<compile_context>
chip_gen: v6e
topology: v6e:2x2x1
jax: 0.10.0
libtpu: 0.0.40
codegen_flags: <defaults>
</compile_context>

<pallas_src>
import functools

import jax
import jax.numpy as jnp
from jax.experimental import pallas as pl
from jax.experimental.pallas import tpu as pltpu


# ----------------------------------------------------------------------------
# Kernel
# ----------------------------------------------------------------------------
def _lif_deg_feat_kernel(deg_ref, dv_ref, vprev_ref, vth_ref,
                         spike_ref, vout_ref, *, inv_tau, v_reset):
    # Leaky integration (multiply by trace-time 1/tau instead of dividing).
    dv = dv_ref[...].astype(jnp.float32)                 # (tN, tS)
    v_prev = vprev_ref[...].astype(jnp.float32)          # (tN, tS)
    v = v_prev + (dv - (v_prev - v_reset)) * inv_tau

    # Per-node threshold gather via one-hot matmul on the MXU:
    #   thresh[n, :] = v_threshold[degree[n], :]
    # Precision.HIGHEST keeps the selected f32 thresholds bit-exact.
    bins = vth_ref.shape[0]
    tn = deg_ref.shape[0]
    # Clamp defensively: out-of-range bins (and garbage rows of the masked
    # partial last tile) never index outside [0, bins).
    deg = jnp.clip(deg_ref[...], 0, bins - 1)                       # (tN, 1)
    bin_iota = jax.lax.broadcasted_iota(jnp.int32, (tn, bins), 1)
    onehot = (deg == bin_iota).astype(jnp.float32)                  # (tN, bins)
    thresh = jnp.dot(onehot, vth_ref[...].astype(jnp.float32),
                     preferred_element_type=jnp.float32,
                     precision=jax.lax.Precision.HIGHEST)           # (tN, tS)

    # Heaviside forward of the surrogate + fused soft reset (single select).
    mask = v > thresh
    spike_ref[...] = mask.astype(spike_ref.dtype)
    vout_ref[...] = jnp.where(mask, jnp.float32(v_reset), v).astype(vout_ref.dtype)


# ----------------------------------------------------------------------------
# Sizing helpers
# ----------------------------------------------------------------------------
def _round_up(x, m):
    return -(-x // m) * m


def _tensorcore_count():
    """TensorCores per device (gates the single-tile megacore split). Max 2."""
    try:
        info = pltpu.get_tpu_info()
        for attr in ("num_cores", "core_count", "num_tensorcores", "tensorcore_count"):
            n = getattr(info, attr, None)
            if isinstance(n, int) and n > 0:
                return max(1, min(int(n), 2))
    except Exception:
        pass
    try:
        dev = jax.devices()[0]
        for attr in ("num_cores", "core_count"):
            n = getattr(dev, attr, None)
            if isinstance(n, int) and n > 0:
                return max(1, min(int(n), 2))
        kind = str(getattr(dev, "device_kind", "")).lower()
        if ("v7" in kind) or ("v4" in kind) or ("v5p" in kind):
            return 2
    except Exception:
        pass
    return 1  # conservative: never split a single-tile problem on 1-TC chips


def _tpu_vmem_capacity_bytes():
    try:
        cap = getattr(pltpu.get_tpu_info(), "vmem_capacity_bytes", None)
        if isinstance(cap, int) and cap > 0:
            return cap
    except Exception:
        pass
    return 128 << 20


def _choose_tiles(n_rows, s_cols, dv_bytes, v_bytes, spike_bytes,
                  num_cores, vmem_cap):
    """Pick (tile_n, tile_s) against a per-chip VMEM budget."""
    # Feature tile: lane-dense, at most 2048 lanes per block.
    max_tile_s = 2048
    tile_s = s_cols if s_cols <= max_tile_s else max_tile_s

    # 128 MiB chips (v5e/v6e) get a generous budget; 64 MiB (v7x) conservative.
    budget = (56 << 20) if vmem_cap >= (100 << 20) else (20 << 20)

    # Double-buffered streamed blocks per row ...
    per_row = 2 * (dv_bytes + 2 * v_bytes + spike_bytes) * tile_s
    # ... plus in-kernel f32 temporaries (v, thresh, spike, v_out ~= 4 tiles,
    # onehot lane-padded) and the lane-padded degree block.
    per_row += 4 * 4 * tile_s + 4 * 128 + 2 * 128 * 4

    cap = max(8, budget // per_row)
    tile_n = int(min(1024, cap, _round_up(n_rows, 8)))
    tile_n = max(8, (tile_n // 8) * 8)                  # sublane multiple

    # Only split a single-step problem when the chip actually has >1 TC.
    n_steps = pl.cdiv(n_rows, tile_n) * pl.cdiv(s_cols, tile_s)
    if num_cores >= 2 and n_steps < num_cores and n_rows > 8:
        tile_n = max(8, _round_up(pl.cdiv(n_rows, num_cores), 8))
    return tile_n, tile_s


# ----------------------------------------------------------------------------
# Wrapper
# ----------------------------------------------------------------------------
def lif_deg_feat_forward(dv, degree, v_prev, v_threshold,
                         *, tau=1.0, v_reset=0.0,
                         spike_dtype=jnp.float32, tile_n=None, tile_s=None):
    """One forward step of LIF_deg_feat.

    dv:          (N, S) float   input currents
    degree:      (N,) or (N,1) int  bin index per node, in [0, bins)
    v_prev:      (N, S) float   membrane potential state (0 after reset)
    v_threshold: (bins, S) float

    Returns (spike, v_new). spike has dtype `spike_dtype` ({0,1}-valued);
    v_new has the dtype of v_prev and is aliased in place onto it.
    """
    N, S = dv.shape
    bins = v_threshold.shape[0]
    assert v_threshold.shape[1] == S and v_prev.shape == (N, S)

    v_dtype = v_prev.dtype

    # Feature axis must be lane-dense; pad only in the uncommon misaligned case
    # (prefer S % 128 == 0 upstream so this memory-bound kernel streams no pad).
    S_pad = _round_up(S, 128)
    if S_pad != S:
        dv = jnp.pad(dv, ((0, 0), (0, S_pad - S)))
        v_prev = jnp.pad(v_prev, ((0, 0), (0, S_pad - S)))
        v_threshold = jnp.pad(v_threshold, ((0, 0), (0, S_pad - S)))

    deg2 = jnp.reshape(degree.astype(jnp.int32), (N, 1))
    vth = v_threshold.astype(jnp.float32)

    num_cores = _tensorcore_count()
    vmem_cap = _tpu_vmem_capacity_bytes()
    dv_bytes = jnp.dtype(dv.dtype).itemsize
    v_bytes = jnp.dtype(v_dtype).itemsize
    spike_bytes = jnp.dtype(spike_dtype).itemsize

    auto_tn, auto_ts = _choose_tiles(N, S_pad, dv_bytes, v_bytes, spike_bytes,
                                     num_cores, vmem_cap)
    tile_n = auto_tn if tile_n is None else tile_n
    tile_s = auto_ts if tile_s is None else tile_s

    grid = (pl.cdiv(N, tile_n), pl.cdiv(S_pad, tile_s))

    # Per-step VMEM: double-buffered streams + resident threshold + degree block
    # + in-kernel f32 temporaries; raise the scoped limit with headroom but stay
    # well inside v7x's 64 MiB physical VMEM (96 MiB cap on 128 MiB chips).
    est_vmem = (2 * tile_n * tile_s * (dv_bytes + 2 * v_bytes + spike_bytes)
                + 2 * bins * tile_s * 4
                + 2 * tile_n * 128 * 4
                + 4 * tile_n * tile_s * 4       # v, thresh, spike, v_out temps
                + tile_n * 128 * 4)             # onehot (lane-padded bins)
    cap_limit = (96 << 20) if vmem_cap >= (100 << 20) else (48 << 20)
    vmem_limit = int(min(cap_limit, max(32 << 20, int(est_vmem * 1.25))))

    kernel = functools.partial(_lif_deg_feat_kernel,
                               inv_tau=float(1.0 / tau),
                               v_reset=float(v_reset))

    cost = pl.CostEstimate(
        flops=2 * N * bins * S_pad,                       # one-hot gather matmul
        transcendentals=0,
        bytes_accessed=(N * S_pad * (dv_bytes + 2 * v_bytes + spike_bytes)
                        + bins * S_pad * 4 + N * 4))

    spike, v_new = pl.pallas_call(
        kernel,
        out_shape=(
            jax.ShapeDtypeStruct((N, S_pad), spike_dtype),   # spike
            jax.ShapeDtypeStruct((N, S_pad), v_dtype),       # v_new (state)
        ),
        grid_spec=pltpu.PrefetchScalarGridSpec(
            num_scalar_prefetch=0,
            grid=grid,
            in_specs=[
                pl.BlockSpec((tile_n, 1), lambda i, j: (i, 0)),        # degree
                pl.BlockSpec((tile_n, tile_s), lambda i, j: (i, j)),   # dv
                pl.BlockSpec((tile_n, tile_s), lambda i, j: (i, j)),   # v_prev
                pl.BlockSpec((bins, tile_s), lambda i, j: (0, j)),     # v_threshold
            ],
            out_specs=[
                pl.BlockSpec((tile_n, tile_s), lambda i, j: (i, j)),   # spike
                pl.BlockSpec((tile_n, tile_s), lambda i, j: (i, j)),   # v_new
            ],
        ),
        input_output_aliases={2: 1},   # v_prev -> v_new (in-place state update)
        compiler_params=pltpu.CompilerParams(
            dimension_semantics=("parallel", "parallel"),
            vmem_limit_bytes=vmem_limit),
        cost_estimate=cost,
    )(deg2, dv, v_prev, vth)

    if S_pad != S:   # only in the misaligned fallback path
        spike = spike[:, :S]
        v_new = v_new[:, :S]
    return spike, v_new


# ----------------------------------------------------------------------------
# Self-test
# ----------------------------------------------------------------------------
if __name__ == "__main__":
    key = jax.random.PRNGKey(0)
    k_dv, k_deg, k_vth = jax.random.split(key, 3)

    # Small shapes consistent with the module defaults (ssize=128, bins=20).
    # N = 500 deliberately exercises the partial (masked) last row tile.
    N, ssize, bins = 500, 128, 20
    tau, v_reset, v_th_init = 1.0, 0.0, 0.25

    dv = jax.random.normal(k_dv, (N, ssize), dtype=jnp.float32)
    degree = jax.random.randint(k_deg, (N,), 0, bins, dtype=jnp.int32)
    v_prev = jnp.zeros((N, ssize), dtype=jnp.float32)     # self.v = 0.0 after reset()
    # Deterministic init per __init__ (each bin row = v_threshold) plus a tiny
    # perturbation so the per-degree gather is actually exercised.
    v_threshold = (jnp.full((bins, ssize), v_th_init, dtype=jnp.float32)
                   + 0.01 * jax.random.normal(k_vth, (bins, ssize), dtype=jnp.float32))

    # Pure-JAX reference of the PyTorch forward (computed BEFORE the kernel call
    # because v_prev is donated to make the state update truly in-place).
    def reference(dv, degree, v_prev, v_threshold):
        v = v_prev + (dv - (v_prev - v_reset)) / tau
        thresh = v_threshold[degree]                      # (N, S)
        spike = (v > thresh).astype(jnp.float32)
        v_new = (1.0 - spike) * v + spike * v_reset
        return spike, v_new

    spike_ref, v_ref = reference(dv, degree, v_prev, v_threshold)

    fwd = jax.jit(functools.partial(lif_deg_feat_forward, tau=tau, v_reset=v_reset),
                  donate_argnums=(2,))                    # donate the state buffer
    spike, v_new = fwd(dv, degree, v_prev, v_threshold)
    jax.block_until_ready((spike, v_new))

    assert spike.shape == (N, ssize) and v_new.shape == (N, ssize)
    assert jnp.array_equal(spike, spike_ref.astype(spike.dtype)), "spike mismatch"
    assert jnp.allclose(v_new, v_ref, atol=1e-6), "v state mismatch"

    print("KERNEL_OK")
</pallas_src>

<mosaic_0001>
module attributes {stable_mosaic.version = 11 : i64} {
  func.func @_lif_deg_feat_kernel(%arg0: i32, %arg1: i32, %arg2: memref<504x1xi32, #tpu.memory_space<vmem>>, %arg3: memref<504x128xf32, #tpu.memory_space<vmem>>, %arg4: memref<504x128xf32, #tpu.memory_space<vmem>>, %arg5: memref<20x128xf32, #tpu.memory_space<vmem>>, %arg6: memref<504x128xf32, #tpu.memory_space<vmem>>, %arg7: memref<504x128xf32, #tpu.memory_space<vmem>>) attributes {dimension_semantics = [#tpu.dimension_semantics<parallel>, #tpu.dimension_semantics<parallel>], iteration_bounds = array<i64: 1, 1>, scalar_prefetch = 0 : i64, scratch_operands = 0 : i64, tpu.core_type = #tpu.core_type<tc>, window_params = [{transform_indices = @transform_0, window_bounds = array<i64: 504, 1>}, {transform_indices = @transform_1, window_bounds = array<i64: 504, 128>}, {transform_indices = @transform_2, window_bounds = array<i64: 504, 128>}, {transform_indices = @transform_3, window_bounds = array<i64: 20, 128>}, {transform_indices = @transform_4, window_bounds = array<i64: 504, 128>}, {transform_indices = @transform_5, window_bounds = array<i64: 504, 128>}]} {
    %c0 = arith.constant 0 : index
    %c0_0 = arith.constant 0 : index
    %0 = vector.load %arg3[%c0, %c0_0] : memref<504x128xf32, #tpu.memory_space<vmem>>, vector<504x128xf32>
    %c0_1 = arith.constant 0 : index
    %c0_2 = arith.constant 0 : index
    %1 = vector.load %arg4[%c0_1, %c0_2] : memref<504x128xf32, #tpu.memory_space<vmem>>, vector<504x128xf32>
    %cst = arith.constant 0.000000e+00 : f32
    %2 = vector.broadcast %cst : f32 to vector<504x128xf32>
    %3 = arith.subf %1, %2 : vector<504x128xf32>
    %4 = arith.subf %0, %3 : vector<504x128xf32>
    %cst_3 = arith.constant 1.000000e+00 : f32
    %5 = vector.broadcast %cst_3 : f32 to vector<504x128xf32>
    %6 = arith.mulf %4, %5 : vector<504x128xf32>
    %7 = arith.addf %1, %6 : vector<504x128xf32>
    %c0_4 = arith.constant 0 : index
    %c0_5 = arith.constant 0 : index
    %8 = vector.load %arg2[%c0_4, %c0_5] : memref<504x1xi32, #tpu.memory_space<vmem>>, vector<504x1xi32>
    %c0_i32 = arith.constant 0 : i32
    %c19_i32 = arith.constant 19 : i32
    %9 = vector.broadcast %c0_i32 : i32 to vector<504x1xi32>
    %10 = arith.maxsi %9, %8 : vector<504x1xi32>
    %11 = vector.broadcast %c19_i32 : i32 to vector<504x1xi32>
    %12 = arith.minsi %11, %10 : vector<504x1xi32>
    %13 = tpu.iota {dimensions = array<i32: 1>} : vector<504x20xi32>
    %14 = vector.broadcast %12 : vector<504x1xi32> to vector<504x20xi32>
    %15 = arith.cmpi eq, %14, %13 : vector<504x20xi32>
    %16 = arith.extui %15 : vector<504x20xi1> to vector<504x20xi32>
    %17 = arith.sitofp %16 : vector<504x20xi32> to vector<504x20xf32>
    %c0_6 = arith.constant 0 : index
    %c0_7 = arith.constant 0 : index
    %18 = vector.load %arg5[%c0_6, %c0_7] : memref<20x128xf32, #tpu.memory_space<vmem>>, vector<20x128xf32>
    %cst_8 = arith.constant dense<0.000000e+00> : vector<504x128xf32>
    %19 = tpu.matmul %17, %18, %cst_8 {dimension_numbers = #tpu.dot_dimension_numbers<[1], [0], [0], [1], [0, 0, 1, 1], [], []>, precision = #tpu.contract_precision<fp32>} : vector<504x20xf32>, vector<20x128xf32>, vector<504x128xf32> -> vector<504x128xf32>
    %20 = arith.cmpf ogt, %7, %19 : vector<504x128xf32>
    %21 = arith.extui %20 : vector<504x128xi1> to vector<504x128xi32>
    %22 = arith.sitofp %21 : vector<504x128xi32> to vector<504x128xf32>
    %c0_9 = arith.constant 0 : index
    %c0_10 = arith.constant 0 : index
    %23 = vector.load %arg6[%c0_9, %c0_10] : memref<504x128xf32, #tpu.memory_space<vmem>>, vector<504x128xf32>
    tpu.vector_store %arg6[%c0_9, %c0_10], %22 {strides = array<i32>} : memref<504x128xf32, #tpu.memory_space<vmem>>, vector<504x128xf32>,
    %cst_11 = arith.constant 0.000000e+00 : f32
    %24 = vector.broadcast %cst_11 : f32 to vector<504x128xf32>
    %25 = arith.select %20, %24, %7 : vector<504x128xi1>, vector<504x128xf32>
    %c0_12 = arith.constant 0 : index
    %c0_13 = arith.constant 0 : index
    %26 = vector.load %arg7[%c0_12, %c0_13] : memref<504x128xf32, #tpu.memory_space<vmem>>, vector<504x128xf32>
    tpu.vector_store %arg7[%c0_12, %c0_13], %25 {strides = array<i32>} : memref<504x128xf32, #tpu.memory_space<vmem>>, vector<504x128xf32>,
    return
  }
  func.func @transform_0(%arg0: i32, %arg1: i32) -> (i32, i32) {
    %c0_i32 = arith.constant 0 : i32
    %c0_i32_0 = arith.constant 0 : i32
    return %arg0, %c0_i32 : i32, i32
  }
  func.func @transform_1(%arg0: i32, %arg1: i32) -> (i32, i32) {
    %c0_i32 = arith.constant 0 : i32
    return %arg0, %arg1 : i32, i32
  }
  func.func @transform_2(%arg0: i32, %arg1: i32) -> (i32, i32) {
    %c0_i32 = arith.constant 0 : i32
    return %arg0, %arg1 : i32, i32
  }
  func.func @transform_3(%arg0: i32, %arg1: i32) -> (i32, i32) {
    %c0_i32 = arith.constant 0 : i32
    %c0_i32_0 = arith.constant 0 : i32
    return %c0_i32, %arg1 : i32, i32
  }
  func.func @transform_4(%arg0: i32, %arg1: i32) -> (i32, i32) {
    %c0_i32 = arith.constant 0 : i32
    return %arg0, %arg1 : i32, i32
  }
  func.func @transform_5(%arg0: i32, %arg1: i32) -> (i32, i32) {
    %c0_i32 = arith.constant 0 : i32
    return %arg0, %arg1 : i32, i32
  }
}

</mosaic_0001>

<bundles_post_ra>
// kernel: lif_deg_feat_forward.1
= control target key start
LH: loop header
LB: loop body
LE: loop exit
PB: predicated region body
PF: predicated region fallthrough
CT: control target
= control target key end

     0   :  { %v6611_v3 = vmov 0   ;;  %v6612_v11 = vmov 0.0   ;;  %s10003_s0 = inlined_call_operand.vmem [shape: s32[500,1], index: 0, kind: input, shape index: {}]   ;;  %s10004_s1 = inlined_call_operand.vmem [shape: f32[500,128], index: 1, kind: input, shape index: {}]   ;;  %s10005_s2 = inlined_call_operand.vmem [shape: f32[500,128], index: 2, kind: input, shape index: {}, may-alias: {2,5}]   ;;  %s10006_s3 = inlined_call_operand.vmem [shape: f32[20,128], index: 3, kind: input, shape index: {}]   ;;  %s10007_s4 = inlined_call_operand.hbm [shape: f32[500,128], index: 4, kind: output, shape index: {0}]   ;;  %s10008_s5 = inlined_call_operand.vmem [shape: f32[500,128], index: 5, kind: output, shape index: {1}, may-alias: {2,5}]  }
   0x1   :  { %v274_v0 = vld [vmem:[%s10003_s0 + $0x10] sm:$0xff]  ;;  %v272_v1 = vld [vmem:[%s10003_s0] sm:$0xff]  ;;  %v275_v2 = vld [vmem:[%s10003_s0 + $0x18] sm:$0xff]  ;;  %6588 = vset.pattern.permute.xlu1 %v6611_v3  ;;  %6587 = vset.pattern.permute.xlu0 %v6611_v3 }
   0x2   :  { %vm339_vm0 = vcmp.gt.s32.totalorder %v274_v0, 0  ;;  %vm335_vm1 = vcmp.gt.s32.totalorder %v272_v1, 0  ;;  %vm341_vm2 = vcmp.gt.s32.totalorder %v275_v2, 0  ;;  %v273_v4 = vld [vmem:[%s10003_s0 + $0x8] sm:$0xff]  ;;  %v276_v9 = vld [vmem:[%s10003_s0 + $0x20] sm:$0xff]  ;;  %v279_v10 = vld [vmem:[%s10003_s0 + $0x38] sm:$0xff]  ;;  %5606 = vmatprep.subr.mxu1 %v6612_v11  ;;  %5411 = vmatprep.subr.mxu0 %v6612_v11 }
   0x3   :  { %v277_v5 = vld [vmem:[%s10003_s0 + $0x28] sm:$0xff]  ;;  %v340_v6 = vsel %vm339_vm0, %v274_v0, 0  ;;  %v336_v7 = vsel %vm335_vm1, %v272_v1, 0  ;;  %v342_v8 = vsel %vm341_vm2, %v275_v2, 0  ;;  %vm337_vm3 = vcmp.gt.s32.totalorder %v273_v4, 0  ;;  %v278_v13 = vld [vmem:[%s10003_s0 + $0x30] sm:$0xff] }
   0x4   :  { %vm465_vm4 = vcmp.lt.s32.totalorder %v340_v6, 19  ;;  %vm461_vm5 = vcmp.lt.s32.totalorder %v336_v7, 19  ;;  %vm467_vm6 = vcmp.lt.s32.totalorder %v342_v8, 19  ;;  %v338_v12 = vsel %vm337_vm3, %v273_v4, 0  ;;  %v281_v20 = vld [vmem:[%s10003_s0 + $0x48] sm:$0xff]  ;;  %v280_v21 = vld [vmem:[%s10003_s0 + $0x40] sm:$0xff] }
   0x5   :  { %v466_v14 = vsel %vm465_vm4, %v340_v6, 19  ;;  %v462_v15 = vsel %vm461_vm5, %v336_v7, 19  ;;  %vm463_vm7 = vcmp.lt.s32.totalorder %v338_v12, 19  ;;  %v468_v16 = vsel %vm467_vm6, %v342_v8, 19  ;;  %v283_v26 = vld [vmem:[%s10003_s0 + $0x58] sm:$0xff]  ;;  %v282_v27 = vld [vmem:[%s10003_s0 + $0x50] sm:$0xff] }
   0x6   :  { %596 = vperm.xlu1 %6588, %v466_v14   ;;  %590 = vperm.xlu0 %6587, %v462_v15   ;;  %vm345_vm8 = vcmp.gt.s32.totalorder %v277_v5, 0  ;;  %vm343_vm9 = vcmp.gt.s32.totalorder %v276_v9, 0  ;;  %vm349_vm10 = vcmp.gt.s32.totalorder %v279_v10, 0  ;;  %v464_v17 = vsel %vm463_vm7, %v338_v12, 19  ;;  %v285_v32 = vld [vmem:[%s10003_s0 + $0x68] sm:$0xff]  ;;  %v284_v33 = vld [vmem:[%s10003_s0 + $0x60] sm:$0xff] }
   0x7   :  { %v346_v18 = vsel %vm345_vm8, %v277_v5, 0  ;;  %v344_v19 = vsel %vm343_vm9, %v276_v9, 0  ;;  %vm347_vm11 = vcmp.gt.s32.totalorder %v278_v13, 0  ;;  %v350_v22 = vsel %vm349_vm10, %v279_v10, 0  ;;  %v287_v38 = vld [vmem:[%s10003_s0 + $0x78] sm:$0xff]  ;;  %v286_v39 = vld [vmem:[%s10003_s0 + $0x70] sm:$0xff] }
   0x8   :  { %vm471_vm12 = vcmp.lt.s32.totalorder %v346_v18, 19  ;;  %vm469_vm13 = vcmp.lt.s32.totalorder %v344_v19, 19  ;;  %v348_v23 = vsel %vm347_vm11, %v278_v13, 0  ;;  %vm353_vm14 = vcmp.gt.s32.totalorder %v281_v20, 0  ;;  %v289_v44 = vld [vmem:[%s10003_s0 + $0x88] sm:$0xff]  ;;  %v288_v45 = vld [vmem:[%s10003_s0 + $0x80] sm:$0xff] }
   0x9   :  { %vm351_vm15 = vcmp.gt.s32.totalorder %v280_v21, 0  ;;  %v472_v24 = vsel %vm471_vm12, %v346_v18, 19  ;;  %v470_v25 = vsel %vm469_vm13, %v344_v19, 19  ;;  %vm475_vm0 = vcmp.lt.s32.totalorder %v350_v22, 19  ;;  %v291_v50 = vld [vmem:[%s10003_s0 + $0x98] sm:$0xff]  ;;  %v290_v51 = vld [vmem:[%s10003_s0 + $0x90] sm:$0xff] }
   0xa   :  { %599 = vperm.xlu1 %6588, %v468_v16   ;;  %593 = vperm.xlu0 %6587, %v464_v17   ;;  %vm473_vm1 = vcmp.lt.s32.totalorder %v348_v23, 19  ;;  %v354_v28 = vsel %vm353_vm14, %v281_v20, 0  ;;  %v352_v29 = vsel %vm351_vm15, %v280_v21, 0  ;;  %vm357_vm2 = vcmp.gt.s32.totalorder %v283_v26, 0  ;;  %v293_v56 = vld [vmem:[%s10003_s0 + $0xa8] sm:$0xff]  ;;  %v292_v57 = vld [vmem:[%s10003_s0 + $0xa0] sm:$0xff] }
   0xb   :  { %vm355_vm3 = vcmp.gt.s32.totalorder %v282_v27, 0  ;;  %v476_v30 = vsel %vm475_vm0, %v350_v22, 19  ;;  %v474_v31 = vsel %vm473_vm1, %v348_v23, 19  ;;  %vm479_vm4 = vcmp.lt.s32.totalorder %v354_v28, 19 }
   0xc   :  { %vm477_vm5 = vcmp.lt.s32.totalorder %v352_v29, 19  ;;  %v358_v34 = vsel %vm357_vm2, %v283_v26, 0  ;;  %v356_v35 = vsel %vm355_vm3, %v282_v27, 0  ;;  %vm361_vm6 = vcmp.gt.s32.totalorder %v285_v32, 0 }
   0xd   :  { %vm359_vm7 = vcmp.gt.s32.totalorder %v284_v33, 0  ;;  %v480_v36 = vsel %vm479_vm4, %v354_v28, 19  ;;  %v478_v37 = vsel %vm477_vm5, %v352_v29, 19  ;;  %vm483_vm8 = vcmp.lt.s32.totalorder %v358_v34, 19 }
   0xe   :  { %605 = vperm.xlu1 %6588, %v472_v24   ;;  %602 = vperm.xlu0 %6587, %v470_v25   ;;  %vm481_vm9 = vcmp.lt.s32.totalorder %v356_v35, 19  ;;  %v362_v40 = vsel %vm361_vm6, %v285_v32, 0  ;;  %v360_v41 = vsel %vm359_vm7, %v284_v33, 0  ;;  %vm365_vm10 = vcmp.gt.s32.totalorder %v287_v38, 0 }
   0xf   :  { %vm363_vm11 = vcmp.gt.s32.totalorder %v286_v39, 0  ;;  %v484_v42 = vsel %vm483_vm8, %v358_v34, 19  ;;  %v482_v43 = vsel %vm481_vm9, %v356_v35, 19  ;;  %vm487_vm12 = vcmp.lt.s32.totalorder %v362_v40, 19 }
  0x10   :  { %vm485_vm13 = vcmp.lt.s32.totalorder %v360_v41, 19  ;;  %v366_v46 = vsel %vm365_vm10, %v287_v38, 0  ;;  %v364_v47 = vsel %vm363_vm11, %v286_v39, 0  ;;  %vm369_vm14 = vcmp.gt.s32.totalorder %v289_v44, 0 }
  0x11   :  { %vm367_vm15 = vcmp.gt.s32.totalorder %v288_v45, 0  ;;  %v488_v48 = vsel %vm487_vm12, %v362_v40, 19  ;;  %v486_v49 = vsel %vm485_vm13, %v360_v41, 19  ;;  %vm491_vm0 = vcmp.lt.s32.totalorder %v366_v46, 19 }
  0x12   :  { %611 = vperm.xlu1 %6588, %v476_v30   ;;  %608 = vperm.xlu0 %6587, %v474_v31   ;;  %vm489_vm1 = vcmp.lt.s32.totalorder %v364_v47, 19  ;;  %v370_v52 = vsel %vm369_vm14, %v289_v44, 0  ;;  %v368_v53 = vsel %vm367_vm15, %v288_v45, 0  ;;  %vm373_vm2 = vcmp.gt.s32.totalorder %v291_v50, 0 }
  0x13   :  { %vm371_vm3 = vcmp.gt.s32.totalorder %v290_v51, 0  ;;  %v492_v54 = vsel %vm491_vm0, %v366_v46, 19  ;;  %v490_v55 = vsel %vm489_vm1, %v364_v47, 19  ;;  %vm495_vm4 = vcmp.lt.s32.totalorder %v370_v52, 19 }
  0x14   :  { %vm493_vm5 = vcmp.lt.s32.totalorder %v368_v53, 19  ;;  %v374_v58 = vsel %vm373_vm2, %v291_v50, 0  ;;  %v372_v59 = vsel %vm371_vm3, %v290_v51, 0  ;;  %vm377_vm6 = vcmp.gt.s32.totalorder %v293_v56, 0 }
  0x15   :  { %vm375_vm7 = vcmp.gt.s32.totalorder %v292_v57, 0 }
  0x16   :  { %617 = vperm.xlu1 %6588, %v480_v36   ;;  %614 = vperm.xlu0 %6587, %v478_v37  }
  0x1a   :  { %623 = vperm.xlu1 %6588, %v484_v42   ;;  %620 = vperm.xlu0 %6587, %v482_v43  }
  0x1e   :  { %629 = vperm.xlu1 %6588, %v488_v48   ;;  %626 = vperm.xlu0 %6587, %v486_v49  }
  0x22   :  { %635 = vperm.xlu1 %6588, %v492_v54   ;;  %632 = vperm.xlu0 %6587, %v490_v55  }
  0x23   :  { %11 = vsyncpa [#allocation3], 0  ;;  %v496_v60 = vsel %vm495_vm4, %v370_v52, 19  ;;  %v494_v61 = vsel %vm493_vm5, %v368_v53, 19  ;;  %v295_v62 = vld [vmem:[%s10003_s0 + $0xb8] sm:$0xff]  ;;  %v294_v63 = vld [vmem:[%s10003_s0 + $0xb0] sm:$0xff] }
  0x24   :  { %vm499_vm8 = vcmp.lt.s32.totalorder %v374_v58, 19  ;;  %vm497_vm9 = vcmp.lt.s32.totalorder %v372_v59, 19  ;;  %v378_v0 = vsel %vm377_vm6, %v293_v56, 0  ;;  %v376_v1 = vsel %vm375_vm7, %v292_v57, 0  ;;  %v297_v4 = vld [vmem:[%s10003_s0 + $0xc8] sm:$0xff]  ;;  %v296_v5 = vld [vmem:[%s10003_s0 + $0xc0] sm:$0xff] }
  0x25   :  { %vm381_vm10 = vcmp.gt.s32.totalorder %v295_v62, 0  ;;  %vm379_vm11 = vcmp.gt.s32.totalorder %v294_v63, 0  ;;  %v500_v2 = vsel %vm499_vm8, %v374_v58, 19  ;;  %v498_v3 = vsel %vm497_vm9, %v372_v59, 19  ;;  %v299_v10 = vld [vmem:[%s10003_s0 + $0xd8] sm:$0xff]  ;;  %v298_v12 = vld [vmem:[%s10003_s0 + $0xd0] sm:$0xff] }
  0x26   :  { %641 = vperm.xlu1 %6588, %v496_v60   ;;  %638 = vperm.xlu0 %6587, %v494_v61   ;;  %vm503_vm12 = vcmp.lt.s32.totalorder %v378_v0, 19  ;;  %vm501_vm13 = vcmp.lt.s32.totalorder %v376_v1, 19  ;;  %v382_v6 = vsel %vm381_vm10, %v295_v62, 0  ;;  %v380_v7 = vsel %vm379_vm11, %v294_v63, 0  ;;  %v301_v17 = vld [vmem:[%s10003_s0 + $0xe8] sm:$0xff]  ;;  %v300_v18 = vld [vmem:[%s10003_s0 + $0xe0] sm:$0xff] }
  0x27   :  { %vm385_vm14 = vcmp.gt.s32.totalorder %v297_v4, 0  ;;  %vm383_vm15 = vcmp.gt.s32.totalorder %v296_v5, 0  ;;  %v504_v8 = vsel %vm503_vm12, %v378_v0, 19  ;;  %v502_v9 = vsel %vm501_vm13, %v376_v1, 19  ;;  %v303_v23 = vld [vmem:[%s10003_s0 + $0xf8] sm:$0xff]  ;;  %v302_v24 = vld [vmem:[%s10003_s0 + $0xf0] sm:$0xff] }
  0x28   :  { %vm507_vm0 = vcmp.lt.s32.totalorder %v382_v6, 19  ;;  %vm505_vm1 = vcmp.lt.s32.totalorder %v380_v7, 19  ;;  %v386_v13 = vsel %vm385_vm14, %v297_v4, 0  ;;  %v384_v14 = vsel %vm383_vm15, %v296_v5, 0  ;;  %v305_v29 = vld [vmem:[%s10003_s0 + $0x108] sm:$0xff]  ;;  %v304_v30 = vld [vmem:[%s10003_s0 + $0x100] sm:$0xff] }
  0x29   :  { %vm389_vm2 = vcmp.gt.s32.totalorder %v299_v10, 0  ;;  %vm387_vm3 = vcmp.gt.s32.totalorder %v298_v12, 0  ;;  %v508_v15 = vsel %vm507_vm0, %v382_v6, 19  ;;  %v506_v16 = vsel %vm505_vm1, %v380_v7, 19  ;;  %v307_v35 = vld [vmem:[%s10003_s0 + $0x118] sm:$0xff]  ;;  %v306_v36 = vld [vmem:[%s10003_s0 + $0x110] sm:$0xff] }
  0x2a   :  { %647 = vperm.xlu1 %6588, %v500_v2   ;;  %644 = vperm.xlu0 %6587, %v498_v3   ;;  %vm511_vm4 = vcmp.lt.s32.totalorder %v386_v13, 19  ;;  %vm509_vm5 = vcmp.lt.s32.totalorder %v384_v14, 19  ;;  %v390_v19 = vsel %vm389_vm2, %v299_v10, 0  ;;  %v388_v20 = vsel %vm387_vm3, %v298_v12, 0  ;;  %v969_v37 = vld [vmem:[%s10006_s3 + $0x10] sm:$0xf] }
  0x2b   :  { %vm393_vm6 = vcmp.gt.s32.totalorder %v301_v17, 0  ;;  %vm391_vm7 = vcmp.gt.s32.totalorder %v300_v18, 0  ;;  %v512_v21 = vsel %vm511_vm4, %v386_v13, 19  ;;  %v510_v22 = vsel %vm509_vm5, %v384_v14, 19  ;;  %v968_v38 = vld [vmem:[%s10006_s3 + $0x8] sm:$0xff]  ;;  %v308_v45 = vld [vmem:[%s10003_s0 + $0x120] sm:$0xff] }
  0x2c   :  { %vm515_vm8 = vcmp.lt.s32.totalorder %v390_v19, 19  ;;  %vm513_vm9 = vcmp.lt.s32.totalorder %v388_v20, 19  ;;  %v394_v25 = vsel %vm393_vm6, %v301_v17, 0  ;;  %v392_v26 = vsel %vm391_vm7, %v300_v18, 0  ;;  %v309_v41 = vld [vmem:[%s10003_s0 + $0x128] sm:$0xff]  ;;  %v967_v48 = vld [vmem:[%s10006_s3] sm:$0xff] }
  0x2d   :  { %vm397_vm10 = vcmp.gt.s32.totalorder %v303_v23, 0  ;;  %vm395_vm11 = vcmp.gt.s32.totalorder %v302_v24, 0  ;;  %v516_v27 = vsel %vm515_vm8, %v390_v19, 19  ;;  %v514_v28 = vsel %vm513_vm9, %v388_v20, 19  ;;  %v311_v56 = vld [vmem:[%s10003_s0 + $0x138] sm:$0xff]  ;;  %v310_v57 = vld [vmem:[%s10003_s0 + $0x130] sm:$0xff] }
  0x2e   :  { %653 = vperm.xlu1 %6588, %v504_v8   ;;  %650 = vperm.xlu0 %6587, %v502_v9   ;;  %vm519_vm12 = vcmp.lt.s32.totalorder %v394_v25, 19  ;;  %vm517_vm13 = vcmp.lt.s32.totalorder %v392_v26, 19  ;;  %v398_v31 = vsel %vm397_vm10, %v303_v23, 0  ;;  %v396_v32 = vsel %vm395_vm11, %v302_v24, 0  ;;  %v313_v4 = vld [vmem:[%s10003_s0 + $0x148] sm:$0xff]  ;;  %v312_v5 = vld [vmem:[%s10003_s0 + $0x140] sm:$0xff] }
  0x2f   :  { %vm401_vm14 = vcmp.gt.s32.totalorder %v305_v29, 0  ;;  %vm399_vm15 = vcmp.gt.s32.totalorder %v304_v30, 0  ;;  %vm1160_vm0 = vcmask 1043456   ;;  %v520_v33 = vsel %vm519_vm12, %v394_v25, 19  ;;  %v315_v14 = vld [vmem:[%s10003_s0 + $0x158] sm:$0xff] }
  0x30   :  { %v518_v34 = vsel %vm517_vm13, %v392_v26, 19  ;;  %vm523_vm1 = vcmp.lt.s32.totalorder %v398_v31, 19  ;;  %vm521_vm2 = vcmp.lt.s32.totalorder %v396_v32, 19  ;;  %v402_v39 = vsel %vm401_vm14, %v305_v29, 0 }
  0x31   :  { %v400_v40 = vsel %vm399_vm15, %v304_v30, 0  ;;  %vm405_vm3 = vcmp.gt.s32.totalorder %v307_v35, 0  ;;  %vm403_vm4 = vcmp.gt.s32.totalorder %v306_v36, 0  ;;  %v1162_v42 = vsel %vm1160_vm0, %v969_v37, 0 }
  0x32   :  { %659 = vperm.xlu1 %6588, %v508_v15   ;;  %656 = vperm.xlu0 %6587, %v506_v16   ;;  %v524_v43 = vsel %vm523_vm1, %v398_v31, 19  ;;  %v522_v44 = vsel %vm521_vm2, %v396_v32, 19  ;;  %v6770_v46 = vand.u32 4294901760, %v1162_v42  ;;  %v6772_v47 = vand.u32 4294901760, %v968_v38  ;;  %v314_v15 = vld [vmem:[%s10003_s0 + $0x150] sm:$0xff] }
  0x33   :  { %vm527_vm5 = vcmp.lt.s32.totalorder %v402_v39, 19  ;;  %vm525_vm6 = vcmp.lt.s32.totalorder %v400_v40, 19  ;;  %v406_v49 = vsel %vm405_vm3, %v307_v35, 0  ;;  %v404_v50 = vsel %vm403_vm4, %v306_v36, 0 }
  0x34   :  { %v6778_v51 = vsub.f32 %v1162_v42, %v6770_v46  ;;  %v6781_v52 = vsub.f32 %v968_v38, %v6772_v47  ;;  %5412 = vmatpush3.msra.mxu0 %v6770_v46  ;;  %vm409_vm7 = vcmp.gt.s32.totalorder %v309_v41, 0  ;;  %vm407_vm8 = vcmp.gt.s32.totalorder %v308_v45, 0 }
  0x35   :  { %v6784_v53 = vand.u32 4294901760, %v967_v48  ;;  %v528_v54 = vsel %vm527_vm5, %v402_v39, 19  ;;  %v526_v55 = vsel %vm525_vm6, %v400_v40, 19  ;;  %vm6613_vm9 = vmmov 0   ;;  %5413 = vmatprep.subr.mxu0 %v6612_v11  ;;  %v323_v39 = vld [vmem:[%s10003_s0 + $0x198] sm:$0xff]  ;;  %v322_v40 = vld [vmem:[%s10003_s0 + $0x190] sm:$0xff] }
  0x36   :  { %665 = vperm.xlu1 %6588, %v512_v21   ;;  %662 = vperm.xlu0 %6587, %v510_v22   ;;  %v10027_v58 = vand.u32 4294901760, %v6778_v51  ;;  %v10024_v59 = vand.u32 4294901760, %v6781_v52  ;;  %vm531_vm10 = vcmp.lt.s32.totalorder %v406_v49, 19  ;;  %vm529_vm11 = vcmp.lt.s32.totalorder %v404_v50, 19  ;;  %v317_v21 = vld [vmem:[%s10003_s0 + $0x168] sm:$0xff]  ;;  %v316_v22 = vld [vmem:[%s10003_s0 + $0x160] sm:$0xff] }
  0x37   :  { %5612 = vmatprep.mubr.msk.f32.mxu1 %vm6613_vm9, %v6612_v11  ;;  %v6798_v60 = vsub.f32 %v967_v48, %v6784_v53  ;;  %5414 = vmatpush3.msra.mxu0 %v6772_v47  ;;  %v410_v61 = vsel %vm409_vm7, %v309_v41, 0  ;;  %v408_v62 = vsel %vm407_vm8, %v308_v45, 0  ;;  %vm413_vm12 = vcmp.gt.s32.totalorder %v311_v56, 0  ;;  %v325_v45 = vld [vmem:[%s10003_s0 + $0x1a8] sm:$0xff]  ;;  %v324_v48 = vld [vmem:[%s10003_s0 + $0x1a0] sm:$0xff] }
  0x38   :  { %5417 = vmatprep.mubr.msk.f32.mxu0 %vm6613_vm9, %v6612_v11  ;;  %v1892_v63 = vsub.f32 %v6778_v51, %v10027_v58  ;;  %v1899_v0 = vsub.f32 %v6781_v52, %v10024_v59  ;;  %5415 = vmatprep.subr.mxu0 %v6612_v11  ;;  %vm411_vm13 = vcmp.gt.s32.totalorder %v310_v57, 0  ;;  %v532_v2 = vsel %vm531_vm10, %v406_v49, 19 }
  0x39   :  { %v10022_v1 = vand.u32 4294901760, %v6798_v60  ;;  %v530_v3 = vsel %vm529_vm11, %v404_v50, 19  ;;  %5416 = vmatpush3.msra.mxu0 %v6784_v53  ;;  %vm535_vm14 = vcmp.lt.s32.totalorder %v410_v61, 19  ;;  %vm533_vm15 = vcmp.lt.s32.totalorder %v408_v62, 19 }
  0x3a   :  { %671 = vperm.xlu1 %6588, %v516_v27   ;;  %668 = vperm.xlu0 %6587, %v514_v28   ;;  %v1893_v6 = vand.u32 4294901760, %v1892_v63  ;;  %v1900_v7 = vand.u32 4294901760, %v1899_v0  ;;  %v414_v9 = vsel %vm413_vm12, %v311_v56, 0  ;;  %v412_v10 = vsel %vm411_vm13, %v310_v57, 0  ;;  %v319_v27 = vld [vmem:[%s10003_s0 + $0x178] sm:$0xff]  ;;  %v318_v28 = vld [vmem:[%s10003_s0 + $0x170] sm:$0xff] }
  0x3b   :  { %v1906_v8 = vsub.f32 %v6798_v60, %v10022_v1  ;;  %5801 = vmatprep.subr.mxu0 %v6612_v11  ;;  %vm417_vm0 = vcmp.gt.s32.totalorder %v313_v4, 0  ;;  %vm415_vm1 = vcmp.gt.s32.totalorder %v312_v5, 0  ;;  %v536_v12 = vsel %vm535_vm14, %v410_v61, 19  ;;  %v327_v56 = vld [vmem:[%s10003_s0 + $0x1b8] sm:$0xff]  ;;  %v326_v57 = vld [vmem:[%s10003_s0 + $0x1b0] sm:$0xff] }
  0x3c   :  { %5607 = vmatpush3.msra.mxu1 %v1893_v6  ;;  %v534_v13 = vsel %vm533_vm15, %v408_v62, 19  ;;  %vm539_vm2 = vcmp.lt.s32.totalorder %v414_v9, 19  ;;  %vm537_vm3 = vcmp.lt.s32.totalorder %v412_v10, 19  ;;  %v418_v17 = vsel %vm417_vm0, %v313_v4, 0 }
  0x3d   :  { %5608 = vmatprep.subr.mxu1 %v6612_v11  ;;  %v1907_v16 = vand.u32 4294901760, %v1906_v8  ;;  %v416_v18 = vsel %vm415_vm1, %v312_v5, 0  ;;  %vm421_vm4 = vcmp.gt.s32.totalorder %v315_v14, 0  ;;  %vm419_vm5 = vcmp.gt.s32.totalorder %v314_v15, 0  ;;  %v331_v8 = vld [vmem:[%s10003_s0 + $0x1d8] sm:$0xff] }
  0x3e   :  { %677 = vperm.xlu1 %6588, %v520_v33   ;;  %674 = vperm.xlu0 %6587, %v518_v34   ;;  %v540_v19 = vsel %vm539_vm2, %v414_v9, 19  ;;  %v538_v20 = vsel %vm537_vm3, %v412_v10, 19  ;;  %vm543_vm6 = vcmp.lt.s32.totalorder %v418_v17, 19  ;;  %vm541_vm7 = vcmp.lt.s32.totalorder %v416_v18, 19  ;;  %v321_v33 = vld [vmem:[%s10003_s0 + $0x188] sm:$0xff]  ;;  %v320_v34 = vld [vmem:[%s10003_s0 + $0x180] sm:$0xff] }
  0x3f   :  { %5609 = vmatpush3.msra.mxu1 %v1900_v7  ;;  %v422_v23 = vsel %vm421_vm4, %v315_v14, 0  ;;  %v420_v24 = vsel %vm419_vm5, %v314_v15, 0  ;;  %vm425_vm8 = vcmp.gt.s32.totalorder %v317_v21, 0  ;;  %vm423_vm10 = vcmp.gt.s32.totalorder %v316_v22, 0  ;;  %v330_v9 = vld [vmem:[%s10003_s0 + $0x1d0] sm:$0xff]  ;;  %v333_v15 = vld [vmem:[%s10003_s0 + $0x1e8] sm:$0xff] }
  0x40   :  { %5610 = vmatprep.subr.mxu1 %v6612_v11  ;;  %v544_v25 = vsel %vm543_vm6, %v418_v17, 19  ;;  %v542_v26 = vsel %vm541_vm7, %v416_v18, 19  ;;  %vm547_vm11 = vcmp.lt.s32.totalorder %v422_v23, 19  ;;  %vm545_vm12 = vcmp.lt.s32.totalorder %v420_v24, 19 }
  0x41   :  { %5611 = vmatpush3.msra.mxu1 %v1907_v16  ;;  %v426_v29 = vsel %vm425_vm8, %v317_v21, 0  ;;  %v424_v30 = vsel %vm423_vm10, %v316_v22, 0  ;;  %vm429_vm13 = vcmp.gt.s32.totalorder %v319_v27, 0  ;;  %vm427_vm14 = vcmp.gt.s32.totalorder %v318_v28, 0  ;;  %v332_v16 = vld [vmem:[%s10003_s0 + $0x1e0] sm:$0xff]  ;;  %v334_v21 = vld [vmem:[%s10003_s0 + $0x1f0] sm:$0xff] }
  0x42   :  { %683 = vperm.xlu1 %6588, %v524_v43   ;;  %680 = vperm.xlu0 %6587, %v522_v44   ;;  %v548_v31 = vsel %vm547_vm11, %v422_v23, 19  ;;  %v546_v32 = vsel %vm545_vm12, %v420_v24, 19  ;;  %vm551_vm15 = vcmp.lt.s32.totalorder %v426_v29, 19  ;;  %vm549_vm0 = vcmp.lt.s32.totalorder %v424_v30, 19 }
  0x43   :  { %5996 = vmatprep.subr.mxu1 %v6612_v11  ;;  %v430_v35 = vsel %vm429_vm13, %v319_v27, 0  ;;  %v428_v36 = vsel %vm427_vm14, %v318_v28, 0  ;;  %vm433_vm1 = vcmp.gt.s32.totalorder %v321_v33, 0  ;;  %vm431_vm2 = vcmp.gt.s32.totalorder %v320_v34, 0 }
  0x44   :  { %v552_v37 = vsel %vm551_vm15, %v426_v29, 19  ;;  %v550_v38 = vsel %vm549_vm0, %v424_v30, 19  ;;  %vm555_vm3 = vcmp.lt.s32.totalorder %v430_v35, 19  ;;  %vm553_vm4 = vcmp.lt.s32.totalorder %v428_v36, 19 }
  0x45   :  { %v434_v41 = vsel %vm433_vm1, %v321_v33, 0  ;;  %v432_v42 = vsel %vm431_vm2, %v320_v34, 0  ;;  %vm437_vm5 = vcmp.gt.s32.totalorder %v323_v39, 0  ;;  %vm435_vm6 = vcmp.gt.s32.totalorder %v322_v40, 0 }
  0x46   :  { %689 = vperm.xlu1 %6588, %v528_v54   ;;  %686 = vperm.xlu0 %6587, %v526_v55   ;;  %v556_v43 = vsel %vm555_vm3, %v430_v35, 19  ;;  %v554_v44 = vsel %vm553_vm4, %v428_v36, 19  ;;  %vm559_vm7 = vcmp.lt.s32.totalorder %v434_v41, 19  ;;  %vm557_vm8 = vcmp.lt.s32.totalorder %v432_v42, 19 }
  0x47   :  { %v438_v49 = vsel %vm437_vm5, %v323_v39, 0  ;;  %v436_v50 = vsel %vm435_vm6, %v322_v40, 0  ;;  %vm441_vm10 = vcmp.gt.s32.totalorder %v325_v45, 0  ;;  %vm439_vm11 = vcmp.gt.s32.totalorder %v324_v48, 0 }
  0x48   :  { %v560_v54 = vsel %vm559_vm7, %v434_v41, 19  ;;  %v558_v55 = vsel %vm557_vm8, %v432_v42, 19  ;;  %vm563_vm12 = vcmp.lt.s32.totalorder %v438_v49, 19  ;;  %vm561_vm13 = vcmp.lt.s32.totalorder %v436_v50, 19 }
  0x49   :  { %v442_v61 = vsel %vm441_vm10, %v325_v45, 0  ;;  %v440_v62 = vsel %vm439_vm11, %v324_v48, 0  ;;  %vm445_vm14 = vcmp.gt.s32.totalorder %v327_v56, 0  ;;  %vm443_vm15 = vcmp.gt.s32.totalorder %v326_v57, 0 }
  0x4a   :  { %695 = vperm.xlu1 %6588, %v532_v2   ;;  %692 = vperm.xlu0 %6587, %v530_v3   ;;  %v564_v63 = vsel %vm563_vm12, %v438_v49, 19  ;;  %v562_v0 = vsel %vm561_vm13, %v436_v50, 19  ;;  %v329_v2 = vld [vmem:[%s10003_s0 + $0x1c8] sm:$0xff]  ;;  %v328_v3 = vld [vmem:[%s10003_s0 + $0x1c0] sm:$0xff]  ;;  %vm567_vm0 = vcmp.lt.s32.totalorder %v442_v61, 19  ;;  %vm565_vm1 = vcmp.lt.s32.totalorder %v440_v62, 19 }
  0x4b   :  { %v446_v4 = vsel %vm445_vm14, %v327_v56, 0  ;;  %v444_v5 = vsel %vm443_vm15, %v326_v57, 0  ;;  %vm449_vm2 = vcmp.gt.s32.totalorder %v329_v2, 0  ;;  %vm447_vm3 = vcmp.gt.s32.totalorder %v328_v3, 0 }
  0x4c   :  { %v568_v6 = vsel %vm567_vm0, %v442_v61, 19  ;;  %v566_v7 = vsel %vm565_vm1, %v440_v62, 19  ;;  %vm571_vm4 = vcmp.lt.s32.totalorder %v446_v4, 19  ;;  %vm569_vm5 = vcmp.lt.s32.totalorder %v444_v5, 19 }
  0x4d   :  { %v450_v10 = vsel %vm449_vm2, %v329_v2, 0  ;;  %vm453_vm6 = vcmp.gt.s32.totalorder %v331_v8, 0  ;;  %vm451_vm7 = vcmp.gt.s32.totalorder %v330_v9, 0  ;;  %v570_v14 = vsel %vm569_vm5, %v444_v5, 19 }
  0x4e   :  { %701 = vperm.xlu1 %6588, %v536_v12   ;;  %698 = vperm.xlu0 %6587, %v534_v13   ;;  %v448_v12 = vsel %vm447_vm3, %v328_v3, 0  ;;  %v572_v13 = vsel %vm571_vm4, %v446_v4, 19  ;;  %vm575_vm8 = vcmp.lt.s32.totalorder %v450_v10, 19  ;;  %v454_v17 = vsel %vm453_vm6, %v331_v8, 0 }
  0x4f   :  { %vm573_vm10 = vcmp.lt.s32.totalorder %v448_v12, 19  ;;  %v452_v18 = vsel %vm451_vm7, %v330_v9, 0  ;;  %vm457_vm11 = vcmp.gt.s32.totalorder %v333_v15, 0  ;;  %vm455_vm12 = vcmp.gt.s32.totalorder %v332_v16, 0 }
  0x50   :  { %vm579_vm13 = vcmp.lt.s32.totalorder %v454_v17, 19  ;;  %vm577_vm14 = vcmp.lt.s32.totalorder %v452_v18, 19  ;;  %v458_v22 = vsel %vm457_vm11, %v333_v15, 0  ;;  %v456_v23 = vsel %vm455_vm12, %v332_v16, 0 }
  0x51   :  { %vm459_vm15 = vcmp.gt.s32.totalorder %v334_v21, 0  ;;  %v580_v24 = vsel %vm579_vm13, %v454_v17, 19  ;;  %vm583_vm0 = vcmp.lt.s32.totalorder %v458_v22, 19  ;;  %vm581_vm1 = vcmp.lt.s32.totalorder %v456_v23, 19 }
  0x52   :  { %707 = vperm.xlu1 %6588, %v540_v19   ;;  %704 = vperm.xlu0 %6587, %v538_v20   ;;  %v576_v19 = vsel %vm575_vm8, %v450_v10, 19  ;;  %v574_v20 = vsel %vm573_vm10, %v448_v12, 19  ;;  %v587_v27 = vlaneseq  ;;  %v584_v28 = vsel %vm583_vm0, %v458_v22, 19 }
  0x53   :  { %v582_v29 = vsel %vm581_vm1, %v456_v23, 19  ;;  %vm970_vm3 = vcmask 162816  }
  0x54   :  { %v6890_v30 = vand.u32 127, %v587_v27 }
  0x56   :  { %713 = vperm.xlu1 %6588, %v544_v25   ;;  %710 = vperm.xlu0 %6587, %v542_v26   ;;  %v578_v25 = vsel %vm577_vm14, %v452_v18, 19  ;;  %v460_v26 = vsel %vm459_vm15, %v334_v21, 0 }
  0x57   :  { %vm585_vm2 = vcmp.lt.s32.totalorder %v460_v26, 19 }
  0x5a   :  { %719 = vperm.xlu1 %6588, %v548_v31   ;;  %716 = vperm.xlu0 %6587, %v546_v32   ;;  %v586_v31 = vsel %vm585_vm2, %v460_v26, 19 }
  0x5e   :  { %725 = vperm.xlu1 %6588, %v552_v37   ;;  %722 = vperm.xlu0 %6587, %v550_v38  }
  0x62   :  { %731 = vperm.xlu1 %6588, %v556_v43   ;;  %728 = vperm.xlu0 %6587, %v554_v44  }
  0x66   :  { %737 = vperm.xlu1 %6588, %v560_v54   ;;  %734 = vperm.xlu0 %6587, %v558_v55  }
  0x6a   :  { %743 = vperm.xlu1 %6588, %v564_v63   ;;  %740 = vperm.xlu0 %6587, %v562_v0  }
  0x6e   :  { %749 = vperm.xlu1 %6588, %v568_v6   ;;  %746 = vperm.xlu0 %6587, %v566_v7  }
  0x72   :  { %755 = vperm.xlu1 %6588, %v572_v13   ;;  %752 = vperm.xlu0 %6587, %v570_v14  }
  0x76   :  { %761 = vperm.xlu1 %6588, %v576_v19   ;;  %758 = vperm.xlu0 %6587, %v574_v20  }
  0x7a   :  { %767 = vperm.xlu1 %6588, %v580_v24   ;;  %764 = vperm.xlu0 %6587, %v578_v25  }
  0x7e   :  { %773 = vperm.xlu1 %6588, %v584_v28   ;;  %770 = vperm.xlu0 %6587, %v582_v29  }
  0x81   :  { %v597_v32 = vpop.permute.xlu1 %596  ;;  %v591_v33 = vpop.permute.xlu0 %590 }
  0x82   :  { %vm780_vm4 = vcmp.eq.s32.totalorder %v597_v32, %v6890_v30  ;;  %vm778_vm5 = vcmp.eq.s32.totalorder %v591_v33, %v6890_v30  ;;  %776 = vperm.xlu0 %6587, %v586_v31  }
  0x83   :  { %v6895_v34 = vsel %vm780_vm4, 1.0, %v6612_v11  ;;  %v6898_v35 = vsel %vm778_vm5, 1.0, %v6612_v11 }
  0x84   :  { %10237 = vst [vmem:[#allocation5_spill] sm:$0xff] %v6895_v34  ;;  %10238 = vst [vmem:[#allocation6_spill] sm:$0xff] %v6898_v35  ;;  %v978_v36 = vsel %vm970_vm3, %v6895_v34, 0  ;;  %v972_v37 = vsel %vm970_vm3, %v6898_v35, 0  ;;  %5613 = vmatmul.mubr.msk.f32.vlgmr.msra.gmra.mxu1 %vm970_vm3, %v6898_v35 }
  0x85   :  { %v6906_v38 = vsub.f32 %v972_v37, %v972_v37  ;;  %v600_v39 = vpop.permute.xlu1 %599  ;;  %v594_v40 = vpop.permute.xlu0 %593  ;;  %5615 = vmatprep.mubr.msk.f32.mxu1 %vm6613_vm9, %v6612_v11  ;;  %5997 = vmatpush3.msra.mxu1 %v6770_v46  ;;  %v6911_v41 = vsub.f32 %v978_v36, %v978_v36 }
  0x86   :  { %vm781_vm6 = vcmp.eq.s32.totalorder %v600_v39, %v6890_v30  ;;  %vm779_vm7 = vcmp.eq.s32.totalorder %v594_v40, %v6890_v30  ;;  %5998 = vmatprep.subr.mxu1 %v6612_v11 }
  0x87   :  { %v6917_v42 = vsel %vm781_vm6, 1.0, %v6612_v11  ;;  %v6920_v43 = vsel %vm779_vm7, 1.0, %v6612_v11  ;;  %v10031_v44 = vand.u32 4294901760, %v6906_v38  ;;  %5999 = vmatpush3.msra.mxu1 %v6772_v47  ;;  %v10028_v56 = vand.u32 4294901760, %v6911_v41 }
  0x88   :  { %10239 = vst [vmem:[#allocation7_spill] sm:$0xff] %v6917_v42  ;;  %10240 = vst [vmem:[#allocation8_spill] sm:$0xff] %v6920_v43  ;;  %v981_v45 = vsel %vm970_vm3, %v6917_v42, 0  ;;  %v975_v48 = vsel %vm970_vm3, %v6920_v43, 0  ;;  %5616 = vmatmul.mubr.msk.f32.gmra.mxu1 %vm970_vm3, %v6920_v43  ;;  %6000 = vmatprep.subr.mxu1 %v6612_v11 }
  0x89   :  { %v6931_v49 = vsub.f32 %v975_v48, %v975_v48  ;;  %v606_v50 = vpop.permute.xlu1 %605  ;;  %v603_v54 = vpop.permute.xlu0 %602  ;;  %5618 = vmatprep.mubr.msk.f32.mxu1 %vm6613_vm9, %v6612_v11  ;;  %v1235_v55 = vsub.f32 %v6906_v38, %v10031_v44  ;;  %6001 = vmatpush3.msra.mxu1 %v6784_v53  ;;  %v6942_v57 = vsub.f32 %v981_v45, %v981_v45 }
  0x8a   :  { %vm783_vm8 = vcmp.eq.s32.totalorder %v606_v50, %v6890_v30  ;;  %vm782_vm10 = vcmp.eq.s32.totalorder %v603_v54, %v6890_v30  ;;  %6386 = vmatprep.subr.mxu1 %v6612_v11  ;;  %v1255_v8 = vsub.f32 %v6911_v41, %v10028_v56 }
  0x8b   :  { %v6945_v61 = vsel %vm782_vm10, 1.0, %v6612_v11  ;;  %v1236_v62 = vand.u32 4294901760, %v1235_v55  ;;  %v10030_v63 = vand.u32 4294901760, %v6931_v49  ;;  %v6954_v2 = vsel %vm783_vm8, 1.0, %v6612_v11 }
  0x8c   :  { %10241 = vst [vmem:[#allocation9_spill] sm:$0xff] %v6945_v61  ;;  %v984_v0 = vsel %vm970_vm3, %v6945_v61, 0  ;;  %5619 = vmatmul.mubr.msk.f32.gmra.mxu1 %vm970_vm3, %v6895_v34  ;;  %10242 = vst [vmem:[#allocation10_spill] sm:$0xff] %v6954_v2  ;;  %v10025_v9 = vand.u32 4294901760, %v6942_v57  ;;  %v987_v10 = vsel %vm970_vm3, %v6954_v2, 0  ;;  %v1256_v15 = vand.u32 4294901760, %v1255_v8 }
  0x8d   :  { %5418 = vmatmul.mubr.f32.vlgmr.msra.gmra.mxu0 %v1236_v62  ;;  %v609_v3 = vpop.permute.xlu0 %608  ;;  %5621 = vmatprep.mubr.msk.f32.mxu1 %vm6613_vm9, %v6612_v11  ;;  %v1245_v4 = vsub.f32 %v6931_v49, %v10030_v63  ;;  %v6965_v5 = vsub.f32 %v984_v0, %v984_v0  ;;  %v612_v6 = vpop.permute.xlu1 %611  ;;  %v6986_v13 = vsub.f32 %v987_v10, %v987_v10 }
  0x8e   :  { %5802 = vmatpush3.msra.mxu0 %v6778_v51  ;;  %vm784_vm11 = vcmp.eq.s32.totalorder %v609_v3, %v6890_v30  ;;  %5420 = vmatprep.mubr.msk.f32.mxu0 %vm6613_vm9, %v6612_v11  ;;  %vm785_vm12 = vcmp.eq.s32.totalorder %v612_v6, %v6890_v30  ;;  %v1265_v16 = vsub.f32 %v6942_v57, %v10025_v9 }
  0x8f   :  { %v1246_v7 = vand.u32 4294901760, %v1245_v4  ;;  %5803 = vmatprep.subr.mxu0 %v6612_v11  ;;  %v6978_v12 = vsel %vm784_vm11, 1.0, %v6612_v11  ;;  %v10021_v17 = vand.u32 4294901760, %v6965_v5  ;;  %v6999_v19 = vsel %vm785_vm12, 1.0, %v6612_v11 }
  0x90   :  { %5622 = vmatmul.mubr.msk.f32.gmra.mxu1 %vm970_vm3, %v6917_v42  ;;  %5804 = vmatpush3.msra.mxu0 %v6781_v52  ;;  %10243 = vst [vmem:[#allocation11_spill] sm:$0xff] %v6978_v12  ;;  %v990_v18 = vsel %vm970_vm3, %v6978_v12, 0  ;;  %10244 = vst [vmem:[#allocation12_spill] sm:$0xff] %v6999_v19  ;;  %v1266_v22 = vand.u32 4294901760, %v1265_v16  ;;  %v10019_v24 = vand.u32 4294901760, %v6986_v13  ;;  %v993_v25 = vsel %vm970_vm3, %v6999_v19, 0 }
  0x91   :  { %5421 = vmatmul.mubr.f32.gmra.mxu0 %v1246_v7  ;;  %5624 = vmatprep.mubr.msk.f32.mxu1 %vm6613_vm9, %v6612_v11  ;;  %v615_v14 = vpop.permute.xlu0 %614  ;;  %v7006_v20 = vsub.f32 %v990_v18, %v990_v18  ;;  %v618_v21 = vpop.permute.xlu1 %617  ;;  %v1275_v23 = vsub.f32 %v6965_v5, %v10021_v17  ;;  %v7024_v27 = vsub.f32 %v993_v25, %v993_v25 }
  0x92   :  { %5423 = vmatprep.mubr.msk.f32.mxu0 %vm6613_vm9, %v6612_v11  ;;  %5805 = vmatprep.subr.mxu0 %v6612_v11  ;;  %vm786_vm13 = vcmp.eq.s32.totalorder %v615_v14, %v6890_v30  ;;  %vm787_vm14 = vcmp.eq.s32.totalorder %v618_v21, %v6890_v30  ;;  %v1285_v31 = vsub.f32 %v6986_v13, %v10019_v24 }
  0x93   :  { %5806 = vmatpush3.msra.mxu0 %v6798_v60  ;;  %v7017_v26 = vsel %vm786_vm13, 1.0, %v6612_v11  ;;  %v1276_v29 = vand.u32 4294901760, %v1275_v23  ;;  %v10018_v32 = vand.u32 4294901760, %v7006_v20  ;;  %v7035_v36 = vsel %vm787_vm14, 1.0, %v6612_v11 }
  0x94   :  { %5625 = vmatmul.mubr.msk.f32.gmra.mxu1 %vm970_vm3, %v6945_v61  ;;  %6191 = vmatprep.subr.mxu0 %v6612_v11  ;;  %10245 = vst [vmem:[#allocation13_spill] sm:$0xff] %v7017_v26  ;;  %v996_v33 = vsel %vm970_vm3, %v7017_v26, 0  ;;  %10246 = vst [vmem:[#allocation14_spill] sm:$0xff] %v7035_v36  ;;  %v1286_v40 = vand.u32 4294901760, %v1285_v31  ;;  %v10016_v48 = vand.u32 4294901760, %v7024_v27  ;;  %v999_v50 = vsel %vm970_vm3, %v7035_v36, 0 }
  0x95   :  { %5424 = vmatmul.mubr.f32.gmra.mxu0 %v1256_v15  ;;  %5627 = vmatprep.mubr.msk.f32.mxu1 %vm6613_vm9, %v6612_v11  ;;  %v621_v28 = vpop.permute.xlu0 %620  ;;  %v7042_v37 = vsub.f32 %v996_v33, %v996_v33  ;;  %v624_v39 = vpop.permute.xlu1 %623  ;;  %v1295_v45 = vsub.f32 %v7006_v20, %v10018_v32  ;;  %v7060_v55 = vsub.f32 %v999_v50, %v999_v50 }
  0x96   :  { %5426 = vmatprep.mubr.msk.f32.mxu0 %vm6613_vm9, %v6612_v11  ;;  %vm788_vm15 = vcmp.eq.s32.totalorder %v621_v28, %v6890_v30  ;;  %vm789_vm0 = vcmp.eq.s32.totalorder %v624_v39, %v6890_v30  ;;  %v1305_v3 = vsub.f32 %v7024_v27, %v10016_v48 }
  0x97   :  { %v7053_v54 = vsel %vm788_vm15, 1.0, %v6612_v11  ;;  %v1296_v0 = vand.u32 4294901760, %v1295_v45  ;;  %v10015_v4 = vand.u32 4294901760, %v7042_v37  ;;  %v7071_v7 = vsel %vm789_vm0, 1.0, %v6612_v11 }
  0x98   :  { %5628 = vmatmul.mubr.msk.f32.gmra.mxu1 %vm970_vm3, %v6954_v2  ;;  %10247 = vst [vmem:[#allocation15_spill] sm:$0xff] %v7053_v54  ;;  %v1002_v6 = vsel %vm970_vm3, %v7053_v54, 0  ;;  %10248 = vst [vmem:[#allocation16_spill] sm:$0xff] %v7071_v7  ;;  %v1306_v14 = vand.u32 4294901760, %v1305_v3  ;;  %v10013_v16 = vand.u32 4294901760, %v7060_v55  ;;  %v1005_v18 = vsel %vm970_vm3, %v7071_v7, 0 }
  0x99   :  { %5427 = vmatmul.mubr.f32.gmra.mxu0 %v1266_v22  ;;  %5630 = vmatprep.mubr.msk.f32.mxu1 %vm6613_vm9, %v6612_v11  ;;  %v627_v62 = vpop.permute.xlu0 %626  ;;  %v7078_v8 = vsub.f32 %v1002_v6, %v1002_v6  ;;  %v630_v10 = vpop.permute.xlu1 %629  ;;  %v1315_v15 = vsub.f32 %v7042_v37, %v10015_v4  ;;  %v7096_v22 = vsub.f32 %v1005_v18, %v1005_v18 }
  0x9a   :  { %5429 = vmatprep.mubr.msk.f32.mxu0 %vm6613_vm9, %v6612_v11  ;;  %vm790_vm1 = vcmp.eq.s32.totalorder %v627_v62, %v6890_v30  ;;  %vm791_vm2 = vcmp.eq.s32.totalorder %v630_v10, %v6890_v30  ;;  %v1325_v28 = vsub.f32 %v7060_v55, %v10013_v16 }
  0x9b   :  { %v7089_v21 = vsel %vm790_vm1, 1.0, %v6612_v11  ;;  %v1316_v25 = vand.u32 4294901760, %v1315_v15  ;;  %v7107_v33 = vsel %vm791_vm2, 1.0, %v6612_v11  ;;  %v10010_v62 = vand.u32 4294901760, %v7096_v22 }
  0x9c   :  { %5631 = vmatmul.mubr.msk.f32.gmra.mxu1 %vm970_vm3, %v6978_v12  ;;  %10249 = vst [vmem:[#allocation17_spill] sm:$0xff] %v7089_v21  ;;  %v1008_v31 = vsel %vm970_vm3, %v7089_v21, 0  ;;  %10250 = vst [vmem:[#allocation18_spill] sm:$0xff] %v7107_v33  ;;  %v1326_v45 = vand.u32 4294901760, %v1325_v28 }
  0x9d   :  { %5430 = vmatmul.mubr.f32.gmra.mxu0 %v1276_v29  ;;  %5633 = vmatprep.mubr.msk.f32.mxu1 %vm6613_vm9, %v6612_v11  ;;  %v633_v23 = vpop.permute.xlu0 %632  ;;  %v10012_v29 = vand.u32 4294901760, %v7078_v8  ;;  %v7114_v39 = vsub.f32 %v1008_v31, %v1008_v31  ;;  %v1345_v15 = vsub.f32 %v7096_v22, %v10010_v62 }
  0x9e   :  { %5432 = vmatprep.mubr.msk.f32.mxu0 %vm6613_vm9, %v6612_v11  ;;  %vm792_vm4 = vcmp.eq.s32.totalorder %v633_v23, %v6890_v30 }
  0x9f   :  { %v1335_v50 = vsub.f32 %v7078_v8, %v10012_v29  ;;  %v7125_v3 = vsel %vm792_vm4, 1.0, %v6612_v11  ;;  %v10009_v18 = vand.u32 4294901760, %v7114_v39 }
  0xa0   :  { %5634 = vmatmul.mubr.msk.f32.gmra.mxu1 %vm970_vm3, %v6999_v19  ;;  %10251 = vst [vmem:[#allocation19_spill] sm:$0xff] %v7125_v3  ;;  %v1014_v23 = vsel %vm970_vm3, %v7125_v3, 0 }
  0xa1   :  { %5433 = vmatmul.mubr.f32.gmra.mxu0 %v1286_v40  ;;  %5636 = vmatprep.mubr.msk.f32.mxu1 %vm6613_vm9, %v6612_v11  ;;  %v636_v40 = vpop.permute.xlu1 %635  ;;  %v639_v10 = vpop.permute.xlu0 %638  ;;  %v7150_v28 = vsub.f32 %v1014_v23, %v1014_v23 }
  0xa2   :  { %5435 = vmatprep.mubr.msk.f32.mxu0 %vm6613_vm9, %v6612_v11  ;;  %vm793_vm5 = vcmp.eq.s32.totalorder %v636_v40, %v6890_v30  ;;  %vm794_vm6 = vcmp.eq.s32.totalorder %v639_v10, %v6890_v30  ;;  %v1346_v40 = vand.u32 4294901760, %v1345_v15 }
  0xa3   :  { %v7161_v10 = vsel %vm794_vm6, 1.0, %v6612_v11  ;;  %v10014_v62 = vand.u32 4294901760, %v7150_v28 }
  0xa4   :  { %5637 = vmatmul.mubr.msk.f32.gmra.mxu1 %vm970_vm3, %v7017_v26  ;;  %10253 = vst [vmem:[#allocation21_spill] sm:$0xff] %v7161_v10 }
  0xa5   :  { %5436 = vmatmul.mubr.f32.gmra.mxu0 %v1296_v0  ;;  %5639 = vmatprep.mubr.msk.f32.mxu1 %vm6613_vm9, %v6612_v11  ;;  %v1011_v0 = vsel %vm970_vm3, %v7107_v33, 0  ;;  %v642_v31 = vpop.permute.xlu1 %641  ;;  %v645_v15 = vpop.permute.xlu0 %644  ;;  %v1375_v29 = vsub.f32 %v7150_v28, %v10014_v62 }
  0xa6   :  { %5438 = vmatprep.mubr.msk.f32.mxu0 %vm6613_vm9, %v6612_v11  ;;  %v7132_v6 = vsub.f32 %v1011_v0, %v1011_v0  ;;  %vm795_vm7 = vcmp.eq.s32.totalorder %v642_v31, %v6890_v30  ;;  %vm796_vm8 = vcmp.eq.s32.totalorder %v645_v15, %v6890_v30 }
  0xa7   :  { %v7179_v31 = vsel %vm795_vm7, 1.0, %v6612_v11  ;;  %v7197_v15 = vsel %vm796_vm8, 1.0, %v6612_v11  ;;  %v1376_v62 = vand.u32 4294901760, %v1375_v29 }
  0xa8   :  { %5640 = vmatmul.mubr.msk.f32.gmra.mxu1 %vm970_vm3, %v7035_v36  ;;  %10254 = vst [vmem:[#allocation22_spill] sm:$0xff] %v7179_v31  ;;  %10255 = vst [vmem:[#allocation23_spill] sm:$0xff] %v7197_v15 }
  0xa9   :  { %5439 = vmatmul.mubr.f32.gmra.mxu0 %v1306_v14  ;;  %5642 = vmatprep.mubr.msk.f32.mxu1 %vm6613_vm9, %v6612_v11  ;;  %v1336_v14 = vand.u32 4294901760, %v1335_v50  ;;  %v10011_v50 = vand.u32 4294901760, %v7132_v6 }
  0xaa   :  { %5441 = vmatprep.mubr.msk.f32.mxu0 %vm6613_vm9, %v6612_v11 }
  0xac   :  { %5643 = vmatmul.mubr.msk.f32.gmra.mxu1 %vm970_vm3, %v7053_v54 }
  0xad   :  { %5442 = vmatmul.mubr.f32.gmra.mxu0 %v1316_v25  ;;  %5645 = vmatprep.mubr.msk.f32.mxu1 %vm6613_vm9, %v6612_v11  ;;  %v7143_v25 = vsel %vm793_vm5, 1.0, %v6612_v11 }
  0xae   :  { %5444 = vmatprep.mubr.msk.f32.mxu0 %vm6613_vm9, %v6612_v11  ;;  %10252 = vst [vmem:[#allocation20_spill] sm:$0xff] %v7143_v25  ;;  %v1017_v0 = vsel %vm970_vm3, %v7143_v25, 0 }
  0xb0   :  { %5646 = vmatmul.mubr.msk.f32.gmra.mxu1 %vm970_vm3, %v7071_v7 }
  0xb1   :  { %5445 = vmatmul.mubr.f32.gmra.mxu0 %v1326_v45  ;;  %5648 = vmatprep.mubr.msk.f32.mxu1 %vm6613_vm9, %v6612_v11  ;;  %v1355_v45 = vsub.f32 %v7114_v39, %v10009_v18  ;;  %v1365_v18 = vsub.f32 %v7132_v6, %v10011_v50 }
  0xb2   :  { %5447 = vmatprep.mubr.msk.f32.mxu0 %vm6613_vm9, %v6612_v11 }
  0xb3   :  { %v1356_v23 = vand.u32 4294901760, %v1355_v45  ;;  %v1366_v50 = vand.u32 4294901760, %v1365_v18 }
  0xb4   :  { %5649 = vmatmul.mubr.msk.f32.gmra.mxu1 %vm970_vm3, %v7089_v21 }
  0xb5   :  { %5448 = vmatmul.mubr.f32.gmra.mxu0 %v1336_v14  ;;  %5651 = vmatprep.mubr.msk.f32.mxu1 %vm6613_vm9, %v6612_v11  ;;  %v7168_v14 = vsub.f32 %v1017_v0, %v1017_v0  ;;  %v648_v0 = vpop.permute.xlu1 %647 }
  0xb6   :  { %5450 = vmatprep.mubr.msk.f32.mxu0 %vm6613_vm9, %v6612_v11  ;;  %vm797_vm10 = vcmp.eq.s32.totalorder %v648_v0, %v6890_v30 }
  0xb7   :  { %v10017_v16 = vand.u32 4294901760, %v7168_v14  ;;  %v7215_v0 = vsel %vm797_vm10, 1.0, %v6612_v11 }
  0xb8   :  { %5652 = vmatmul.mubr.msk.f32.gmra.mxu1 %vm970_vm3, %v7107_v33  ;;  %10256 = vst [vmem:[#allocation24_spill] sm:$0xff] %v7215_v0 }
  0xb9   :  { %5451 = vmatmul.mubr.f32.gmra.mxu0 %v1346_v40  ;;  %5654 = vmatprep.mubr.msk.f32.mxu1 %vm6613_vm9, %v6612_v11  ;;  %v1020_v40 = vsel %vm970_vm3, %v7161_v10, 0  ;;  %v1385_v4 = vsub.f32 %v7168_v14, %v10017_v16 }
  0xba   :  { %5453 = vmatprep.mubr.msk.f32.mxu0 %vm6613_vm9, %v6612_v11  ;;  %v7186_v45 = vsub.f32 %v1020_v40, %v1020_v40  ;;  %v651_v40 = vpop.permute.xlu0 %650 }
  0xbb   :  { %vm798_vm11 = vcmp.eq.s32.totalorder %v651_v40, %v6890_v30  ;;  %v1386_v16 = vand.u32 4294901760, %v1385_v4 }
  0xbc   :  { %5655 = vmatmul.mubr.msk.f32.gmra.mxu1 %vm970_vm3, %v7125_v3  ;;  %v10020_v48 = vand.u32 4294901760, %v7186_v45  ;;  %v7233_v40 = vsel %vm798_vm11, 1.0, %v6612_v11 }
  0xbd   :  { %5454 = vmatmul.mubr.f32.gmra.mxu0 %v1356_v23  ;;  %5657 = vmatprep.mubr.msk.f32.mxu1 %vm6613_vm9, %v6612_v11  ;;  %v1023_v23 = vsel %vm970_vm3, %v7179_v31, 0  ;;  %10257 = vst [vmem:[#allocation25_spill] sm:$0xff] %v7233_v40 }
  0xbe   :  { %5456 = vmatprep.mubr.msk.f32.mxu0 %vm6613_vm9, %v6612_v11  ;;  %v7204_v18 = vsub.f32 %v1023_v23, %v1023_v23  ;;  %v654_v23 = vpop.permute.xlu1 %653  ;;  %v1395_v32 = vsub.f32 %v7186_v45, %v10020_v48 }
  0xbf   :  { %vm799_vm12 = vcmp.eq.s32.totalorder %v654_v23, %v6890_v30 }
  0xc0   :  { %5658 = vmatmul.mubr.msk.f32.gmra.mxu1 %vm970_vm3, %v7143_v25  ;;  %v10023_v24 = vand.u32 4294901760, %v7204_v18  ;;  %v1396_v48 = vand.u32 4294901760, %v1395_v32  ;;  %v7251_v23 = vsel %vm799_vm12, 1.0, %v6612_v11 }
  0xc1   :  { %5457 = vmatmul.mubr.f32.gmra.mxu0 %v1366_v50  ;;  %5660 = vmatprep.mubr.msk.f32.mxu1 %vm6613_vm9, %v6612_v11  ;;  %v1026_v50 = vsel %vm970_vm3, %v7197_v15, 0  ;;  %10258 = vst [vmem:[#allocation26_spill] sm:$0xff] %v7251_v23 }
  0xc2   :  { %5459 = vmatprep.mubr.msk.f32.mxu0 %vm6613_vm9, %v6612_v11  ;;  %v7222_v29 = vsub.f32 %v1026_v50, %v1026_v50  ;;  %v657_v50 = vpop.permute.xlu0 %656  ;;  %v1405_v17 = vsub.f32 %v7204_v18, %v10023_v24 }
  0xc3   :  { %vm800_vm13 = vcmp.eq.s32.totalorder %v657_v50, %v6890_v30 }
  0xc4   :  { %5661 = vmatmul.mubr.msk.f32.gmra.mxu1 %vm970_vm3, %v7161_v10  ;;  %v10026_v1 = vand.u32 4294901760, %v7222_v29  ;;  %v1406_v24 = vand.u32 4294901760, %v1405_v17  ;;  %v7269_v50 = vsel %vm800_vm13, 1.0, %v6612_v11 }
  0xc5   :  { %5460 = vmatmul.mubr.f32.gmra.mxu0 %v1376_v62  ;;  %5663 = vmatprep.mubr.msk.f32.mxu1 %vm6613_vm9, %v6612_v11  ;;  %v1029_v62 = vsel %vm970_vm3, %v7215_v0, 0  ;;  %10259 = vst [vmem:[#allocation27_spill] sm:$0xff] %v7269_v50 }
  0xc6   :  { %5462 = vmatprep.mubr.msk.f32.mxu0 %vm6613_vm9, %v6612_v11  ;;  %v7240_v4 = vsub.f32 %v1029_v62, %v1029_v62  ;;  %v660_v62 = vpop.permute.xlu1 %659  ;;  %v1415_v59 = vsub.f32 %v7222_v29, %v10026_v1 }
  0xc7   :  { %vm801_vm14 = vcmp.eq.s32.totalorder %v660_v62, %v6890_v30 }
  0xc8   :  { %5664 = vmatmul.mubr.msk.f32.gmra.mxu1 %vm970_vm3, %v7179_v31  ;;  %v10029_v9 = vand.u32 4294901760, %v7240_v4  ;;  %v1416_v1 = vand.u32 4294901760, %v1415_v59  ;;  %v7287_v62 = vsel %vm801_vm14, 1.0, %v6612_v11 }
  0xc9   :  { %5463 = vmatmul.mubr.f32.gmra.mxu0 %v1386_v16  ;;  %5666 = vmatprep.mubr.msk.f32.mxu1 %vm6613_vm9, %v6612_v11  ;;  %v1032_v16 = vsel %vm970_vm3, %v7233_v40, 0  ;;  %10260 = vst [vmem:[#allocation28_spill] sm:$0xff] %v7287_v62 }
  0xca   :  { %5465 = vmatprep.mubr.msk.f32.mxu0 %vm6613_vm9, %v6612_v11  ;;  %v7258_v32 = vsub.f32 %v1032_v16, %v1032_v16  ;;  %v663_v16 = vpop.permute.xlu0 %662  ;;  %v1425_v58 = vsub.f32 %v7240_v4, %v10029_v9 }
  0xcb   :  { %vm802_vm15 = vcmp.eq.s32.totalorder %v663_v16, %v6890_v30 }
  0xcc   :  { %5667 = vmatmul.mubr.msk.f32.gmra.mxu1 %vm970_vm3, %v7197_v15  ;;  %v10032_v56 = vand.u32 4294901760, %v7258_v32  ;;  %v1426_v9 = vand.u32 4294901760, %v1425_v58  ;;  %v7305_v16 = vsel %vm802_vm15, 1.0, %v6612_v11 }
  0xcd   :  { %5466 = vmatmul.mubr.f32.gmra.mxu0 %v1396_v48  ;;  %5669 = vmatprep.mubr.msk.f32.mxu1 %vm6613_vm9, %v6612_v11  ;;  %v1035_v48 = vsel %vm970_vm3, %v7251_v23, 0  ;;  %10261 = vst [vmem:[#allocation29_spill] sm:$0xff] %v7305_v16 }
  0xce   :  { %5468 = vmatprep.mubr.msk.f32.mxu0 %vm6613_vm9, %v6612_v11  ;;  %v7276_v17 = vsub.f32 %v1035_v48, %v1035_v48  ;;  %v666_v48 = vpop.permute.xlu1 %665  ;;  %v1435_v63 = vsub.f32 %v7258_v32, %v10032_v56 }
  0xcf   :  { %vm803_vm0 = vcmp.eq.s32.totalorder %v666_v48, %v6890_v30 }
  0xd0   :  { %5670 = vmatmul.mubr.msk.f32.gmra.mxu1 %vm970_vm3, %v7215_v0  ;;  %v10037_v44 = vand.u32 4294901760, %v7276_v17  ;;  %v1436_v56 = vand.u32 4294901760, %v1435_v63  ;;  %v7323_v48 = vsel %vm803_vm0, 1.0, %v6612_v11 }
  0xd1   :  { %5469 = vmatmul.mubr.f32.gmra.mxu0 %v1406_v24  ;;  %5672 = vmatprep.mubr.msk.f32.mxu1 %vm6613_vm9, %v6612_v11  ;;  %v1038_v24 = vsel %vm970_vm3, %v7269_v50, 0  ;;  %10262 = vst [vmem:[#allocation30_spill] sm:$0xff] %v7323_v48 }
  0xd2   :  { %5471 = vmatprep.mubr.msk.f32.mxu0 %vm6613_vm9, %v6612_v11  ;;  %v7294_v59 = vsub.f32 %v1038_v24, %v1038_v24  ;;  %v669_v24 = vpop.permute.xlu0 %668 }
  0xd3   :  { %vm804_vm1 = vcmp.eq.s32.totalorder %v669_v24, %v6890_v30 }
  0xd4   :  { %5673 = vmatmul.mubr.msk.f32.gmra.mxu1 %vm970_vm3, %v7233_v40  ;;  %v10042_v40 = vand.u32 4294901760, %v7294_v59  ;;  %v7341_v24 = vsel %vm804_vm1, 1.0, %v6612_v11 }
  0xd5   :  { %5472 = vmatmul.mubr.f32.gmra.mxu0 %v1416_v1  ;;  %5675 = vmatprep.mubr.msk.f32.mxu1 %vm6613_vm9, %v6612_v11  ;;  %v1041_v1 = vsel %vm970_vm3, %v7287_v62, 0  ;;  %10263 = vst [vmem:[#allocation31_spill] sm:$0xff] %v7341_v24 }
  0xd6   :  { %5474 = vmatprep.mubr.msk.f32.mxu0 %vm6613_vm9, %v6612_v11  ;;  %v7312_v58 = vsub.f32 %v1041_v1, %v1041_v1  ;;  %v672_v1 = vpop.permute.xlu1 %671 }
  0xd7   :  { %vm805_vm2 = vcmp.eq.s32.totalorder %v672_v1, %v6890_v30 }
  0xd8   :  { %5676 = vmatmul.mubr.msk.f32.gmra.mxu1 %vm970_vm3, %v7251_v23  ;;  %v1445_v23 = vsub.f32 %v7276_v17, %v10037_v44  ;;  %v10047_v0 = vand.u32 4294901760, %v7312_v58  ;;  %v7359_v1 = vsel %vm805_vm2, 1.0, %v6612_v11 }
  0xd9   :  { %5475 = vmatmul.mubr.f32.gmra.mxu0 %v1426_v9  ;;  %5678 = vmatprep.mubr.msk.f32.mxu1 %vm6613_vm9, %v6612_v11  ;;  %v1044_v9 = vsel %vm970_vm3, %v7305_v16, 0  ;;  %10264 = vst [vmem:[#allocation32_spill] sm:$0xff] %v7359_v1 }
  0xda   :  { %5477 = vmatprep.mubr.msk.f32.mxu0 %vm6613_vm9, %v6612_v11  ;;  %v7330_v63 = vsub.f32 %v1044_v9, %v1044_v9  ;;  %v1446_v44 = vand.u32 4294901760, %v1445_v23  ;;  %v675_v9 = vpop.permute.xlu0 %674 }
  0xdb   :  { %vm806_vm4 = vcmp.eq.s32.totalorder %v675_v9, %v6890_v30 }
  0xdc   :  { %5679 = vmatmul.mubr.msk.f32.gmra.mxu1 %vm970_vm3, %v7269_v50  ;;  %v1455_v50 = vsub.f32 %v7294_v59, %v10042_v40  ;;  %v10052_v15 = vand.u32 4294901760, %v7330_v63  ;;  %v7377_v9 = vsel %vm806_vm4, 1.0, %v6612_v11 }
  0xdd   :  { %5478 = vmatmul.mubr.f32.gmra.mxu0 %v1436_v56  ;;  %5681 = vmatprep.mubr.msk.f32.mxu1 %vm6613_vm9, %v6612_v11  ;;  %v1047_v56 = vsel %vm970_vm3, %v7323_v48, 0  ;;  %10265 = vst [vmem:[#allocation33_spill] sm:$0xff] %v7377_v9 }
  0xde   :  { %5480 = vmatprep.mubr.msk.f32.mxu0 %vm6613_vm9, %v6612_v11  ;;  %v7348_v23 = vsub.f32 %v1047_v56, %v1047_v56  ;;  %v1456_v40 = vand.u32 4294901760, %v1455_v50  ;;  %v678_v56 = vpop.permute.xlu1 %677 }
  0xdf   :  { %vm807_vm5 = vcmp.eq.s32.totalorder %v678_v56, %v6890_v30 }
  0xe0   :  { %5682 = vmatmul.mubr.msk.f32.gmra.mxu1 %vm970_vm3, %v7287_v62  ;;  %v1465_v62 = vsub.f32 %v7312_v58, %v10047_v0  ;;  %v10057_v31 = vand.u32 4294901760, %v7348_v23  ;;  %v7395_v56 = vsel %vm807_vm5, 1.0, %v6612_v11 }
  0xe1   :  { %5481 = vmatmul.mubr.f32.gmra.mxu0 %v1446_v44  ;;  %5684 = vmatprep.mubr.msk.f32.mxu1 %vm6613_vm9, %v6612_v11  ;;  %v1050_v44 = vsel %vm970_vm3, %v7341_v24, 0  ;;  %10266 = vst [vmem:[#allocation34_spill] sm:$0xff] %v7395_v56 }
  0xe2   :  { %5483 = vmatprep.mubr.msk.f32.mxu0 %vm6613_vm9, %v6612_v11  ;;  %v7366_v50 = vsub.f32 %v1050_v44, %v1050_v44  ;;  %v1466_v0 = vand.u32 4294901760, %v1465_v62  ;;  %v681_v44 = vpop.permute.xlu0 %680 }
  0xe3   :  { %vm808_vm6 = vcmp.eq.s32.totalorder %v681_v44, %v6890_v30 }
  0xe4   :  { %5685 = vmatmul.mubr.msk.f32.gmra.mxu1 %vm970_vm3, %v7305_v16  ;;  %v1475_v16 = vsub.f32 %v7330_v63, %v10052_v15  ;;  %v10062_v10 = vand.u32 4294901760, %v7366_v50  ;;  %v7413_v44 = vsel %vm808_vm6, 1.0, %v6612_v11 }
  0xe5   :  { %5484 = vmatmul.mubr.f32.gmra.mxu0 %v1456_v40  ;;  %5687 = vmatprep.mubr.msk.f32.mxu1 %vm6613_vm9, %v6612_v11  ;;  %v1053_v40 = vsel %vm970_vm3, %v7359_v1, 0  ;;  %10267 = vst [vmem:[#allocation35_spill] sm:$0xff] %v7413_v44 }
  0xe6   :  { %5486 = vmatprep.mubr.msk.f32.mxu0 %vm6613_vm9, %v6612_v11  ;;  %v7384_v62 = vsub.f32 %v1053_v40, %v1053_v40  ;;  %v1476_v15 = vand.u32 4294901760, %v1475_v16  ;;  %v684_v40 = vpop.permute.xlu1 %683 }
  0xe7   :  { %vm809_vm7 = vcmp.eq.s32.totalorder %v684_v40, %v6890_v30 }
  0xe8   :  { %5688 = vmatmul.mubr.msk.f32.gmra.mxu1 %vm970_vm3, %v7323_v48  ;;  %v1485_v48 = vsub.f32 %v7348_v23, %v10057_v31  ;;  %v10067_v25 = vand.u32 4294901760, %v7384_v62  ;;  %v7431_v40 = vsel %vm809_vm7, 1.0, %v6612_v11 }
  0xe9   :  { %5487 = vmatmul.mubr.f32.gmra.mxu0 %v1466_v0  ;;  %5690 = vmatprep.mubr.msk.f32.mxu1 %vm6613_vm9, %v6612_v11  ;;  %v1056_v0 = vsel %vm970_vm3, %v7377_v9, 0  ;;  %10268 = vst [vmem:[#allocation36_spill] sm:$0xff] %v7431_v40 }
  0xea   :  { %5489 = vmatprep.mubr.msk.f32.mxu0 %vm6613_vm9, %v6612_v11  ;;  %v7402_v16 = vsub.f32 %v1056_v0, %v1056_v0  ;;  %v1486_v31 = vand.u32 4294901760, %v1485_v48  ;;  %v687_v0 = vpop.permute.xlu0 %686 }
  0xeb   :  { %vm810_vm8 = vcmp.eq.s32.totalorder %v687_v0, %v6890_v30 }
  0xec   :  { %5691 = vmatmul.mubr.msk.f32.gmra.mxu1 %vm970_vm3, %v7341_v24  ;;  %v1495_v24 = vsub.f32 %v7366_v50, %v10062_v10  ;;  %v10072_v3 = vand.u32 4294901760, %v7402_v16  ;;  %v7449_v0 = vsel %vm810_vm8, 1.0, %v6612_v11 }
  0xed   :  { %5490 = vmatmul.mubr.f32.gmra.mxu0 %v1476_v15  ;;  %5693 = vmatprep.mubr.msk.f32.mxu1 %vm6613_vm9, %v6612_v11  ;;  %v1059_v15 = vsel %vm970_vm3, %v7395_v56, 0  ;;  %10269 = vst [vmem:[#allocation37_spill] sm:$0xff] %v7449_v0 }
  0xee   :  { %5492 = vmatprep.mubr.msk.f32.mxu0 %vm6613_vm9, %v6612_v11  ;;  %v7420_v48 = vsub.f32 %v1059_v15, %v1059_v15  ;;  %v1496_v10 = vand.u32 4294901760, %v1495_v24  ;;  %v690_v15 = vpop.permute.xlu1 %689 }
  0xef   :  { %vm811_vm10 = vcmp.eq.s32.totalorder %v690_v15, %v6890_v30 }
  0xf0   :  { %5694 = vmatmul.mubr.msk.f32.gmra.mxu1 %vm970_vm3, %v7359_v1  ;;  %v1505_v1 = vsub.f32 %v7384_v62, %v10067_v25  ;;  %v10077_v33 = vand.u32 4294901760, %v7420_v48  ;;  %v7467_v15 = vsel %vm811_vm10, 1.0, %v6612_v11 }
  0xf1   :  { %5493 = vmatmul.mubr.f32.gmra.mxu0 %v1486_v31  ;;  %5696 = vmatprep.mubr.msk.f32.mxu1 %vm6613_vm9, %v6612_v11  ;;  %v1062_v31 = vsel %vm970_vm3, %v7413_v44, 0  ;;  %10270 = vst [vmem:[#allocation38_spill] sm:$0xff] %v7467_v15 }
  0xf2   :  { %5495 = vmatprep.mubr.msk.f32.mxu0 %vm6613_vm9, %v6612_v11  ;;  %v7438_v24 = vsub.f32 %v1062_v31, %v1062_v31  ;;  %v1506_v25 = vand.u32 4294901760, %v1505_v1  ;;  %v693_v31 = vpop.permute.xlu0 %692 }
  0xf3   :  { %vm812_vm11 = vcmp.eq.s32.totalorder %v693_v31, %v6890_v30 }
  0xf4   :  { %5697 = vmatmul.mubr.msk.f32.gmra.mxu1 %vm970_vm3, %v7377_v9  ;;  %v1515_v9 = vsub.f32 %v7402_v16, %v10072_v3  ;;  %v10082_v21 = vand.u32 4294901760, %v7438_v24  ;;  %v7485_v31 = vsel %vm812_vm11, 1.0, %v6612_v11 }
  0xf5   :  { %5496 = vmatmul.mubr.f32.gmra.mxu0 %v1496_v10  ;;  %5699 = vmatprep.mubr.msk.f32.mxu1 %vm6613_vm9, %v6612_v11  ;;  %v1065_v10 = vsel %vm970_vm3, %v7431_v40, 0  ;;  %10271 = vst [vmem:[#allocation39_spill] sm:$0xff] %v7485_v31 }
  0xf6   :  { %5498 = vmatprep.mubr.msk.f32.mxu0 %vm6613_vm9, %v6612_v11  ;;  %v7456_v1 = vsub.f32 %v1065_v10, %v1065_v10  ;;  %v1516_v3 = vand.u32 4294901760, %v1515_v9  ;;  %v696_v10 = vpop.permute.xlu1 %695 }
  0xf7   :  { %vm813_vm12 = vcmp.eq.s32.totalorder %v696_v10, %v6890_v30 }
  0xf8   :  { %5700 = vmatmul.mubr.msk.f32.gmra.mxu1 %vm970_vm3, %v7395_v56  ;;  %v1525_v56 = vsub.f32 %v7420_v48, %v10077_v33  ;;  %v10087_v7 = vand.u32 4294901760, %v7456_v1  ;;  %v7503_v10 = vsel %vm813_vm12, 1.0, %v6612_v11 }
  0xf9   :  { %5499 = vmatmul.mubr.f32.gmra.mxu0 %v1506_v25  ;;  %5702 = vmatprep.mubr.msk.f32.mxu1 %vm6613_vm9, %v6612_v11  ;;  %v1068_v25 = vsel %vm970_vm3, %v7449_v0, 0  ;;  %10272 = vst [vmem:[#allocation40_spill] sm:$0xff] %v7503_v10 }
  0xfa   :  { %5501 = vmatprep.mubr.msk.f32.mxu0 %vm6613_vm9, %v6612_v11  ;;  %v7474_v9 = vsub.f32 %v1068_v25, %v1068_v25  ;;  %v1526_v33 = vand.u32 4294901760, %v1525_v56  ;;  %v699_v25 = vpop.permute.xlu0 %698 }
  0xfb   :  { %vm814_vm13 = vcmp.eq.s32.totalorder %v699_v25, %v6890_v30 }
  0xfc   :  { %5703 = vmatmul.mubr.msk.f32.gmra.mxu1 %vm970_vm3, %v7413_v44  ;;  %v1535_v44 = vsub.f32 %v7438_v24, %v10082_v21  ;;  %v10092_v54 = vand.u32 4294901760, %v7474_v9  ;;  %v7521_v25 = vsel %vm814_vm13, 1.0, %v6612_v11 }
  0xfd   :  { %5502 = vmatmul.mubr.f32.gmra.mxu0 %v1516_v3  ;;  %5705 = vmatprep.mubr.msk.f32.mxu1 %vm6613_vm9, %v6612_v11  ;;  %v1071_v3 = vsel %vm970_vm3, %v7467_v15, 0  ;;  %10273 = vst [vmem:[#allocation41_spill] sm:$0xff] %v7521_v25 }
  0xfe   :  { %5504 = vmatprep.mubr.msk.f32.mxu0 %vm6613_vm9, %v6612_v11  ;;  %v7492_v56 = vsub.f32 %v1071_v3, %v1071_v3  ;;  %v1536_v21 = vand.u32 4294901760, %v1535_v44  ;;  %v702_v3 = vpop.permute.xlu1 %701 }
  0xff   :  { %vm815_vm14 = vcmp.eq.s32.totalorder %v702_v3, %v6890_v30 }
 0x100   :  { %5706 = vmatmul.mubr.msk.f32.gmra.mxu1 %vm970_vm3, %v7431_v40  ;;  %v1545_v40 = vsub.f32 %v7456_v1, %v10087_v7  ;;  %v10097_v36 = vand.u32 4294901760, %v7492_v56  ;;  %v7539_v3 = vsel %vm815_vm14, 1.0, %v6612_v11 }
 0x101   :  { %5505 = vmatmul.mubr.f32.gmra.mxu0 %v1526_v33  ;;  %5708 = vmatprep.mubr.msk.f32.mxu1 %vm6613_vm9, %v6612_v11  ;;  %v1074_v33 = vsel %vm970_vm3, %v7485_v31, 0  ;;  %10275 = vst [vmem:[#allocation43_spill] sm:$0xff] %v7539_v3 }
 0x102   :  { %5507 = vmatprep.mubr.msk.f32.mxu0 %vm6613_vm9, %v6612_v11  ;;  %v7510_v44 = vsub.f32 %v1074_v33, %v1074_v33  ;;  %v1546_v7 = vand.u32 4294901760, %v1545_v40  ;;  %v705_v33 = vpop.permute.xlu0 %704 }
 0x103   :  { %vm816_vm15 = vcmp.eq.s32.totalorder %v705_v33, %v6890_v30 }
 0x104   :  { %5709 = vmatmul.mubr.msk.f32.gmra.mxu1 %vm970_vm3, %v7449_v0  ;;  %v1555_v0 = vsub.f32 %v7474_v9, %v10092_v54  ;;  %v10102_v26 = vand.u32 4294901760, %v7510_v44  ;;  %v7557_v33 = vsel %vm816_vm15, 1.0, %v6612_v11 }
 0x105   :  { %5508 = vmatmul.mubr.f32.gmra.mxu0 %v1536_v21  ;;  %5711 = vmatprep.mubr.msk.f32.mxu1 %vm6613_vm9, %v6612_v11  ;;  %v1077_v21 = vsel %vm970_vm3, %v7503_v10, 0  ;;  %10277 = vst [vmem:[#allocation45_spill] sm:$0xff] %v7557_v33 }
 0x106   :  { %5510 = vmatprep.mubr.msk.f32.mxu0 %vm6613_vm9, %v6612_v11  ;;  %v7528_v40 = vsub.f32 %v1077_v21, %v1077_v21  ;;  %v1556_v54 = vand.u32 4294901760, %v1555_v0  ;;  %v708_v21 = vpop.permute.xlu1 %707 }
 0x107   :  { %vm817_vm0 = vcmp.eq.s32.totalorder %v708_v21, %v6890_v30 }
 0x108   :  { %5712 = vmatmul.mubr.msk.f32.gmra.mxu1 %vm970_vm3, %v7467_v15  ;;  %10274 = vst [vmem:[#allocation42_spill] sm:$0xff] %v7528_v40  ;;  %v1565_v15 = vsub.f32 %v7492_v56, %v10097_v36  ;;  %v10107_v19 = vand.u32 4294901760, %v7528_v40  ;;  %v7575_v21 = vsel %vm817_vm0, 1.0, %v6612_v11 }
 0x109   :  { %5511 = vmatmul.mubr.f32.gmra.mxu0 %v1546_v7  ;;  %5714 = vmatprep.mubr.msk.f32.mxu1 %vm6613_vm9, %v6612_v11  ;;  %v1080_v7 = vsel %vm970_vm3, %v7521_v25, 0  ;;  %10279 = vst [vmem:[#allocation47_spill] sm:$0xff] %v7575_v21 }
 0x10a   :  { %5513 = vmatprep.mubr.msk.f32.mxu0 %vm6613_vm9, %v6612_v11  ;;  %v7546_v0 = vsub.f32 %v1080_v7, %v1080_v7  ;;  %v1566_v36 = vand.u32 4294901760, %v1565_v15  ;;  %v711_v7 = vpop.permute.xlu0 %710 }
 0x10b   :  { %vm818_vm1 = vcmp.eq.s32.totalorder %v711_v7, %v6890_v30 }
 0x10c   :  { %5715 = vmatmul.mubr.msk.f32.gmra.mxu1 %vm970_vm3, %v7485_v31  ;;  %10276 = vst [vmem:[#allocation44_spill] sm:$0xff] %v7546_v0  ;;  %v1575_v31 = vsub.f32 %v7510_v44, %v10102_v26  ;;  %v10112_v12 = vand.u32 4294901760, %v7546_v0  ;;  %v7593_v7 = vsel %vm818_vm1, 1.0, %v6612_v11 }
 0x10d   :  { %5514 = vmatmul.mubr.f32.gmra.mxu0 %v1556_v54  ;;  %5717 = vmatprep.mubr.msk.f32.mxu1 %vm6613_vm9, %v6612_v11  ;;  %v1083_v54 = vsel %vm970_vm3, %v7539_v3, 0  ;;  %10281 = vst [vmem:[#allocation49_spill] sm:$0xff] %v7593_v7 }
 0x10e   :  { %5516 = vmatprep.mubr.msk.f32.mxu0 %vm6613_vm9, %v6612_v11  ;;  %v7564_v15 = vsub.f32 %v1083_v54, %v1083_v54  ;;  %v1576_v26 = vand.u32 4294901760, %v1575_v31  ;;  %v714_v54 = vpop.permute.xlu1 %713 }
 0x10f   :  { %vm819_vm2 = vcmp.eq.s32.totalorder %v714_v54, %v6890_v30 }
 0x110   :  { %5718 = vmatmul.mubr.msk.f32.gmra.mxu1 %vm970_vm3, %v7503_v10  ;;  %10278 = vst [vmem:[#allocation46_spill] sm:$0xff] %v7564_v15  ;;  %v1585_v10 = vsub.f32 %v7528_v40, %v10107_v19  ;;  %v10117_v2 = vand.u32 4294901760, %v7564_v15  ;;  %v7611_v54 = vsel %vm819_vm2, 1.0, %v6612_v11 }
 0x111   :  { %5517 = vmatmul.mubr.f32.gmra.mxu0 %v1566_v36  ;;  %5720 = vmatprep.mubr.msk.f32.mxu1 %vm6613_vm9, %v6612_v11  ;;  %v1086_v36 = vsel %vm970_vm3, %v7557_v33, 0  ;;  %10283 = vst [vmem:[#allocation51_spill] sm:$0xff] %v7611_v54 }
 0x112   :  { %5519 = vmatprep.mubr.msk.f32.mxu0 %vm6613_vm9, %v6612_v11  ;;  %v7582_v31 = vsub.f32 %v1086_v36, %v1086_v36  ;;  %v1586_v19 = vand.u32 4294901760, %v1585_v10  ;;  %v717_v36 = vpop.permute.xlu0 %716 }
 0x113   :  { %vm820_vm4 = vcmp.eq.s32.totalorder %v717_v36, %v6890_v30 }
 0x114   :  { %5721 = vmatmul.mubr.msk.f32.gmra.mxu1 %vm970_vm3, %v7521_v25  ;;  %10280 = vst [vmem:[#allocation48_spill] sm:$0xff] %v7582_v31  ;;  %v1595_v25 = vsub.f32 %v7546_v0, %v10112_v12  ;;  %v10122_v61 = vand.u32 4294901760, %v7582_v31  ;;  %v7629_v36 = vsel %vm820_vm4, 1.0, %v6612_v11 }
 0x115   :  { %5520 = vmatmul.mubr.f32.gmra.mxu0 %v1576_v26  ;;  %5723 = vmatprep.mubr.msk.f32.mxu1 %vm6613_vm9, %v6612_v11  ;;  %v1089_v26 = vsel %vm970_vm3, %v7575_v21, 0  ;;  %10285 = vst [vmem:[#allocation53_spill] sm:$0xff] %v7629_v36 }
 0x116   :  { %5522 = vmatprep.mubr.msk.f32.mxu0 %vm6613_vm9, %v6612_v11  ;;  %v7600_v10 = vsub.f32 %v1089_v26, %v1089_v26  ;;  %v1596_v12 = vand.u32 4294901760, %v1595_v25  ;;  %v720_v26 = vpop.permute.xlu1 %719 }
 0x117   :  { %vm821_vm5 = vcmp.eq.s32.totalorder %v720_v26, %v6890_v30 }
 0x118   :  { %5724 = vmatmul.mubr.msk.f32.gmra.mxu1 %vm970_vm3, %v7539_v3  ;;  %10282 = vst [vmem:[#allocation50_spill] sm:$0xff] %v7600_v10  ;;  %v1605_v3 = vsub.f32 %v7564_v15, %v10117_v2  ;;  %v10127_v42 = vand.u32 4294901760, %v7600_v10  ;;  %v7647_v26 = vsel %vm821_vm5, 1.0, %v6612_v11 }
 0x119   :  { %5523 = vmatmul.mubr.f32.gmra.mxu0 %v1586_v19  ;;  %5726 = vmatprep.mubr.msk.f32.mxu1 %vm6613_vm9, %v6612_v11  ;;  %v1092_v19 = vsel %vm970_vm3, %v7593_v7, 0  ;;  %10287 = vst [vmem:[#allocation55_spill] sm:$0xff] %v7647_v26 }
 0x11a   :  { %5525 = vmatprep.mubr.msk.f32.mxu0 %vm6613_vm9, %v6612_v11  ;;  %v7618_v25 = vsub.f32 %v1092_v19, %v1092_v19  ;;  %v1606_v2 = vand.u32 4294901760, %v1605_v3  ;;  %v723_v19 = vpop.permute.xlu0 %722 }
 0x11b   :  { %vm822_vm6 = vcmp.eq.s32.totalorder %v723_v19, %v6890_v30 }
 0x11c   :  { %5727 = vmatmul.mubr.msk.f32.gmra.mxu1 %vm970_vm3, %v7557_v33  ;;  %10284 = vst [vmem:[#allocation52_spill] sm:$0xff] %v7618_v25  ;;  %v1615_v33 = vsub.f32 %v7582_v31, %v10122_v61  ;;  %v10132_v34 = vand.u32 4294901760, %v7618_v25  ;;  %v7665_v19 = vsel %vm822_vm6, 1.0, %v6612_v11 }
 0x11d   :  { %5526 = vmatmul.mubr.f32.gmra.mxu0 %v1596_v12  ;;  %5729 = vmatprep.mubr.msk.f32.mxu1 %vm6613_vm9, %v6612_v11  ;;  %v1095_v12 = vsel %vm970_vm3, %v7611_v54, 0  ;;  %10289 = vst [vmem:[#allocation57_spill] sm:$0xff] %v7665_v19 }
 0x11e   :  { %5528 = vmatprep.mubr.msk.f32.mxu0 %vm6613_vm9, %v6612_v11  ;;  %v7636_v3 = vsub.f32 %v1095_v12, %v1095_v12  ;;  %v1616_v61 = vand.u32 4294901760, %v1615_v33  ;;  %v726_v12 = vpop.permute.xlu1 %725 }
 0x11f   :  { %vm823_vm7 = vcmp.eq.s32.totalorder %v726_v12, %v6890_v30 }
 0x120   :  { %5730 = vmatmul.mubr.msk.f32.gmra.mxu1 %vm970_vm3, %v7575_v21  ;;  %10286 = vst [vmem:[#allocation54_spill] sm:$0xff] %v7636_v3  ;;  %v1625_v21 = vsub.f32 %v7600_v10, %v10127_v42  ;;  %v10137_v43 = vand.u32 4294901760, %v7636_v3  ;;  %v7683_v12 = vsel %vm823_vm7, 1.0, %v6612_v11 }
 0x121   :  { %5529 = vmatmul.mubr.f32.gmra.mxu0 %v1606_v2  ;;  %5732 = vmatprep.mubr.msk.f32.mxu1 %vm6613_vm9, %v6612_v11  ;;  %v1098_v2 = vsel %vm970_vm3, %v7629_v36, 0  ;;  %10291 = vst [vmem:[#allocation59_spill] sm:$0xff] %v7683_v12 }
 0x122   :  { %5531 = vmatprep.mubr.msk.f32.mxu0 %vm6613_vm9, %v6612_v11  ;;  %v7654_v33 = vsub.f32 %v1098_v2, %v1098_v2  ;;  %v1626_v42 = vand.u32 4294901760, %v1625_v21  ;;  %v729_v2 = vpop.permute.xlu0 %728 }
 0x123   :  { %vm824_vm8 = vcmp.eq.s32.totalorder %v729_v2, %v6890_v30 }
 0x124   :  { %5733 = vmatmul.mubr.msk.f32.gmra.mxu1 %vm970_vm3, %v7593_v7  ;;  %10288 = vst [vmem:[#allocation56_spill] sm:$0xff] %v7654_v33  ;;  %v1635_v7 = vsub.f32 %v7618_v25, %v10132_v34  ;;  %v10142_v35 = vand.u32 4294901760, %v7654_v33  ;;  %v7701_v2 = vsel %vm824_vm8, 1.0, %v6612_v11 }
 0x125   :  { %5532 = vmatmul.mubr.f32.gmra.mxu0 %v1616_v61  ;;  %5735 = vmatprep.mubr.msk.f32.mxu1 %vm6613_vm9, %v6612_v11  ;;  %v1101_v61 = vsel %vm970_vm3, %v7647_v26, 0  ;;  %10293 = vst [vmem:[#allocation61_spill] sm:$0xff] %v7701_v2 }
 0x126   :  { %5534 = vmatprep.mubr.msk.f32.mxu0 %vm6613_vm9, %v6612_v11  ;;  %v7672_v21 = vsub.f32 %v1101_v61, %v1101_v61  ;;  %v1636_v34 = vand.u32 4294901760, %v1635_v7  ;;  %v732_v61 = vpop.permute.xlu1 %731 }
 0x127   :  { %vm825_vm10 = vcmp.eq.s32.totalorder %v732_v61, %v6890_v30 }
 0x128   :  { %5736 = vmatmul.mubr.msk.f32.gmra.mxu1 %vm970_vm3, %v7611_v54  ;;  %10290 = vst [vmem:[#allocation58_spill] sm:$0xff] %v7672_v21  ;;  %v1645_v54 = vsub.f32 %v7636_v3, %v10137_v43  ;;  %v10147_v3 = vand.u32 4294901760, %v7672_v21  ;;  %v7719_v61 = vsel %vm825_vm10, 1.0, %v6612_v11 }
 0x129   :  { %5535 = vmatmul.mubr.f32.gmra.mxu0 %v1626_v42  ;;  %5738 = vmatprep.mubr.msk.f32.mxu1 %vm6613_vm9, %v6612_v11  ;;  %v1104_v42 = vsel %vm970_vm3, %v7665_v19, 0  ;;  %10295 = vst [vmem:[#allocation63_spill] sm:$0xff] %v7719_v61 }
 0x12a   :  { %5537 = vmatprep.mubr.msk.f32.mxu0 %vm6613_vm9, %v6612_v11  ;;  %v7690_v7 = vsub.f32 %v1104_v42, %v1104_v42  ;;  %v1646_v43 = vand.u32 4294901760, %v1645_v54  ;;  %v735_v42 = vpop.permute.xlu0 %734 }
 0x12b   :  { %vm826_vm11 = vcmp.eq.s32.totalorder %v735_v42, %v6890_v30 }
 0x12c   :  { %5739 = vmatmul.mubr.msk.f32.gmra.mxu1 %vm970_vm3, %v7629_v36  ;;  %10292 = vst [vmem:[#allocation60_spill] sm:$0xff] %v7690_v7  ;;  %v1655_v36 = vsub.f32 %v7654_v33, %v10142_v35  ;;  %v10152_v33 = vand.u32 4294901760, %v7690_v7  ;;  %v7737_v42 = vsel %vm826_vm11, 1.0, %v6612_v11 }
 0x12d   :  { %5538 = vmatmul.mubr.f32.gmra.mxu0 %v1636_v34  ;;  %5741 = vmatprep.mubr.msk.f32.mxu1 %vm6613_vm9, %v6612_v11  ;;  %v1107_v34 = vsel %vm970_vm3, %v7683_v12, 0  ;;  %10297 = vst [vmem:[#allocation65_spill] sm:$0xff] %v7737_v42 }
 0x12e   :  { %5540 = vmatprep.mubr.msk.f32.mxu0 %vm6613_vm9, %v6612_v11  ;;  %v7708_v54 = vsub.f32 %v1107_v34, %v1107_v34  ;;  %v1656_v35 = vand.u32 4294901760, %v1655_v36  ;;  %v738_v34 = vpop.permute.xlu1 %737 }
 0x12f   :  { %vm827_vm12 = vcmp.eq.s32.totalorder %v738_v34, %v6890_v30 }
 0x130   :  { %5742 = vmatmul.mubr.msk.f32.gmra.mxu1 %vm970_vm3, %v7647_v26  ;;  %10294 = vst [vmem:[#allocation62_spill] sm:$0xff] %v7708_v54  ;;  %v1665_v26 = vsub.f32 %v7672_v21, %v10147_v3  ;;  %v10157_v21 = vand.u32 4294901760, %v7708_v54  ;;  %v7755_v34 = vsel %vm827_vm12, 1.0, %v6612_v11 }
 0x131   :  { %5541 = vmatmul.mubr.f32.gmra.mxu0 %v1646_v43  ;;  %5744 = vmatprep.mubr.msk.f32.mxu1 %vm6613_vm9, %v6612_v11  ;;  %v1110_v43 = vsel %vm970_vm3, %v7701_v2, 0  ;;  %10299 = vst [vmem:[#allocation67_spill] sm:$0xff] %v7755_v34 }
 0x132   :  { %5543 = vmatprep.mubr.msk.f32.mxu0 %vm6613_vm9, %v6612_v11  ;;  %v7726_v36 = vsub.f32 %v1110_v43, %v1110_v43  ;;  %v1666_v3 = vand.u32 4294901760, %v1665_v26  ;;  %v741_v43 = vpop.permute.xlu0 %740 }
 0x133   :  { %vm828_vm13 = vcmp.eq.s32.totalorder %v741_v43, %v6890_v30 }
 0x134   :  { %5745 = vmatmul.mubr.msk.f32.gmra.mxu1 %vm970_vm3, %v7665_v19  ;;  %10296 = vst [vmem:[#allocation64_spill] sm:$0xff] %v7726_v36  ;;  %v1675_v19 = vsub.f32 %v7690_v7, %v10152_v33  ;;  %v10162_v7 = vand.u32 4294901760, %v7726_v36  ;;  %v7773_v43 = vsel %vm828_vm13, 1.0, %v6612_v11 }
 0x135   :  { %5544 = vmatmul.mubr.f32.gmra.mxu0 %v1656_v35  ;;  %5747 = vmatprep.mubr.msk.f32.mxu1 %vm6613_vm9, %v6612_v11  ;;  %v1113_v35 = vsel %vm970_vm3, %v7719_v61, 0  ;;  %10301 = vst [vmem:[#allocation69_spill] sm:$0xff] %v7773_v43 }
 0x136   :  { %5546 = vmatprep.mubr.msk.f32.mxu0 %vm6613_vm9, %v6612_v11  ;;  %v7744_v26 = vsub.f32 %v1113_v35, %v1113_v35  ;;  %v1676_v33 = vand.u32 4294901760, %v1675_v19  ;;  %v744_v35 = vpop.permute.xlu1 %743 }
 0x137   :  { %vm829_vm14 = vcmp.eq.s32.totalorder %v744_v35, %v6890_v30 }
 0x138   :  { %5748 = vmatmul.mubr.msk.f32.gmra.mxu1 %vm970_vm3, %v7683_v12  ;;  %10298 = vst [vmem:[#allocation66_spill] sm:$0xff] %v7744_v26  ;;  %v1685_v12 = vsub.f32 %v7708_v54, %v10157_v21  ;;  %v10169_v54 = vand.u32 4294901760, %v7744_v26  ;;  %v7791_v35 = vsel %vm829_vm14, 1.0, %v6612_v11 }
 0x139   :  { %5547 = vmatmul.mubr.f32.gmra.mxu0 %v1666_v3  ;;  %5750 = vmatprep.mubr.msk.f32.mxu1 %vm6613_vm9, %v6612_v11  ;;  %v1116_v3 = vsel %vm970_vm3, %v7737_v42, 0  ;;  %10303 = vst [vmem:[#allocation71_spill] sm:$0xff] %v7791_v35 }
 0x13a   :  { %5549 = vmatprep.mubr.msk.f32.mxu0 %vm6613_vm9, %v6612_v11  ;;  %v7762_v19 = vsub.f32 %v1116_v3, %v1116_v3  ;;  %v1686_v21 = vand.u32 4294901760, %v1685_v12  ;;  %v747_v3 = vpop.permute.xlu0 %746 }
 0x13b   :  { %vm830_vm15 = vcmp.eq.s32.totalorder %v747_v3, %v6890_v30 }
 0x13c   :  { %5751 = vmatmul.mubr.msk.f32.gmra.mxu1 %vm970_vm3, %v7701_v2  ;;  %10300 = vst [vmem:[#allocation68_spill] sm:$0xff] %v7762_v19  ;;  %v1695_v2 = vsub.f32 %v7726_v36, %v10162_v7  ;;  %v7809_v3 = vsel %vm830_vm15, 1.0, %v6612_v11 }
 0x13d   :  { %5550 = vmatmul.mubr.f32.gmra.mxu0 %v1676_v33  ;;  %5753 = vmatprep.mubr.msk.f32.mxu1 %vm6613_vm9, %v6612_v11  ;;  %v1119_v33 = vsel %vm970_vm3, %v7755_v34, 0  ;;  %10306 = vst [vmem:[#allocation73_spill] sm:$0xff] %v7809_v3 }
 0x13e   :  { %5552 = vmatprep.mubr.msk.f32.mxu0 %vm6613_vm9, %v6612_v11  ;;  %v7780_v12 = vsub.f32 %v1119_v33, %v1119_v33  ;;  %v1696_v7 = vand.u32 4294901760, %v1695_v2 }
 0x140   :  { %5754 = vmatmul.mubr.msk.f32.gmra.mxu1 %vm970_vm3, %v7719_v61  ;;  %10302 = vst [vmem:[#allocation70_spill] sm:$0xff] %v7780_v12  ;;  %v1705_v61 = vsub.f32 %v7744_v26, %v10169_v54  ;;  %v750_v54 = vpop.permute.xlu1 %749  ;;  %v10305_v26 = vand.u32 4294901760, %v7762_v19  ;;  %v10184_v10 = vand.u32 4294901760, %v7780_v12 }
 0x141   :  { %5553 = vmatmul.mubr.f32.gmra.mxu0 %v1686_v21  ;;  %5756 = vmatprep.mubr.msk.f32.mxu1 %vm6613_vm9, %v6612_v11  ;;  %v1122_v21 = vsel %vm970_vm3, %v7773_v43, 0  ;;  %vm831_vm0 = vcmp.eq.s32.totalorder %v750_v54, %v6890_v30 }
 0x142   :  { %5555 = vmatprep.mubr.msk.f32.mxu0 %vm6613_vm9, %v6612_v11  ;;  %v7798_v33 = vsub.f32 %v1122_v21, %v1122_v21  ;;  %v1706_v36 = vand.u32 4294901760, %v1705_v61  ;;  %v753_v21 = vpop.permute.xlu0 %752  ;;  %v7827_v54 = vsel %vm831_vm0, 1.0, %v6612_v11 }
 0x143   :  { %10308 = vst [vmem:[#allocation75_spill] sm:$0xff] %v7827_v54  ;;  %vm832_vm1 = vcmp.eq.s32.totalorder %v753_v21, %v6890_v30  ;;  %v1131_v21 = vsel %vm970_vm3, %v7827_v54, 0 }
 0x144   :  { %v1944_v25 = vpop.f32.mrf.mxu1  ;;  %5757 = vmatmul.mubr.msk.f32.gmra.mxu1 %vm970_vm3, %v7737_v42  ;;  %10304 = vst [vmem:[#allocation72_spill] sm:$0xff] %v7798_v33  ;;  %v1715_v42 = vsub.f32 %v7762_v19, %v10305_v26  ;;  %v756_v19 = vpop.permute.xlu1 %755  ;;  %v10311_v0 = vand.u32 4294901760, %v7798_v33 }
 0x145   :  { %5556 = vmatmul.mubr.f32.gmra.mxu0 %v1696_v7  ;;  %5759 = vmatprep.mubr.msk.f32.mxu1 %vm6613_vm9, %v6612_v11  ;;  %v1125_v7 = vsel %vm970_vm3, %v7791_v35, 0  ;;  %vm833_vm2 = vcmp.eq.s32.totalorder %v756_v19, %v6890_v30 }
 0x146   :  { %v5614_v2 = vpop.f32.mrf.mxu1  ;;  %5558 = vmatprep.mubr.msk.f32.mxu0 %vm6613_vm9, %v6612_v11  ;;  %v7816_v26 = vsub.f32 %v1125_v7, %v1125_v7 }
 0x147   :  { %v1716_v2 = vand.u32 4294901760, %v1715_v42 }
 0x148   :  { %v1950_v31 = vpop.f32.mrf.mxu1  ;;  %5760 = vmatmul.mubr.msk.f32.gmra.mxu1 %vm970_vm3, %v7755_v34  ;;  %10307 = vst [vmem:[#allocation74_spill] sm:$0xff] %v7816_v26  ;;  %v1725_v34 = vsub.f32 %v7780_v12, %v10184_v10 }
 0x149   :  { %5559 = vmatmul.mubr.f32.gmra.mxu0 %v1706_v36  ;;  %5762 = vmatprep.mubr.msk.f32.mxu1 %vm6613_vm9, %v6612_v11  ;;  %v1128_v36 = vsel %vm970_vm3, %v7809_v3, 0 }
 0x14a   :  { %v5617_v61 = vpop.f32.mrf.mxu1  ;;  %5561 = vmatprep.mubr.msk.f32.mxu0 %vm6613_vm9, %v6612_v11  ;;  %v7836_v10 = vsub.f32 %v1128_v36, %v1128_v36  ;;  %v1726_v12 = vand.u32 4294901760, %v1725_v34 }
 0x14c   :  { %v1956_v15 = vpop.f32.mrf.mxu1  ;;  %5763 = vmatmul.mubr.msk.f32.gmra.mxu1 %vm970_vm3, %v7773_v43  ;;  %10310 = vst [vmem:[#allocation77_spill] sm:$0xff] %v7836_v10 }
 0x14d   :  { %v1238_v7 = vpop.f32.mrf.mxu0  ;;  %5562 = vmatmul.mubr.f32.gmra.mxu0 %v1716_v2  ;;  %5765 = vmatprep.mubr.msk.f32.mxu1 %vm6613_vm9, %v6612_v11  ;;  %v1735_v2 = vsub.f32 %v7798_v33, %v10311_v0 }
 0x14e   :  { %v7832_v42 = vadd.f32 %v1944_v25, %v1238_v7  ;;  %v5620_v61 = vpop.f32.mrf.mxu1  ;;  %5564 = vmatprep.mubr.msk.f32.mxu0 %vm6613_vm9, %v6612_v11  ;;  %v7847_v7 = vsel %vm832_vm1, 1.0, %v6612_v11 }
 0x14f   :  { %v5419_v43 = vpop.f32.mrf.mxu0  ;;  %10312 = vst [vmem:[#allocation78_spill] sm:$0xff] %v7847_v7  ;;  %v759_v61 = vpop.permute.xlu0 %758  ;;  %v1134_v19 = vsel %vm970_vm3, %v7847_v7, 0 }
 0x150   :  { %10309 = vst [vmem:[#allocation76_spill] sm:$0xff] %v7832_v42  ;;  %v1962_v25 = vpop.f32.mrf.mxu1  ;;  %5766 = vmatmul.mubr.msk.f32.gmra.mxu1 %vm970_vm3, %v7791_v35  ;;  %v7856_v43 = vsub.f32 %v1131_v21, %v1131_v21  ;;  %v1736_v35 = vand.u32 4294901760, %v1735_v2  ;;  %v10315_v42 = vand.u32 4294901760, %v7816_v26  ;;  %vm834_vm4 = vcmp.eq.s32.totalorder %v759_v61, %v6890_v30 }
 0x151   :  { %v1248_v36 = vpop.f32.mrf.mxu0  ;;  %5565 = vmatmul.mubr.f32.gmra.mxu0 %v1726_v12  ;;  %5768 = vmatprep.mubr.msk.f32.mxu1 %vm6613_vm9, %v6612_v11  ;;  %v7876_v2 = vsub.f32 %v1134_v19, %v1134_v19 }
 0x152   :  { %v7852_v0 = vadd.f32 %v1950_v31, %v1248_v36  ;;  %v5623_v34 = vpop.f32.mrf.mxu1  ;;  %5567 = vmatprep.mubr.msk.f32.mxu0 %vm6613_vm9, %v6612_v11  ;;  %10314 = vst [vmem:[#allocation80_spill] sm:$0xff] %v7856_v43  ;;  %v1745_v12 = vsub.f32 %v7816_v26, %v10315_v42  ;;  %v7867_v36 = vsel %vm833_vm2, 1.0, %v6612_v11 }
 0x153   :  { %v5422_v40 = vpop.f32.mrf.mxu0  ;;  %10316 = vst [vmem:[#allocation81_spill] sm:$0xff] %v7867_v36  ;;  %10318 = vst [vmem:[#allocation83_spill] sm:$0xff] %v7876_v2  ;;  %v762_v34 = vpop.permute.xlu1 %761  ;;  %v1137_v61 = vsel %vm970_vm3, %v7867_v36, 0 }
 0x154   :  { %10313 = vst [vmem:[#allocation79_spill] sm:$0xff] %v7852_v0  ;;  %v1968_v31 = vpop.f32.mrf.mxu1  ;;  %5769 = vmatmul.mubr.msk.f32.gmra.mxu1 %vm970_vm3, %v7809_v3  ;;  %v1746_v3 = vand.u32 4294901760, %v1745_v12  ;;  %v10319_v0 = vand.u32 4294901760, %v7836_v10  ;;  %vm835_vm5 = vcmp.eq.s32.totalorder %v762_v34, %v6890_v30  ;;  %v7896_v12 = vsub.f32 %v1137_v61, %v1137_v61 }
 0x155   :  { %v1258_v21 = vpop.f32.mrf.mxu0  ;;  %5568 = vmatmul.mubr.f32.gmra.mxu0 %v1736_v35  ;;  %5771 = vmatprep.mubr.msk.f32.mxu1 %vm6613_vm9, %v6612_v11 }
 0x156   :  { %v7872_v40 = vadd.f32 %v1956_v15, %v1258_v21  ;;  %v5626_v42 = vpop.f32.mrf.mxu1  ;;  %5570 = vmatprep.mubr.msk.f32.mxu0 %vm6613_vm9, %v6612_v11  ;;  %v1755_v35 = vsub.f32 %v7836_v10, %v10319_v0  ;;  %v7887_v21 = vsel %vm834_vm4, 1.0, %v6612_v11  ;;  %10322 = vst [vmem:[#allocation86_spill] sm:$0xff] %v7896_v12 }
 0x157   :  { %v5425_v33 = vpop.f32.mrf.mxu0  ;;  %10320 = vst [vmem:[#allocation84_spill] sm:$0xff] %v7887_v21  ;;  %v765_v42 = vpop.permute.xlu0 %764  ;;  %v1140_v34 = vsel %vm970_vm3, %v7887_v21, 0 }
 0x158   :  { %10317 = vst [vmem:[#allocation82_spill] sm:$0xff] %v7872_v40  ;;  %v1974_v15 = vpop.f32.mrf.mxu1  ;;  %5772 = vmatmul.mubr.msk.f32.gmra.mxu1 %vm970_vm3, %v7827_v54  ;;  %v1756_v54 = vand.u32 4294901760, %v1755_v35  ;;  %v10323_v40 = vand.u32 4294901760, %v7856_v43  ;;  %vm836_vm6 = vcmp.eq.s32.totalorder %v765_v42, %v6890_v30  ;;  %v7916_v35 = vsub.f32 %v1140_v34, %v1140_v34 }
 0x159   :  { %v1268_v19 = vpop.f32.mrf.mxu0  ;;  %5571 = vmatmul.mubr.f32.gmra.mxu0 %v1746_v3  ;;  %5774 = vmatprep.mubr.msk.f32.mxu1 %vm6613_vm9, %v6612_v11 }
 0x15a   :  { %v7892_v33 = vadd.f32 %v1962_v25, %v1268_v19  ;;  %v5629_v0 = vpop.f32.mrf.mxu1  ;;  %5573 = vmatprep.mubr.msk.f32.mxu0 %vm6613_vm9, %v6612_v11  ;;  %v1765_v3 = vsub.f32 %v7856_v43, %v10323_v40  ;;  %v7907_v19 = vsel %vm835_vm5, 1.0, %v6612_v11  ;;  %10326 = vst [vmem:[#allocation89_spill] sm:$0xff] %v7916_v35 }
 0x15b   :  { %v5428_v26 = vpop.f32.mrf.mxu0  ;;  %10324 = vst [vmem:[#allocation87_spill] sm:$0xff] %v7907_v19  ;;  %v768_v0 = vpop.permute.xlu1 %767  ;;  %v1143_v42 = vsel %vm970_vm3, %v7907_v19, 0 }
 0x15c   :  { %10321 = vst [vmem:[#allocation85_spill] sm:$0xff] %v7892_v33  ;;  %v1980_v25 = vpop.f32.mrf.mxu1  ;;  %5775 = vmatmul.mubr.msk.f32.gmra.mxu1 %vm970_vm3, %v7847_v7  ;;  %v1766_v7 = vand.u32 4294901760, %v1765_v3  ;;  %v10327_v33 = vand.u32 4294901760, %v7876_v2  ;;  %vm837_vm7 = vcmp.eq.s32.totalorder %v768_v0, %v6890_v30  ;;  %v7936_v3 = vsub.f32 %v1143_v42, %v1143_v42 }
 0x15d   :  { %v1278_v61 = vpop.f32.mrf.mxu0  ;;  %5574 = vmatmul.mubr.f32.gmra.mxu0 %v1756_v54  ;;  %5777 = vmatprep.mubr.msk.f32.mxu1 %vm6613_vm9, %v6612_v11 }
 0x15e   :  { %v7912_v26 = vadd.f32 %v1968_v31, %v1278_v61  ;;  %v5632_v40 = vpop.f32.mrf.mxu1  ;;  %5576 = vmatprep.mubr.msk.f32.mxu0 %vm6613_vm9, %v6612_v11  ;;  %v1775_v54 = vsub.f32 %v7876_v2, %v10327_v33  ;;  %v7927_v61 = vsel %vm836_vm6, 1.0, %v6612_v11  ;;  %10330 = vst [vmem:[#allocation92_spill] sm:$0xff] %v7936_v3 }
 0x15f   :  { %v5431_v10 = vpop.f32.mrf.mxu0  ;;  %10328 = vst [vmem:[#allocation90_spill] sm:$0xff] %v7927_v61  ;;  %v771_v40 = vpop.permute.xlu0 %770  ;;  %v1146_v0 = vsel %vm970_vm3, %v7927_v61, 0 }
 0x160   :  { %10325 = vst [vmem:[#allocation88_spill] sm:$0xff] %v7912_v26  ;;  %v1986_v31 = vpop.f32.mrf.mxu1  ;;  %5778 = vmatmul.mubr.msk.f32.gmra.mxu1 %vm970_vm3, %v7867_v36  ;;  %v1776_v36 = vand.u32 4294901760, %v1775_v54  ;;  %v10331_v26 = vand.u32 4294901760, %v7896_v12  ;;  %vm838_vm8 = vcmp.eq.s32.totalorder %v771_v40, %v6890_v30  ;;  %v7956_v54 = vsub.f32 %v1146_v0, %v1146_v0 }
 0x161   :  { %v1288_v34 = vpop.f32.mrf.mxu0  ;;  %5577 = vmatmul.mubr.f32.gmra.mxu0 %v1766_v7  ;;  %5780 = vmatprep.mubr.msk.f32.mxu1 %vm6613_vm9, %v6612_v11 }
 0x162   :  { %v7932_v10 = vadd.f32 %v1974_v15, %v1288_v34  ;;  %v5635_v33 = vpop.f32.mrf.mxu1  ;;  %5579 = vmatprep.mubr.msk.f32.mxu0 %vm6613_vm9, %v6612_v11  ;;  %v1785_v7 = vsub.f32 %v7896_v12, %v10331_v26  ;;  %v7947_v34 = vsel %vm837_vm7, 1.0, %v6612_v11 }
 0x163   :  { %v5434_v43 = vpop.f32.mrf.mxu0  ;;  %10332 = vst [vmem:[#allocation93_spill] sm:$0xff] %v7947_v34  ;;  %v774_v33 = vpop.permute.xlu1 %773  ;;  %v1149_v40 = vsel %vm970_vm3, %v7947_v34, 0 }
 0x164   :  { %10329 = vst [vmem:[#allocation91_spill] sm:$0xff] %v7932_v10  ;;  %v1992_v15 = vpop.f32.mrf.mxu1  ;;  %5781 = vmatmul.mubr.msk.f32.gmra.mxu1 %vm970_vm3, %v7887_v21  ;;  %v1786_v21 = vand.u32 4294901760, %v1785_v7  ;;  %v10334_v10 = vand.u32 4294901760, %v7916_v35  ;;  %vm839_vm10 = vcmp.eq.s32.totalorder %v774_v33, %v6890_v30  ;;  %v7976_v7 = vsub.f32 %v1149_v40, %v1149_v40 }
 0x165   :  { %v1298_v42 = vpop.f32.mrf.mxu0  ;;  %5580 = vmatmul.mubr.f32.gmra.mxu0 %v1776_v36  ;;  %5783 = vmatprep.mubr.msk.f32.mxu1 %vm6613_vm9, %v6612_v11 }
 0x166   :  { %v7952_v43 = vadd.f32 %v1980_v25, %v1298_v42  ;;  %v5638_v26 = vpop.f32.mrf.mxu1  ;;  %5582 = vmatprep.mubr.msk.f32.mxu0 %vm6613_vm9, %v6612_v11  ;;  %v1795_v36 = vsub.f32 %v7916_v35, %v10334_v10  ;;  %v7967_v42 = vsel %vm838_vm8, 1.0, %v6612_v11 }
 0x167   :  { %v5437_v2 = vpop.f32.mrf.mxu0  ;;  %10335 = vst [vmem:[#allocation95_spill] sm:$0xff] %v7967_v42  ;;  %v777_v26 = vpop.permute.xlu0 %776  ;;  %v1152_v33 = vsel %vm970_vm3, %v7967_v42, 0 }
 0x168   :  { %10333 = vst [vmem:[#allocation94_spill] sm:$0xff] %v7952_v43  ;;  %v1998_v25 = vpop.f32.mrf.mxu1  ;;  %5784 = vmatmul.mubr.msk.f32.gmra.mxu1 %vm970_vm3, %v7907_v19  ;;  %v1796_v19 = vand.u32 4294901760, %v1795_v36  ;;  %v10337_v43 = vand.u32 4294901760, %v7936_v3  ;;  %vm840_vm11 = vcmp.eq.s32.totalorder %v777_v26, %v6890_v30  ;;  %v7996_v36 = vsub.f32 %v1152_v33, %v1152_v33 }
 0x169   :  { %v1308_v0 = vpop.f32.mrf.mxu0  ;;  %5583 = vmatmul.mubr.f32.gmra.mxu0 %v1786_v21  ;;  %5786 = vmatprep.mubr.msk.f32.mxu1 %vm6613_vm9, %v6612_v11 }
 0x16a   :  { %v7972_v2 = vadd.f32 %v1986_v31, %v1308_v0  ;;  %v5641_v10 = vpop.f32.mrf.mxu1  ;;  %5585 = vmatprep.mubr.msk.f32.mxu0 %vm6613_vm9, %v6612_v11  ;;  %v1805_v21 = vsub.f32 %v7936_v3, %v10337_v43  ;;  %v7987_v0 = vsel %vm839_vm10, 1.0, %v6612_v11 }
 0x16b   :  { %v5440_v12 = vpop.f32.mrf.mxu0  ;;  %10338 = vst [vmem:[#allocation97_spill] sm:$0xff] %v7987_v0  ;;  %v1155_v3 = vsel %vm970_vm3, %v7987_v0, 0 }
 0x16c   :  { %10336 = vst [vmem:[#allocation96_spill] sm:$0xff] %v7972_v2  ;;  %v2004_v31 = vpop.f32.mrf.mxu1  ;;  %5787 = vmatmul.mubr.msk.f32.gmra.mxu1 %vm970_vm3, %v7927_v61  ;;  %v1806_v35 = vand.u32 4294901760, %v1805_v21  ;;  %v10340_v61 = vand.u32 4294901760, %v7956_v54  ;;  %v8015_v33 = vsub.f32 %v1155_v3, %v1155_v3 }
 0x16d   :  { %v1318_v40 = vpop.f32.mrf.mxu0  ;;  %5586 = vmatmul.mubr.f32.gmra.mxu0 %v1796_v19  ;;  %5789 = vmatprep.mubr.msk.f32.mxu1 %vm6613_vm9, %v6612_v11  ;;  %v10227_v19 = vand.u32 4294901760, %v7976_v7 }
 0x16e   :  { %v7992_v12 = vadd.f32 %v1992_v15, %v1318_v40  ;;  %v5644_v43 = vpop.f32.mrf.mxu1  ;;  %5588 = vmatprep.mubr.msk.f32.mxu0 %vm6613_vm9, %v6612_v11  ;;  %v1815_v2 = vsub.f32 %v7956_v54, %v10340_v61  ;;  %v8007_v15 = vsel %vm840_vm11, 1.0, %v6612_v11 }
 0x16f   :  { %v5443_v10 = vpop.f32.mrf.mxu0  ;;  %10341 = vst [vmem:[#allocation99_spill] sm:$0xff] %v8007_v15 }
 0x170   :  { %10339 = vst [vmem:[#allocation98_spill] sm:$0xff] %v7992_v12  ;;  %v2010_v30 = vpop.f32.mrf.mxu1  ;;  %5790 = vmatmul.mubr.msk.f32.gmra.mxu1 %vm970_vm3, %v7947_v34  ;;  %v1816_v43 = vand.u32 4294901760, %v1815_v2  ;;  %v1825_v10 = vsub.f32 %v7976_v7, %v10227_v19  ;;  %v10230_v34 = vand.u32 4294901760, %v7996_v36 }
 0x171   :  { %v1328_v26 = vpop.f32.mrf.mxu0  ;;  %5589 = vmatmul.mubr.f32.gmra.mxu0 %v1806_v35  ;;  %5792 = vmatprep.mubr.msk.f32.mxu1 %vm6613_vm9, %v6612_v11  ;;  %v1158_v35 = vsel %vm970_vm3, %v8007_v15, 0 }
 0x172   :  { %v8011_v21 = vadd.f32 %v1998_v25, %v1328_v26  ;;  %v5647_v61 = vpop.f32.mrf.mxu1  ;;  %5591 = vmatprep.mubr.msk.f32.mxu0 %vm6613_vm9, %v6612_v11  ;;  %v8031_v26 = vsub.f32 %v1158_v35, %v1158_v35  ;;  %v1835_v19 = vsub.f32 %v7996_v36, %v10230_v34 }
 0x173   :  { %v5446_v40 = vpop.f32.mrf.mxu0 }
 0x174   :  { %v2016_v12 = vpop.f32.mrf.mxu1  ;;  %5793 = vmatmul.mubr.msk.f32.gmra.mxu1 %vm970_vm3, %v7967_v42  ;;  %v1826_v40 = vand.u32 4294901760, %v1825_v10  ;;  %v10233_v42 = vand.u32 4294901760, %v8015_v33  ;;  %v10236_v34 = vand.u32 4294901760, %v8031_v26 }
 0x175   :  { %v1338_v25 = vpop.f32.mrf.mxu0  ;;  %5592 = vmatmul.mubr.f32.gmra.mxu0 %v1816_v43  ;;  %5795 = vmatprep.mubr.msk.f32.mxu1 %vm6613_vm9, %v6612_v11 }
 0x176   :  { %v8027_v3 = vadd.f32 %v2004_v31, %v1338_v25  ;;  %v5650_v2 = vpop.f32.mrf.mxu1  ;;  %5594 = vmatprep.mubr.msk.f32.mxu0 %vm6613_vm9, %v6612_v11 }
 0x177   :  { %v5449_v61 = vpop.f32.mrf.mxu0  ;;  %v1836_v2 = vand.u32 4294901760, %v1835_v19 }
 0x178   :  { %v2022_v43 = vpop.f32.mrf.mxu1  ;;  %5796 = vmatmul.mubr.msk.f32.gmra.mxu1 %vm970_vm3, %v7987_v0  ;;  %v1845_v61 = vsub.f32 %v8015_v33, %v10233_v42 }
 0x179   :  { %v1348_v31 = vpop.f32.mrf.mxu0  ;;  %5595 = vmatmul.mubr.f32.gmra.mxu0 %v1826_v40  ;;  %5798 = vmatprep.mubr.msk.f32.mxu1 %vm6613_vm9, %v6612_v11 }
 0x17a   :  { %v8041_v25 = vadd.f32 %v2010_v30, %v1348_v31  ;;  %v5653_v35 = vpop.f32.mrf.mxu1  ;;  %5597 = vmatprep.mubr.msk.f32.mxu0 %vm6613_vm9, %v6612_v11 }
 0x17b   :  { %v5452_v10 = vpop.f32.mrf.mxu0  ;;  %v1846_v35 = vand.u32 4294901760, %v1845_v61 }
 0x17c   :  { %v2028_v0 = vpop.f32.mrf.mxu1  ;;  %5799 = vmatmul.mubr.msk.f32.gmra.mxu1 %vm970_vm3, %v8007_v15  ;;  %v1855_v10 = vsub.f32 %v8031_v26, %v10236_v34  ;;  %v10342_v15 = vand.u32 4294901760, %v6906_v38 }
 0x17d   :  { %v1358_v40 = vpop.f32.mrf.mxu0  ;;  %5598 = vmatmul.mubr.f32.gmra.mxu0 %v1836_v2  ;;  %6002 = vmatprep.mubr.msk.f32.mxu1 %vm6613_vm9, %v6612_v11 }
 0x17e   :  { %v8053_v30 = vadd.f32 %v2016_v12, %v1358_v40  ;;  %v5656_v31 = vpop.f32.mrf.mxu1  ;;  %5600 = vmatprep.mubr.msk.f32.mxu0 %vm6613_vm9, %v6612_v11 }
 0x17f   :  { %v5455_v19 = vpop.f32.mrf.mxu0  ;;  %v1856_v31 = vand.u32 4294901760, %v1855_v10 }
 0x180   :  { %v2034_v42 = vpop.f32.mrf.mxu1  ;;  %6003 = vmatmul.mubr.f32.vlgmr.msra.gmra.mxu1 %v10342_v15  ;;  %v10343_v15 = vand.u32 4294901760, %v6931_v49 }
 0x181   :  { %v1368_v2 = vpop.f32.mrf.mxu0  ;;  %5601 = vmatmul.mubr.f32.gmra.mxu0 %v1846_v35  ;;  %6005 = vmatprep.mubr.msk.f32.mxu1 %vm6613_vm9, %v6612_v11 }
 0x182   :  { %v8064_v12 = vadd.f32 %v2022_v43, %v1368_v2  ;;  %v5659_v40 = vpop.f32.mrf.mxu1  ;;  %5603 = vmatprep.mubr.msk.f32.mxu0 %vm6613_vm9, %v6612_v11  ;;  %6387 = vmatpush3.msra.mxu1 %v6770_v46 }
 0x183   :  { %v5458_v61 = vpop.f32.mrf.mxu0  ;;  %6388 = vmatprep.subr.mxu1 %v6612_v11  ;;  %v10344_v40 = vand.u32 4294901760, %v6911_v41 }
 0x184   :  { %v2040_v19 = vpop.f32.mrf.mxu1  ;;  %6006 = vmatmul.mubr.f32.gmra.mxu1 %v10343_v15 }
 0x185   :  { %v1378_v35 = vpop.f32.mrf.mxu0  ;;  %5604 = vmatmul.mubr.f32.gmra.mxu0 %v1856_v31  ;;  %6008 = vmatprep.mubr.msk.f32.mxu1 %vm6613_vm9, %v6612_v11  ;;  %v10345_v31 = vand.u32 4294901760, %v6778_v51 }
 0x186   :  { %v8074_v43 = vadd.f32 %v2028_v0, %v1378_v35  ;;  %v5662_v2 = vpop.f32.mrf.mxu1  ;;  %5807 = vmatprep.mubr.msk.f32.mxu0 %vm6613_vm9, %v6612_v11  ;;  %6389 = vmatpush3.msra.mxu1 %v6772_v47 }
 0x187   :  { %v5461_v46 = vpop.f32.mrf.mxu0  ;;  %6390 = vmatprep.subr.mxu1 %v6612_v11  ;;  %v10347_v2 = vand.u32 4294901760, %v6781_v52 }
 0x188   :  { %v2046_v10 = vpop.f32.mrf.mxu1  ;;  %6009 = vmatmul.mubr.f32.gmra.mxu1 %v10344_v40  ;;  %v10348_v40 = vand.u32 4294901760, %v6798_v60  ;;  %v10350_v60 = vand.u32 4294901760, %v6986_v13 }
 0x189   :  { %v1388_v61 = vpop.f32.mrf.mxu0  ;;  %5808 = vmatmul.mubr.f32.vlgmr.msra.gmra.mxu0 %v6906_v38  ;;  %6011 = vmatprep.mubr.msk.f32.mxu1 %vm6613_vm9, %v6612_v11  ;;  %v10346_v38 = vand.u32 4294901760, %v6942_v57 }
 0x18a   :  { %v8085_v0 = vadd.f32 %v2034_v42, %v1388_v61  ;;  %6192 = vmatpush3.msra.mxu0 %v10345_v31  ;;  %v5665_v15 = vpop.f32.mrf.mxu1  ;;  %5810 = vmatprep.mubr.msk.f32.mxu0 %vm6613_vm9, %v6612_v11  ;;  %v10349_v61 = vand.u32 4294901760, %v6965_v5 }
 0x18b   :  { %v5464_v47 = vpop.f32.mrf.mxu0  ;;  %6193 = vmatprep.subr.mxu0 %v6612_v11  ;;  %6391 = vmatpush3.msra.mxu1 %v6784_v53 }
 0x18c   :  { %v2052_v35 = vpop.f32.mrf.mxu1  ;;  %6012 = vmatmul.mubr.f32.gmra.mxu1 %v10346_v38  ;;  %6194 = vmatpush3.msra.mxu0 %v10347_v2 }
 0x18d   :  { %v1398_v42 = vpop.f32.mrf.mxu0  ;;  %5811 = vmatmul.mubr.f32.gmra.mxu0 %v6931_v49  ;;  %6014 = vmatprep.mubr.msk.f32.mxu1 %vm6613_vm9, %v6612_v11 }
 0x18e   :  { %v8100_v51 = vadd.f32 %v2040_v19, %v1398_v42  ;;  %v5668_v46 = vpop.f32.mrf.mxu1  ;;  %5813 = vmatprep.mubr.msk.f32.mxu0 %vm6613_vm9, %v6612_v11  ;;  %6195 = vmatprep.subr.mxu0 %v6612_v11 }
 0x18f   :  { %v5467_v53 = vpop.f32.mrf.mxu0  ;;  %6196 = vmatpush3.msra.mxu0 %v10348_v40  ;;  %v10351_v46 = vand.u32 4294901760, %v7006_v20 }
 0x190   :  { %v2058_v52 = vpop.f32.mrf.mxu1  ;;  %6015 = vmatmul.mubr.f32.gmra.mxu1 %v10349_v61 }
 0x191   :  { %v1408_v49 = vpop.f32.mrf.mxu0  ;;  %5814 = vmatmul.mubr.f32.gmra.mxu0 %v6911_v41  ;;  %6017 = vmatprep.mubr.msk.f32.mxu1 %vm6613_vm9, %v6612_v11 }
 0x192   :  { %v8112_v19 = vadd.f32 %v2046_v10, %v1408_v49  ;;  %v5671_v31 = vpop.f32.mrf.mxu1  ;;  %5816 = vmatprep.mubr.msk.f32.mxu0 %vm6613_vm9, %v6612_v11  ;;  %v10352_v49 = vand.u32 4294901760, %v7024_v27 }
 0x193   :  { %v5470_v15 = vpop.f32.mrf.mxu0 }
 0x194   :  { %v2064_v47 = vpop.f32.mrf.mxu1  ;;  %6018 = vmatmul.mubr.f32.gmra.mxu1 %v10350_v60 }
 0x195   :  { %v1418_v38 = vpop.f32.mrf.mxu0  ;;  %5817 = vmatmul.mubr.f32.gmra.mxu0 %v6942_v57  ;;  %6020 = vmatprep.mubr.msk.f32.mxu1 %vm6613_vm9, %v6612_v11 }
 0x196   :  { %v8121_v41 = vadd.f32 %v2052_v35, %v1418_v38  ;;  %v5674_v2 = vpop.f32.mrf.mxu1  ;;  %5819 = vmatprep.mubr.msk.f32.mxu0 %vm6613_vm9, %v6612_v11  ;;  %v10353_v38 = vand.u32 4294901760, %v7042_v37 }
 0x197   :  { %v5473_v10 = vpop.f32.mrf.mxu0 }
 0x198   :  { %v2070_v42 = vpop.f32.mrf.mxu1  ;;  %6021 = vmatmul.mubr.f32.gmra.mxu1 %v10351_v46 }
 0x199   :  { %v1428_v53 = vpop.f32.mrf.mxu0  ;;  %5820 = vmatmul.mubr.f32.gmra.mxu0 %v6965_v5  ;;  %6023 = vmatprep.mubr.msk.f32.mxu1 %vm6613_vm9, %v6612_v11 }
 0x19a   :  { %v8130_v57 = vadd.f32 %v2058_v52, %v1428_v53  ;;  %v5677_v40 = vpop.f32.mrf.mxu1  ;;  %5822 = vmatprep.mubr.msk.f32.mxu0 %vm6613_vm9, %v6612_v11  ;;  %v10354_v53 = vand.u32 4294901760, %v7060_v55 }
 0x19b   :  { %v5476_v35 = vpop.f32.mrf.mxu0 }
 0x19c   :  { %v2076_v61 = vpop.f32.mrf.mxu1  ;;  %6024 = vmatmul.mubr.f32.gmra.mxu1 %v10352_v49 }
 0x19d   :  { %v1438_v31 = vpop.f32.mrf.mxu0  ;;  %5823 = vmatmul.mubr.f32.gmra.mxu0 %v6986_v13  ;;  %6026 = vmatprep.mubr.msk.f32.mxu1 %vm6613_vm9, %v6612_v11 }
 0x19e   :  { %v8139_v5 = vadd.f32 %v2064_v47, %v1438_v31  ;;  %v5680_v15 = vpop.f32.mrf.mxu1  ;;  %5825 = vmatprep.mubr.msk.f32.mxu0 %vm6613_vm9, %v6612_v11  ;;  %v10355_v31 = vand.u32 4294901760, %v7078_v8 }
 0x19f   :  { %v5479_v52 = vpop.f32.mrf.mxu0 }
 0x1a0   :  { %v2082_v60 = vpop.f32.mrf.mxu1  ;;  %6027 = vmatmul.mubr.f32.gmra.mxu1 %v10353_v38 }
 0x1a1   :  { %v1448_v2 = vpop.f32.mrf.mxu0  ;;  %5826 = vmatmul.mubr.f32.gmra.mxu0 %v7006_v20  ;;  %6029 = vmatprep.mubr.msk.f32.mxu1 %vm6613_vm9, %v6612_v11 }
 0x1a2   :  { %v8148_v13 = vadd.f32 %v2070_v42, %v1448_v2  ;;  %v5683_v10 = vpop.f32.mrf.mxu1  ;;  %5828 = vmatprep.mubr.msk.f32.mxu0 %vm6613_vm9, %v6612_v11  ;;  %v10356_v2 = vand.u32 4294901760, %v7096_v22 }
 0x1a3   :  { %v5482_v47 = vpop.f32.mrf.mxu0 }
 0x1a4   :  { %v2088_v46 = vpop.f32.mrf.mxu1  ;;  %6030 = vmatmul.mubr.f32.gmra.mxu1 %v10354_v53 }
 0x1a5   :  { %v1458_v40 = vpop.f32.mrf.mxu0  ;;  %5829 = vmatmul.mubr.f32.gmra.mxu0 %v7024_v27  ;;  %6032 = vmatprep.mubr.msk.f32.mxu1 %vm6613_vm9, %v6612_v11 }
 0x1a6   :  { %v8157_v20 = vadd.f32 %v2076_v61, %v1458_v40  ;;  %v5686_v35 = vpop.f32.mrf.mxu1  ;;  %5831 = vmatprep.mubr.msk.f32.mxu0 %vm6613_vm9, %v6612_v11  ;;  %v10357_v40 = vand.u32 4294901760, %v7114_v39 }
 0x1a7   :  { %v5485_v42 = vpop.f32.mrf.mxu0 }
 0x1a8   :  { %v2094_v49 = vpop.f32.mrf.mxu1  ;;  %6033 = vmatmul.mubr.f32.gmra.mxu1 %v10355_v31 }
 0x1a9   :  { %v1468_v15 = vpop.f32.mrf.mxu0  ;;  %5832 = vmatmul.mubr.f32.gmra.mxu0 %v7042_v37  ;;  %6035 = vmatprep.mubr.msk.f32.mxu1 %vm6613_vm9, %v6612_v11 }
 0x1aa   :  { %v8166_v27 = vadd.f32 %v2082_v60, %v1468_v15  ;;  %v5689_v52 = vpop.f32.mrf.mxu1  ;;  %5834 = vmatprep.mubr.msk.f32.mxu0 %vm6613_vm9, %v6612_v11  ;;  %v10358_v15 = vand.u32 4294901760, %v7132_v6 }
 0x1ab   :  { %v5488_v61 = vpop.f32.mrf.mxu0 }
 0x1ac   :  { %v2100_v38 = vpop.f32.mrf.mxu1  ;;  %6036 = vmatmul.mubr.f32.gmra.mxu1 %v10356_v2 }
 0x1ad   :  { %v1478_v10 = vpop.f32.mrf.mxu0  ;;  %5835 = vmatmul.mubr.f32.gmra.mxu0 %v7060_v55  ;;  %6038 = vmatprep.mubr.msk.f32.mxu1 %vm6613_vm9, %v6612_v11 }
 0x1ae   :  { %v8175_v37 = vadd.f32 %v2088_v46, %v1478_v10  ;;  %v5692_v47 = vpop.f32.mrf.mxu1  ;;  %5837 = vmatprep.mubr.msk.f32.mxu0 %vm6613_vm9, %v6612_v11  ;;  %v10359_v10 = vand.u32 4294901760, %v7150_v28 }
 0x1af   :  { %v5491_v60 = vpop.f32.mrf.mxu0 }
 0x1b0   :  { %v2106_v53 = vpop.f32.mrf.mxu1  ;;  %6039 = vmatmul.mubr.f32.gmra.mxu1 %v10357_v40 }
 0x1b1   :  { %v1488_v35 = vpop.f32.mrf.mxu0  ;;  %5838 = vmatmul.mubr.f32.gmra.mxu0 %v7078_v8  ;;  %6041 = vmatprep.mubr.msk.f32.mxu1 %vm6613_vm9, %v6612_v11 }
 0x1b2   :  { %v8184_v55 = vadd.f32 %v2094_v49, %v1488_v35  ;;  %v5695_v42 = vpop.f32.mrf.mxu1  ;;  %5840 = vmatprep.mubr.msk.f32.mxu0 %vm6613_vm9, %v6612_v11  ;;  %v10360_v35 = vand.u32 4294901760, %v7168_v14 }
 0x1b3   :  { %v5494_v46 = vpop.f32.mrf.mxu0 }
 0x1b4   :  { %v2112_v31 = vpop.f32.mrf.mxu1  ;;  %6042 = vmatmul.mubr.f32.gmra.mxu1 %v10358_v15 }
 0x1b5   :  { %v1498_v52 = vpop.f32.mrf.mxu0  ;;  %5841 = vmatmul.mubr.f32.gmra.mxu0 %v7096_v22  ;;  %6044 = vmatprep.mubr.msk.f32.mxu1 %vm6613_vm9, %v6612_v11 }
 0x1b6   :  { %v8193_v8 = vadd.f32 %v2100_v38, %v1498_v52  ;;  %v5698_v61 = vpop.f32.mrf.mxu1  ;;  %5843 = vmatprep.mubr.msk.f32.mxu0 %vm6613_vm9, %v6612_v11  ;;  %v10361_v52 = vand.u32 4294901760, %v7186_v45 }
 0x1b7   :  { %v5497_v49 = vpop.f32.mrf.mxu0 }
 0x1b8   :  { %v2118_v2 = vpop.f32.mrf.mxu1  ;;  %6045 = vmatmul.mubr.f32.gmra.mxu1 %v10359_v10 }
 0x1b9   :  { %v1508_v47 = vpop.f32.mrf.mxu0  ;;  %5844 = vmatmul.mubr.f32.gmra.mxu0 %v7114_v39  ;;  %6047 = vmatprep.mubr.msk.f32.mxu1 %vm6613_vm9, %v6612_v11 }
 0x1ba   :  { %v8202_v22 = vadd.f32 %v2106_v53, %v1508_v47  ;;  %v5701_v60 = vpop.f32.mrf.mxu1  ;;  %5846 = vmatprep.mubr.msk.f32.mxu0 %vm6613_vm9, %v6612_v11  ;;  %v10362_v47 = vand.u32 4294901760, %v7204_v18 }
 0x1bb   :  { %v5500_v38 = vpop.f32.mrf.mxu0 }
 0x1bc   :  { %v2124_v40 = vpop.f32.mrf.mxu1  ;;  %6048 = vmatmul.mubr.f32.gmra.mxu1 %v10360_v35 }
 0x1bd   :  { %v1518_v42 = vpop.f32.mrf.mxu0  ;;  %5847 = vmatmul.mubr.f32.gmra.mxu0 %v7132_v6  ;;  %6050 = vmatprep.mubr.msk.f32.mxu1 %vm6613_vm9, %v6612_v11 }
 0x1be   :  { %v8211_v39 = vadd.f32 %v2112_v31, %v1518_v42  ;;  %v5704_v46 = vpop.f32.mrf.mxu1  ;;  %5849 = vmatprep.mubr.msk.f32.mxu0 %vm6613_vm9, %v6612_v11  ;;  %v10363_v42 = vand.u32 4294901760, %v7222_v29 }
 0x1bf   :  { %v5503_v53 = vpop.f32.mrf.mxu0 }
 0x1c0   :  { %v2130_v15 = vpop.f32.mrf.mxu1  ;;  %6051 = vmatmul.mubr.f32.gmra.mxu1 %v10361_v52 }
 0x1c1   :  { %v1528_v61 = vpop.f32.mrf.mxu0  ;;  %5850 = vmatmul.mubr.f32.gmra.mxu0 %v7150_v28  ;;  %6053 = vmatprep.mubr.msk.f32.mxu1 %vm6613_vm9, %v6612_v11 }
 0x1c2   :  { %v8220_v6 = vadd.f32 %v2118_v2, %v1528_v61  ;;  %v5707_v49 = vpop.f32.mrf.mxu1  ;;  %5852 = vmatprep.mubr.msk.f32.mxu0 %vm6613_vm9, %v6612_v11  ;;  %v10364_v61 = vand.u32 4294901760, %v7240_v4 }
 0x1c3   :  { %v5506_v31 = vpop.f32.mrf.mxu0 }
 0x1c4   :  { %v2136_v10 = vpop.f32.mrf.mxu1  ;;  %6054 = vmatmul.mubr.f32.gmra.mxu1 %v10362_v47 }
 0x1c5   :  { %v1538_v60 = vpop.f32.mrf.mxu0  ;;  %5853 = vmatmul.mubr.f32.gmra.mxu0 %v7168_v14  ;;  %6056 = vmatprep.mubr.msk.f32.mxu1 %vm6613_vm9, %v6612_v11 }
 0x1c6   :  { %v8229_v28 = vadd.f32 %v2124_v40, %v1538_v60  ;;  %v5710_v38 = vpop.f32.mrf.mxu1  ;;  %5855 = vmatprep.mubr.msk.f32.mxu0 %vm6613_vm9, %v6612_v11  ;;  %v10365_v60 = vand.u32 4294901760, %v7258_v32 }
 0x1c7   :  { %v5509_v2 = vpop.f32.mrf.mxu0 }
 0x1c8   :  { %v2142_v35 = vpop.f32.mrf.mxu1  ;;  %6057 = vmatmul.mubr.f32.gmra.mxu1 %v10363_v42 }
 0x1c9   :  { %v1548_v46 = vpop.f32.mrf.mxu0  ;;  %5856 = vmatmul.mubr.f32.gmra.mxu0 %v7186_v45  ;;  %6059 = vmatprep.mubr.msk.f32.mxu1 %vm6613_vm9, %v6612_v11 }
 0x1ca   :  { %v8238_v14 = vadd.f32 %v2130_v15, %v1548_v46  ;;  %v5713_v53 = vpop.f32.mrf.mxu1  ;;  %5858 = vmatprep.mubr.msk.f32.mxu0 %vm6613_vm9, %v6612_v11  ;;  %v10366_v46 = vand.u32 4294901760, %v7276_v17 }
 0x1cb   :  { %v5512_v40 = vpop.f32.mrf.mxu0 }
 0x1cc   :  { %v2148_v52 = vpop.f32.mrf.mxu1  ;;  %6060 = vmatmul.mubr.f32.gmra.mxu1 %v10364_v61 }
 0x1cd   :  { %v1558_v49 = vpop.f32.mrf.mxu0  ;;  %5859 = vmatmul.mubr.f32.gmra.mxu0 %v7204_v18  ;;  %6062 = vmatprep.mubr.msk.f32.mxu1 %vm6613_vm9, %v6612_v11 }
 0x1ce   :  { %v8247_v45 = vadd.f32 %v2136_v10, %v1558_v49  ;;  %v5716_v31 = vpop.f32.mrf.mxu1  ;;  %5861 = vmatprep.mubr.msk.f32.mxu0 %vm6613_vm9, %v6612_v11  ;;  %v10367_v49 = vand.u32 4294901760, %v7294_v59 }
 0x1cf   :  { %v5515_v15 = vpop.f32.mrf.mxu0 }
 0x1d0   :  { %v2154_v47 = vpop.f32.mrf.mxu1  ;;  %6063 = vmatmul.mubr.f32.gmra.mxu1 %v10365_v60 }
 0x1d1   :  { %v1568_v38 = vpop.f32.mrf.mxu0  ;;  %5862 = vmatmul.mubr.f32.gmra.mxu0 %v7222_v29  ;;  %6065 = vmatprep.mubr.msk.f32.mxu1 %vm6613_vm9, %v6612_v11 }
 0x1d2   :  { %v8256_v18 = vadd.f32 %v2142_v35, %v1568_v38  ;;  %v5719_v2 = vpop.f32.mrf.mxu1  ;;  %5864 = vmatprep.mubr.msk.f32.mxu0 %vm6613_vm9, %v6612_v11  ;;  %v10368_v38 = vand.u32 4294901760, %v7312_v58 }
 0x1d3   :  { %v5518_v10 = vpop.f32.mrf.mxu0 }
 0x1d4   :  { %v2160_v42 = vpop.f32.mrf.mxu1  ;;  %6066 = vmatmul.mubr.f32.gmra.mxu1 %v10366_v46 }
 0x1d5   :  { %v1578_v53 = vpop.f32.mrf.mxu0  ;;  %5865 = vmatmul.mubr.f32.gmra.mxu0 %v7240_v4  ;;  %6068 = vmatprep.mubr.msk.f32.mxu1 %vm6613_vm9, %v6612_v11 }
 0x1d6   :  { %v8265_v29 = vadd.f32 %v2148_v52, %v1578_v53  ;;  %v5722_v40 = vpop.f32.mrf.mxu1  ;;  %5867 = vmatprep.mubr.msk.f32.mxu0 %vm6613_vm9, %v6612_v11  ;;  %v10369_v53 = vand.u32 4294901760, %v7330_v63 }
 0x1d7   :  { %v5521_v35 = vpop.f32.mrf.mxu0 }
 0x1d8   :  { %v2166_v61 = vpop.f32.mrf.mxu1  ;;  %6069 = vmatmul.mubr.f32.gmra.mxu1 %v10367_v49 }
 0x1d9   :  { %v1588_v31 = vpop.f32.mrf.mxu0  ;;  %5868 = vmatmul.mubr.f32.gmra.mxu0 %v7258_v32  ;;  %6071 = vmatprep.mubr.msk.f32.mxu1 %vm6613_vm9, %v6612_v11 }
 0x1da   :  { %v8274_v4 = vadd.f32 %v2154_v47, %v1588_v31  ;;  %v5725_v15 = vpop.f32.mrf.mxu1  ;;  %5870 = vmatprep.mubr.msk.f32.mxu0 %vm6613_vm9, %v6612_v11  ;;  %v10370_v31 = vand.u32 4294901760, %v7348_v23 }
 0x1db   :  { %v5524_v52 = vpop.f32.mrf.mxu0 }
 0x1dc   :  { %v2172_v60 = vpop.f32.mrf.mxu1  ;;  %6072 = vmatmul.mubr.f32.gmra.mxu1 %v10368_v38 }
 0x1dd   :  { %v1598_v2 = vpop.f32.mrf.mxu0  ;;  %5871 = vmatmul.mubr.f32.gmra.mxu0 %v7276_v17  ;;  %6074 = vmatprep.mubr.msk.f32.mxu1 %vm6613_vm9, %v6612_v11 }
 0x1de   :  { %v8283_v32 = vadd.f32 %v2160_v42, %v1598_v2  ;;  %v5728_v10 = vpop.f32.mrf.mxu1  ;;  %5873 = vmatprep.mubr.msk.f32.mxu0 %vm6613_vm9, %v6612_v11  ;;  %v10371_v2 = vand.u32 4294901760, %v7366_v50 }
 0x1df   :  { %v5527_v47 = vpop.f32.mrf.mxu0 }
 0x1e0   :  { %v2178_v46 = vpop.f32.mrf.mxu1  ;;  %6075 = vmatmul.mubr.f32.gmra.mxu1 %v10369_v53 }
 0x1e1   :  { %v1608_v40 = vpop.f32.mrf.mxu0  ;;  %5874 = vmatmul.mubr.f32.gmra.mxu0 %v7294_v59  ;;  %6077 = vmatprep.mubr.msk.f32.mxu1 %vm6613_vm9, %v6612_v11 }
 0x1e2   :  { %v8292_v17 = vadd.f32 %v2166_v61, %v1608_v40  ;;  %v5731_v35 = vpop.f32.mrf.mxu1  ;;  %5876 = vmatprep.mubr.msk.f32.mxu0 %vm6613_vm9, %v6612_v11  ;;  %v10372_v40 = vand.u32 4294901760, %v7384_v62 }
 0x1e3   :  { %v5530_v42 = vpop.f32.mrf.mxu0 }
 0x1e4   :  { %v2184_v49 = vpop.f32.mrf.mxu1  ;;  %6078 = vmatmul.mubr.f32.gmra.mxu1 %v10370_v31 }
 0x1e5   :  { %v1618_v15 = vpop.f32.mrf.mxu0  ;;  %5877 = vmatmul.mubr.f32.gmra.mxu0 %v7312_v58  ;;  %6080 = vmatprep.mubr.msk.f32.mxu1 %vm6613_vm9, %v6612_v11 }
 0x1e6   :  { %v8301_v59 = vadd.f32 %v2172_v60, %v1618_v15  ;;  %v5734_v52 = vpop.f32.mrf.mxu1  ;;  %5879 = vmatprep.mubr.msk.f32.mxu0 %vm6613_vm9, %v6612_v11  ;;  %v10373_v15 = vand.u32 4294901760, %v7402_v16 }
 0x1e7   :  { %v5533_v61 = vpop.f32.mrf.mxu0 }
 0x1e8   :  { %v2190_v38 = vpop.f32.mrf.mxu1  ;;  %6081 = vmatmul.mubr.f32.gmra.mxu1 %v10371_v2 }
 0x1e9   :  { %v1628_v10 = vpop.f32.mrf.mxu0  ;;  %5880 = vmatmul.mubr.f32.gmra.mxu0 %v7330_v63  ;;  %6083 = vmatprep.mubr.msk.f32.mxu1 %vm6613_vm9, %v6612_v11 }
 0x1ea   :  { %v8310_v58 = vadd.f32 %v2178_v46, %v1628_v10  ;;  %v5737_v47 = vpop.f32.mrf.mxu1  ;;  %5882 = vmatprep.mubr.msk.f32.mxu0 %vm6613_vm9, %v6612_v11  ;;  %v10374_v10 = vand.u32 4294901760, %v7420_v48 }
 0x1eb   :  { %v5536_v60 = vpop.f32.mrf.mxu0 }
 0x1ec   :  { %v2196_v53 = vpop.f32.mrf.mxu1  ;;  %6084 = vmatmul.mubr.f32.gmra.mxu1 %v10372_v40 }
 0x1ed   :  { %v1638_v35 = vpop.f32.mrf.mxu0  ;;  %5883 = vmatmul.mubr.f32.gmra.mxu0 %v7348_v23  ;;  %6086 = vmatprep.mubr.msk.f32.mxu1 %vm6613_vm9, %v6612_v11 }
 0x1ee   :  { %v8319_v63 = vadd.f32 %v2184_v49, %v1638_v35  ;;  %v5740_v42 = vpop.f32.mrf.mxu1  ;;  %5885 = vmatprep.mubr.msk.f32.mxu0 %vm6613_vm9, %v6612_v11  ;;  %v10375_v35 = vand.u32 4294901760, %v7438_v24 }
 0x1ef   :  { %v5539_v46 = vpop.f32.mrf.mxu0 }
 0x1f0   :  { %v2202_v31 = vpop.f32.mrf.mxu1  ;;  %6087 = vmatmul.mubr.f32.gmra.mxu1 %v10373_v15 }
 0x1f1   :  { %v1648_v52 = vpop.f32.mrf.mxu0  ;;  %5886 = vmatmul.mubr.f32.gmra.mxu0 %v7366_v50  ;;  %6089 = vmatprep.mubr.msk.f32.mxu1 %vm6613_vm9, %v6612_v11 }
 0x1f2   :  { %v8328_v23 = vadd.f32 %v2190_v38, %v1648_v52  ;;  %v5743_v61 = vpop.f32.mrf.mxu1  ;;  %5888 = vmatprep.mubr.msk.f32.mxu0 %vm6613_vm9, %v6612_v11  ;;  %v10376_v52 = vand.u32 4294901760, %v7456_v1 }
 0x1f3   :  { %v5542_v49 = vpop.f32.mrf.mxu0 }
 0x1f4   :  { %v2208_v2 = vpop.f32.mrf.mxu1  ;;  %6090 = vmatmul.mubr.f32.gmra.mxu1 %v10374_v10 }
 0x1f5   :  { %v1658_v47 = vpop.f32.mrf.mxu0  ;;  %5889 = vmatmul.mubr.f32.gmra.mxu0 %v7384_v62  ;;  %6092 = vmatprep.mubr.msk.f32.mxu1 %vm6613_vm9, %v6612_v11 }
 0x1f6   :  { %v8337_v50 = vadd.f32 %v2196_v53, %v1658_v47  ;;  %v5746_v60 = vpop.f32.mrf.mxu1  ;;  %5891 = vmatprep.mubr.msk.f32.mxu0 %vm6613_vm9, %v6612_v11  ;;  %v10377_v47 = vand.u32 4294901760, %v7474_v9 }
 0x1f7   :  { %v5545_v38 = vpop.f32.mrf.mxu0 }
 0x1f8   :  { %v2214_v40 = vpop.f32.mrf.mxu1  ;;  %6093 = vmatmul.mubr.f32.gmra.mxu1 %v10375_v35 }
 0x1f9   :  { %v1668_v42 = vpop.f32.mrf.mxu0  ;;  %5892 = vmatmul.mubr.f32.gmra.mxu0 %v7402_v16  ;;  %6095 = vmatprep.mubr.msk.f32.mxu1 %vm6613_vm9, %v6612_v11 }
 0x1fa   :  { %v8346_v62 = vadd.f32 %v2202_v31, %v1668_v42  ;;  %v5749_v46 = vpop.f32.mrf.mxu1  ;;  %5894 = vmatprep.mubr.msk.f32.mxu0 %vm6613_vm9, %v6612_v11  ;;  %v10378_v42 = vand.u32 4294901760, %v7492_v56 }
 0x1fb   :  { %v5548_v53 = vpop.f32.mrf.mxu0 }
 0x1fc   :  { %v2220_v15 = vpop.f32.mrf.mxu1  ;;  %6096 = vmatmul.mubr.f32.gmra.mxu1 %v10376_v52 }
 0x1fd   :  { %v1678_v61 = vpop.f32.mrf.mxu0  ;;  %5895 = vmatmul.mubr.f32.gmra.mxu0 %v7420_v48  ;;  %6098 = vmatprep.mubr.msk.f32.mxu1 %vm6613_vm9, %v6612_v11 }
 0x1fe   :  { %v8355_v16 = vadd.f32 %v2208_v2, %v1678_v61  ;;  %v5752_v49 = vpop.f32.mrf.mxu1  ;;  %5897 = vmatprep.mubr.msk.f32.mxu0 %vm6613_vm9, %v6612_v11  ;;  %v10379_v61 = vand.u32 4294901760, %v7510_v44 }
 0x1ff   :  { %v5551_v31 = vpop.f32.mrf.mxu0 }
 0x200   :  { %v2226_v10 = vpop.f32.mrf.mxu1  ;;  %6099 = vmatmul.mubr.f32.gmra.mxu1 %v10377_v47 }
 0x201   :  { %v1688_v60 = vpop.f32.mrf.mxu0  ;;  %5898 = vmatmul.mubr.f32.gmra.mxu0 %v7438_v24  ;;  %6101 = vmatprep.mubr.msk.f32.mxu1 %vm6613_vm9, %v6612_v11 }
 0x202   :  { %v8364_v48 = vadd.f32 %v2214_v40, %v1688_v60  ;;  %v5755_v38 = vpop.f32.mrf.mxu1  ;;  %5900 = vmatprep.mubr.msk.f32.mxu0 %vm6613_vm9, %v6612_v11  ;;  %v10380_v60 = vld [vmem:[#allocation42_spill] sm:$0xff] }
 0x203   :  { %v5554_v2 = vpop.f32.mrf.mxu0  ;;  %v10381_v38 = vand.u32 4294901760, %v10380_v60 }
 0x204   :  { %v2232_v35 = vpop.f32.mrf.mxu1  ;;  %6102 = vmatmul.mubr.f32.gmra.mxu1 %v10378_v42 }
 0x205   :  { %v1698_v46 = vpop.f32.mrf.mxu0  ;;  %5901 = vmatmul.mubr.f32.gmra.mxu0 %v7456_v1  ;;  %6104 = vmatprep.mubr.msk.f32.mxu1 %vm6613_vm9, %v6612_v11 }
 0x206   :  { %v8373_v24 = vadd.f32 %v2220_v15, %v1698_v46  ;;  %v5758_v53 = vpop.f32.mrf.mxu1  ;;  %5903 = vmatprep.mubr.msk.f32.mxu0 %vm6613_vm9, %v6612_v11 }
 0x207   :  { %v5557_v40 = vpop.f32.mrf.mxu0  ;;  %v10382_v53 = vld [vmem:[#allocation44_spill] sm:$0xff] }
 0x208   :  { %v2238_v52 = vpop.f32.mrf.mxu1  ;;  %6105 = vmatmul.mubr.f32.gmra.mxu1 %v10379_v61  ;;  %v10383_v40 = vand.u32 4294901760, %v10382_v53 }
 0x209   :  { %v1708_v49 = vpop.f32.mrf.mxu0  ;;  %5904 = vmatmul.mubr.f32.gmra.mxu0 %v7474_v9  ;;  %6107 = vmatprep.mubr.msk.f32.mxu1 %vm6613_vm9, %v6612_v11 }
 0x20a   :  { %v8382_v1 = vadd.f32 %v2226_v10, %v1708_v49  ;;  %v5761_v31 = vpop.f32.mrf.mxu1  ;;  %5906 = vmatprep.mubr.msk.f32.mxu0 %vm6613_vm9, %v6612_v11 }
 0x20b   :  { %v5560_v15 = vpop.f32.mrf.mxu0 }
 0x20c   :  { %v2244_v47 = vpop.f32.mrf.mxu1  ;;  %6108 = vmatmul.mubr.f32.gmra.mxu1 %v10381_v38  ;;  %v10385_v15 = vld [vmem:[#allocation46_spill] sm:$0xff] }
 0x20d   :  { %v1718_v2 = vpop.f32.mrf.mxu0  ;;  %5907 = vmatmul.mubr.f32.gmra.mxu0 %v7492_v56  ;;  %6110 = vmatprep.mubr.msk.f32.mxu1 %vm6613_vm9, %v6612_v11  ;;  %v10386_v38 = vand.u32 4294901760, %v10385_v15 }
 0x20e   :  { %v8391_v9 = vadd.f32 %v2232_v35, %v1718_v2  ;;  %v5764_v42 = vpop.f32.mrf.mxu1  ;;  %5909 = vmatprep.mubr.msk.f32.mxu0 %vm6613_vm9, %v6612_v11 }
 0x20f   :  { %v5563_v10 = vpop.f32.mrf.mxu0 }
 0x210   :  { %v2250_v46 = vpop.f32.mrf.mxu1  ;;  %6111 = vmatmul.mubr.f32.gmra.mxu1 %v10383_v40  ;;  %v10388_v40 = vld [vmem:[#allocation48_spill] sm:$0xff] }
 0x211   :  { %v1728_v61 = vpop.f32.mrf.mxu0  ;;  %5910 = vmatmul.mubr.f32.gmra.mxu0 %v7510_v44  ;;  %6113 = vmatprep.mubr.msk.f32.mxu1 %vm6613_vm9, %v6612_v11 }
 0x212   :  { %v8400_v56 = vadd.f32 %v2238_v52, %v1728_v61  ;;  %v5767_v49 = vpop.f32.mrf.mxu1  ;;  %5912 = vmatprep.mubr.msk.f32.mxu0 %vm6613_vm9, %v6612_v11  ;;  %v10389_v61 = vand.u32 4294901760, %v10388_v40 }
 0x213   :  { %v5566_v35 = vpop.f32.mrf.mxu0 }
 0x214   :  { %10384 = vst [vmem:[#allocation42_spill] sm:$0xff] %v8400_v56  ;;  %v2256_v31 = vpop.f32.mrf.mxu1  ;;  %6114 = vmatmul.mubr.f32.gmra.mxu1 %v10386_v38 }
 0x215   :  { %v1738_v2 = vpop.f32.mrf.mxu0  ;;  %5913 = vmatmul.mubr.f32.gmra.mxu0 %v10380_v60  ;;  %6116 = vmatprep.mubr.msk.f32.mxu1 %vm6613_vm9, %v6612_v11 }
 0x216   :  { %v8409_v44 = vadd.f32 %v2244_v47, %v1738_v2  ;;  %v5770_v42 = vpop.f32.mrf.mxu1  ;;  %5915 = vmatprep.mubr.msk.f32.mxu0 %vm6613_vm9, %v6612_v11  ;;  %v10391_v2 = vld [vmem:[#allocation50_spill] sm:$0xff] }
 0x217   :  { %v5569_v52 = vpop.f32.mrf.mxu0  ;;  %v10392_v42 = vand.u32 4294901760, %v10391_v2 }
 0x218   :  { %10387 = vst [vmem:[#allocation44_spill] sm:$0xff] %v8409_v44  ;;  %v2262_v10 = vpop.f32.mrf.mxu1  ;;  %6117 = vmatmul.mubr.f32.gmra.mxu1 %v10389_v61 }
 0x219   :  { %v1748_v49 = vpop.f32.mrf.mxu0  ;;  %5916 = vmatmul.mubr.f32.gmra.mxu0 %v10382_v53  ;;  %6119 = vmatprep.mubr.msk.f32.mxu1 %vm6613_vm9, %v6612_v11 }
 0x21a   :  { %v8418_v60 = vadd.f32 %v2250_v46, %v1748_v49  ;;  %v5773_v35 = vpop.f32.mrf.mxu1  ;;  %5918 = vmatprep.mubr.msk.f32.mxu0 %vm6613_vm9, %v6612_v11 }
 0x21b   :  { %v5572_v47 = vpop.f32.mrf.mxu0  ;;  %v10394_v35 = vld [vmem:[#allocation52_spill] sm:$0xff] }
 0x21c   :  { %10390 = vst [vmem:[#allocation46_spill] sm:$0xff] %v8418_v60  ;;  %v2268_v38 = vpop.f32.mrf.mxu1  ;;  %6120 = vmatmul.mubr.f32.gmra.mxu1 %v10392_v42  ;;  %v10395_v47 = vand.u32 4294901760, %v10394_v35 }
 0x21d   :  { %v1758_v52 = vpop.f32.mrf.mxu0  ;;  %5919 = vmatmul.mubr.f32.gmra.mxu0 %v10385_v15  ;;  %6122 = vmatprep.mubr.msk.f32.mxu1 %vm6613_vm9, %v6612_v11 }
 0x21e   :  { %v8427_v53 = vadd.f32 %v2256_v31, %v1758_v52  ;;  %v5776_v61 = vpop.f32.mrf.mxu1  ;;  %5921 = vmatprep.mubr.msk.f32.mxu0 %vm6613_vm9, %v6612_v11 }
 0x21f   :  { %v5575_v46 = vpop.f32.mrf.mxu0  ;;  %v10397_v61 = vld [vmem:[#allocation54_spill] sm:$0xff] }
 0x220   :  { %10393 = vst [vmem:[#allocation48_spill] sm:$0xff] %v8427_v53  ;;  %v2274_v49 = vpop.f32.mrf.mxu1  ;;  %6123 = vmatmul.mubr.f32.gmra.mxu1 %v10395_v47  ;;  %v10398_v46 = vand.u32 4294901760, %v10397_v61 }
 0x221   :  { %v1768_v34 = vpop.f32.mrf.mxu0  ;;  %5922 = vmatmul.mubr.f32.gmra.mxu0 %v10388_v40  ;;  %6125 = vmatprep.mubr.msk.f32.mxu1 %vm6613_vm9, %v6612_v11 }
 0x222   :  { %v8436_v15 = vadd.f32 %v2262_v10, %v1768_v34  ;;  %v5779_v42 = vpop.f32.mrf.mxu1  ;;  %5924 = vmatprep.mubr.msk.f32.mxu0 %vm6613_vm9, %v6612_v11 }
 0x223   :  { %v5578_v31 = vpop.f32.mrf.mxu0  ;;  %v10400_v42 = vld [vmem:[#allocation56_spill] sm:$0xff] }
 0x224   :  { %10396 = vst [vmem:[#allocation50_spill] sm:$0xff] %v8436_v15  ;;  %v2280_v52 = vpop.f32.mrf.mxu1  ;;  %6126 = vmatmul.mubr.f32.gmra.mxu1 %v10398_v46  ;;  %v10401_v31 = vand.u32 4294901760, %v10400_v42 }
 0x225   :  { %v1778_v53 = vpop.f32.mrf.mxu0  ;;  %5925 = vmatmul.mubr.f32.gmra.mxu0 %v10391_v2  ;;  %6128 = vmatprep.mubr.msk.f32.mxu1 %vm6613_vm9, %v6612_v11 }
 0x226   :  { %v8445_v40 = vadd.f32 %v2268_v38, %v1778_v53  ;;  %v5782_v47 = vpop.f32.mrf.mxu1  ;;  %5927 = vmatprep.mubr.msk.f32.mxu0 %vm6613_vm9, %v6612_v11 }
 0x227   :  { %v5581_v34 = vpop.f32.mrf.mxu0  ;;  %v10403_v47 = vld [vmem:[#allocation58_spill] sm:$0xff] }
 0x228   :  { %10399 = vst [vmem:[#allocation52_spill] sm:$0xff] %v8445_v40  ;;  %v2286_v10 = vpop.f32.mrf.mxu1  ;;  %6129 = vmatmul.mubr.f32.gmra.mxu1 %v10401_v31  ;;  %v10404_v34 = vand.u32 4294901760, %v10403_v47 }
 0x229   :  { %v1788_v15 = vpop.f32.mrf.mxu0  ;;  %5928 = vmatmul.mubr.f32.gmra.mxu0 %v10394_v35  ;;  %6131 = vmatprep.mubr.msk.f32.mxu1 %vm6613_vm9, %v6612_v11 }
 0x22a   :  { %v8454_v2 = vadd.f32 %v2274_v49, %v1788_v15  ;;  %v5785_v46 = vpop.f32.mrf.mxu1  ;;  %5930 = vmatprep.mubr.msk.f32.mxu0 %vm6613_vm9, %v6612_v11 }
 0x22b   :  { %v5584_v38 = vpop.f32.mrf.mxu0  ;;  %v10406_v46 = vld [vmem:[#allocation60_spill] sm:$0xff] }
 0x22c   :  { %10402 = vst [vmem:[#allocation54_spill] sm:$0xff] %v8454_v2  ;;  %v2292_v53 = vpop.f32.mrf.mxu1  ;;  %6132 = vmatmul.mubr.f32.gmra.mxu1 %v10404_v34  ;;  %v10407_v38 = vand.u32 4294901760, %v10406_v46 }
 0x22d   :  { %v1798_v40 = vpop.f32.mrf.mxu0  ;;  %5931 = vmatmul.mubr.f32.gmra.mxu0 %v10397_v61  ;;  %6134 = vmatprep.mubr.msk.f32.mxu1 %vm6613_vm9, %v6612_v11 }
 0x22e   :  { %v8463_v35 = vadd.f32 %v2280_v52, %v1798_v40  ;;  %v5788_v31 = vpop.f32.mrf.mxu1  ;;  %5933 = vmatprep.mubr.msk.f32.mxu0 %vm6613_vm9, %v6612_v11 }
 0x22f   :  { %v5587_v49 = vpop.f32.mrf.mxu0  ;;  %v10409_v31 = vld [vmem:[#allocation62_spill] sm:$0xff] }
 0x230   :  { %10405 = vst [vmem:[#allocation56_spill] sm:$0xff] %v8463_v35  ;;  %v2298_v15 = vpop.f32.mrf.mxu1  ;;  %6135 = vmatmul.mubr.f32.gmra.mxu1 %v10407_v38  ;;  %v10410_v49 = vand.u32 4294901760, %v10409_v31 }
 0x231   :  { %v1808_v2 = vpop.f32.mrf.mxu0  ;;  %5934 = vmatmul.mubr.f32.gmra.mxu0 %v10400_v42  ;;  %6137 = vmatprep.mubr.msk.f32.mxu1 %vm6613_vm9, %v6612_v11 }
 0x232   :  { %v8472_v61 = vadd.f32 %v2286_v10, %v1808_v2  ;;  %v5791_v34 = vpop.f32.mrf.mxu1  ;;  %5936 = vmatprep.mubr.msk.f32.mxu0 %vm6613_vm9, %v6612_v11 }
 0x233   :  { %v5590_v52 = vpop.f32.mrf.mxu0  ;;  %v10412_v34 = vld [vmem:[#allocation64_spill] sm:$0xff] }
 0x234   :  { %10408 = vst [vmem:[#allocation58_spill] sm:$0xff] %v8472_v61  ;;  %v2304_v40 = vpop.f32.mrf.mxu1  ;;  %6138 = vmatmul.mubr.f32.gmra.mxu1 %v10410_v49  ;;  %v10413_v52 = vand.u32 4294901760, %v10412_v34 }
 0x235   :  { %v1818_v35 = vpop.f32.mrf.mxu0  ;;  %5937 = vmatmul.mubr.f32.gmra.mxu0 %v10403_v47  ;;  %6140 = vmatprep.mubr.msk.f32.mxu1 %vm6613_vm9, %v6612_v11 }
 0x236   :  { %v8481_v42 = vadd.f32 %v2292_v53, %v1818_v35  ;;  %v5794_v38 = vpop.f32.mrf.mxu1  ;;  %5939 = vmatprep.mubr.msk.f32.mxu0 %vm6613_vm9, %v6612_v11 }
 0x237   :  { %v5593_v10 = vpop.f32.mrf.mxu0  ;;  %v10415_v38 = vld [vmem:[#allocation66_spill] sm:$0xff] }
 0x238   :  { %10411 = vst [vmem:[#allocation60_spill] sm:$0xff] %v8481_v42  ;;  %v2310_v2 = vpop.f32.mrf.mxu1  ;;  %6141 = vmatmul.mubr.f32.gmra.mxu1 %v10413_v52  ;;  %v10416_v10 = vand.u32 4294901760, %v10415_v38 }
 0x239   :  { %v1828_v61 = vpop.f32.mrf.mxu0  ;;  %5940 = vmatmul.mubr.f32.gmra.mxu0 %v10406_v46  ;;  %6143 = vmatprep.mubr.msk.f32.mxu1 %vm6613_vm9, %v6612_v11 }
 0x23a   :  { %v8490_v47 = vadd.f32 %v2298_v15, %v1828_v61  ;;  %v5797_v49 = vpop.f32.mrf.mxu1  ;;  %5942 = vmatprep.mubr.msk.f32.mxu0 %vm6613_vm9, %v6612_v11 }
 0x23b   :  { %v5596_v53 = vpop.f32.mrf.mxu0  ;;  %v10418_v49 = vld [vmem:[#allocation68_spill] sm:$0xff] }
 0x23c   :  { %10414 = vst [vmem:[#allocation62_spill] sm:$0xff] %v8490_v47  ;;  %v2316_v35 = vpop.f32.mrf.mxu1  ;;  %6144 = vmatmul.mubr.f32.gmra.mxu1 %v10416_v10  ;;  %v10419_v53 = vand.u32 4294901760, %v10418_v49 }
 0x23d   :  { %v1838_v42 = vpop.f32.mrf.mxu0  ;;  %5943 = vmatmul.mubr.f32.gmra.mxu0 %v10409_v31  ;;  %6146 = vmatprep.mubr.msk.f32.mxu1 %vm6613_vm9, %v6612_v11 }
 0x23e   :  { %v8499_v46 = vadd.f32 %v2304_v40, %v1838_v42  ;;  %v5800_v52 = vpop.f32.mrf.mxu1  ;;  %5945 = vmatprep.mubr.msk.f32.mxu0 %vm6613_vm9, %v6612_v11 }
 0x23f   :  { %v5599_v15 = vpop.f32.mrf.mxu0  ;;  %v10421_v52 = vld [vmem:[#allocation70_spill] sm:$0xff] }
 0x240   :  { %10417 = vst [vmem:[#allocation64_spill] sm:$0xff] %v8499_v46  ;;  %v2904_v61 = vpop.f32.mrf.mxu1  ;;  %6147 = vmatmul.mubr.f32.gmra.mxu1 %v10419_v53  ;;  %v10422_v15 = vand.u32 4294901760, %v10421_v52 }
 0x241   :  { %v1848_v47 = vpop.f32.mrf.mxu0  ;;  %5946 = vmatmul.mubr.f32.gmra.mxu0 %v10412_v34  ;;  %6149 = vmatprep.mubr.msk.f32.mxu1 %vm6613_vm9, %v6612_v11 }
 0x242   :  { %v8508_v31 = vadd.f32 %v2310_v2, %v1848_v47  ;;  %v6004_v10 = vpop.f32.mrf.mxu1  ;;  %5948 = vmatprep.mubr.msk.f32.mxu0 %vm6613_vm9, %v6612_v11 }
 0x243   :  { %v5602_v40 = vpop.f32.mrf.mxu0  ;;  %v10424_v10 = vld [vmem:[#allocation72_spill] sm:$0xff] }
 0x244   :  { %10420 = vst [vmem:[#allocation66_spill] sm:$0xff] %v8508_v31  ;;  %v2912_v42 = vpop.f32.mrf.mxu1  ;;  %6150 = vmatmul.mubr.f32.gmra.mxu1 %v10422_v15  ;;  %v10425_v40 = vand.u32 4294901760, %v10424_v10 }
 0x245   :  { %v1858_v46 = vpop.f32.mrf.mxu0  ;;  %5949 = vmatmul.mubr.f32.gmra.mxu0 %v10415_v38  ;;  %6152 = vmatprep.mubr.msk.f32.mxu1 %vm6613_vm9, %v6612_v11  ;;  %v10426_v38 = vld [vmem:[#allocation76_spill] sm:$0xff] }
 0x246   :  { %v8517_v34 = vadd.f32 %v2316_v35, %v1858_v46  ;;  %v6007_v53 = vpop.f32.mrf.mxu1  ;;  %5951 = vmatprep.mubr.msk.f32.mxu0 %vm6613_vm9, %v6612_v11 }
 0x247   :  { %v5605_v2 = vpop.f32.mrf.mxu0  ;;  %v10427_v53 = vld [vmem:[#allocation74_spill] sm:$0xff] }
 0x248   :  { %10423 = vst [vmem:[#allocation68_spill] sm:$0xff] %v8517_v34  ;;  %v2920_v47 = vpop.f32.mrf.mxu1  ;;  %6153 = vmatmul.mubr.f32.gmra.mxu1 %v10425_v40  ;;  %v10428_v2 = vand.u32 4294901760, %v10427_v53 }
 0x249   :  { %v2394_v31 = vpop.f32.mrf.mxu0  ;;  %5952 = vmatmul.mubr.f32.gmra.mxu0 %v10418_v49  ;;  %6155 = vmatprep.mubr.msk.f32.mxu1 %vm6613_vm9, %v6612_v11  ;;  %v10430_v49 = vld [vmem:[#allocation79_spill] sm:$0xff] }
 0x24a   :  { %v2395_v15 = vadd.f32 %v2394_v31, %v10426_v38  ;;  %v6010_v60 = vpop.f32.mrf.mxu1  ;;  %5954 = vmatprep.mubr.msk.f32.mxu0 %vm6613_vm9, %v6612_v11 }
 0x24b   :  { %v5809_v35 = vpop.f32.mrf.mxu0 }
 0x24c   :  { %v2928_v46 = vpop.f32.mrf.mxu1  ;;  %6156 = vmatmul.mubr.f32.gmra.mxu1 %v10428_v2  ;;  %v8531_v34 = vadd.f32 %v2904_v61, %v2395_v15  ;;  %v10431_v35 = vld [vmem:[#allocation77_spill] sm:$0xff] }
 0x24d   :  { %v2401_v40 = vpop.f32.mrf.mxu0  ;;  %5955 = vmatmul.mubr.f32.gmra.mxu0 %v10421_v52  ;;  %6158 = vmatprep.mubr.msk.f32.mxu1 %vm6613_vm9, %v6612_v11  ;;  %v10432_v56 = vand.u32 4294901760, %v10431_v35  ;;  %v10434_v52 = vld [vmem:[#allocation82_spill] sm:$0xff] }
 0x24e   :  { %10429 = vst [vmem:[#allocation70_spill] sm:$0xff] %v8531_v34  ;;  %v2402_v44 = vadd.f32 %v2401_v40, %v10430_v49  ;;  %v6013_v31 = vpop.f32.mrf.mxu1  ;;  %5957 = vmatprep.mubr.msk.f32.mxu0 %vm6613_vm9, %v6612_v11 }
 0x24f   :  { %v5812_v60 = vpop.f32.mrf.mxu0 }
 0x250   :  { %v2936_v38 = vpop.f32.mrf.mxu1  ;;  %6159 = vmatmul.mubr.f32.gmra.mxu1 %v10432_v56  ;;  %v8541_v2 = vadd.f32 %v2912_v42, %v2402_v44  ;;  %v10435_v60 = vld [vmem:[#allocation80_spill] sm:$0xff]  ;;  %v10438_v42 = vld [vmem:[#allocation85_spill] sm:$0xff] }
 0x251   :  { %v2408_v61 = vpop.f32.mrf.mxu0  ;;  %5958 = vmatmul.mubr.f32.gmra.mxu0 %v10424_v10  ;;  %6161 = vmatprep.mubr.msk.f32.mxu1 %vm6613_vm9, %v6612_v11  ;;  %v10436_v34 = vand.u32 4294901760, %v10435_v60 }
 0x252   :  { %10433 = vst [vmem:[#allocation72_spill] sm:$0xff] %v8541_v2  ;;  %v2409_v15 = vadd.f32 %v2408_v61, %v10434_v52  ;;  %v6016_v40 = vpop.f32.mrf.mxu1  ;;  %5960 = vmatprep.mubr.msk.f32.mxu0 %vm6613_vm9, %v6612_v11 }
 0x253   :  { %v5815_v49 = vpop.f32.mrf.mxu0 }
 0x254   :  { %v2944_v31 = vpop.f32.mrf.mxu1  ;;  %6162 = vmatmul.mubr.f32.gmra.mxu1 %v10436_v34  ;;  %v8551_v56 = vadd.f32 %v2920_v47, %v2409_v15  ;;  %v10439_v49 = vld [vmem:[#allocation83_spill] sm:$0xff] }
 0x255   :  { %v2415_v44 = vpop.f32.mrf.mxu0  ;;  %5961 = vmatmul.mubr.f32.gmra.mxu0 %v10427_v53  ;;  %6164 = vmatprep.mubr.msk.f32.mxu1 %vm6613_vm9, %v6612_v11  ;;  %v10440_v2 = vand.u32 4294901760, %v10439_v49  ;;  %v10442_v53 = vld [vmem:[#allocation88_spill] sm:$0xff] }
 0x256   :  { %10437 = vst [vmem:[#allocation76_spill] sm:$0xff] %v8551_v56  ;;  %v2416_v10 = vadd.f32 %v2415_v44, %v10438_v42  ;;  %v6019_v61 = vpop.f32.mrf.mxu1  ;;  %5963 = vmatprep.mubr.msk.f32.mxu0 %vm6613_vm9, %v6612_v11 }
 0x257   :  { %v5818_v52 = vpop.f32.mrf.mxu0 }
 0x258   :  { %v2952_v40 = vpop.f32.mrf.mxu1  ;;  %6165 = vmatmul.mubr.f32.gmra.mxu1 %v10440_v2  ;;  %v8561_v34 = vadd.f32 %v2928_v46, %v2416_v10  ;;  %v10443_v52 = vld [vmem:[#allocation86_spill] sm:$0xff] }
 0x259   :  { %v2422_v47 = vpop.f32.mrf.mxu0  ;;  %5964 = vmatmul.mubr.f32.gmra.mxu0 %v10431_v35  ;;  %6167 = vmatprep.mubr.msk.f32.mxu1 %vm6613_vm9, %v6612_v11  ;;  %v10444_v56 = vand.u32 4294901760, %v10443_v52  ;;  %v10446_v35 = vld [vmem:[#allocation91_spill] sm:$0xff] }
 0x25a   :  { %10441 = vst [vmem:[#allocation74_spill] sm:$0xff] %v8561_v34  ;;  %v2423_v15 = vadd.f32 %v2422_v47, %v10442_v53  ;;  %v6022_v44 = vpop.f32.mrf.mxu1  ;;  %5966 = vmatprep.mubr.msk.f32.mxu0 %vm6613_vm9, %v6612_v11 }
 0x25b   :  { %v5821_v42 = vpop.f32.mrf.mxu0 }
 0x25c   :  { %v2960_v61 = vpop.f32.mrf.mxu1  ;;  %6168 = vmatmul.mubr.f32.gmra.mxu1 %v10444_v56  ;;  %v8571_v2 = vadd.f32 %v2936_v38, %v2423_v15  ;;  %v10447_v42 = vld [vmem:[#allocation89_spill] sm:$0xff] }
 0x25d   :  { %v2429_v46 = vpop.f32.mrf.mxu0  ;;  %5967 = vmatmul.mubr.f32.gmra.mxu0 %v10435_v60  ;;  %6170 = vmatprep.mubr.msk.f32.mxu1 %vm6613_vm9, %v6612_v11  ;;  %v10448_v34 = vand.u32 4294901760, %v10447_v42  ;;  %v10449_v60 = vld [vmem:[#allocation94_spill] sm:$0xff] }
 0x25e   :  { %10445 = vst [vmem:[#allocation79_spill] sm:$0xff] %v8571_v2  ;;  %v2430_v10 = vadd.f32 %v2429_v46, %v10446_v35  ;;  %v6025_v47 = vpop.f32.mrf.mxu1  ;;  %5969 = vmatprep.mubr.msk.f32.mxu0 %vm6613_vm9, %v6612_v11 }
 0x25f   :  { %v5824_v53 = vpop.f32.mrf.mxu0 }
 0x260   :  { %v2968_v44 = vpop.f32.mrf.mxu1  ;;  %6171 = vmatmul.mubr.f32.gmra.mxu1 %v10448_v34  ;;  %v8581_v56 = vadd.f32 %v2944_v31, %v2430_v10  ;;  %v10450_v53 = vld [vmem:[#allocation92_spill] sm:$0xff] }
 0x261   :  { %v2436_v38 = vpop.f32.mrf.mxu0  ;;  %5970 = vmatmul.mubr.f32.gmra.mxu0 %v10439_v49  ;;  %6173 = vmatprep.mubr.msk.f32.mxu1 %vm6613_vm9, %v6612_v11  ;;  %v10451_v2 = vand.u32 4294901760, %v10450_v53  ;;  %v10452_v49 = vld [vmem:[#allocation96_spill] sm:$0xff] }
 0x262   :  { %v2437_v15 = vadd.f32 %v2436_v38, %v10449_v60  ;;  %v6028_v46 = vpop.f32.mrf.mxu1  ;;  %5972 = vmatprep.mubr.msk.f32.mxu0 %vm6613_vm9, %v6612_v11 }
 0x263   :  { %v5827_v35 = vpop.f32.mrf.mxu0 }
 0x264   :  { %v2976_v47 = vpop.f32.mrf.mxu1  ;;  %6174 = vmatmul.mubr.f32.gmra.mxu1 %v10451_v2  ;;  %v8591_v34 = vadd.f32 %v2952_v40, %v2437_v15  ;;  %v10453_v35 = vand.u32 4294901760, %v7956_v54 }
 0x265   :  { %v2443_v31 = vpop.f32.mrf.mxu0  ;;  %5973 = vmatmul.mubr.f32.gmra.mxu0 %v10443_v52  ;;  %6176 = vmatprep.mubr.msk.f32.mxu1 %vm6613_vm9, %v6612_v11  ;;  %v10454_v52 = vld [vmem:[#allocation98_spill] sm:$0xff] }
 0x266   :  { %v2444_v10 = vadd.f32 %v2443_v31, %v10452_v49  ;;  %v6031_v38 = vpop.f32.mrf.mxu1  ;;  %5975 = vmatprep.mubr.msk.f32.mxu0 %vm6613_vm9, %v6612_v11 }
 0x267   :  { %v5830_v60 = vpop.f32.mrf.mxu0 }
 0x268   :  { %v2984_v46 = vpop.f32.mrf.mxu1  ;;  %6177 = vmatmul.mubr.f32.gmra.mxu1 %v10453_v35  ;;  %v8601_v2 = vadd.f32 %v2960_v61, %v2444_v10  ;;  %v10455_v60 = vand.u32 4294901760, %v7976_v7 }
 0x269   :  { %v2450_v40 = vpop.f32.mrf.mxu0  ;;  %5976 = vmatmul.mubr.f32.gmra.mxu0 %v10447_v42  ;;  %6179 = vmatprep.mubr.msk.f32.mxu1 %vm6613_vm9, %v6612_v11 }
 0x26a   :  { %v2451_v15 = vadd.f32 %v2450_v40, %v10454_v52  ;;  %v6034_v31 = vpop.f32.mrf.mxu1  ;;  %5978 = vmatprep.mubr.msk.f32.mxu0 %vm6613_vm9, %v6612_v11 }
 0x26b   :  { %v5833_v49 = vpop.f32.mrf.mxu0  ;;  %v10456_v31 = vand.u32 4294901760, %v7996_v36 }
 0x26c   :  { %v2992_v38 = vpop.f32.mrf.mxu1  ;;  %6180 = vmatmul.mubr.f32.gmra.mxu1 %v10455_v60  ;;  %v8611_v35 = vadd.f32 %v2968_v44, %v2451_v15 }
 0x26d   :  { %v2457_v61 = vpop.f32.mrf.mxu0  ;;  %5979 = vmatmul.mubr.f32.gmra.mxu0 %v10450_v53  ;;  %6182 = vmatprep.mubr.msk.f32.mxu1 %vm6613_vm9, %v6612_v11 }
 0x26e   :  { %v2458_v42 = vadd.f32 %v2457_v61, %v8011_v21  ;;  %v6037_v10 = vpop.f32.mrf.mxu1  ;;  %5981 = vmatprep.mubr.msk.f32.mxu0 %vm6613_vm9, %v6612_v11  ;;  %v10457_v61 = vand.u32 4294901760, %v8015_v33 }
 0x26f   :  { %v5836_v40 = vpop.f32.mrf.mxu0 }
 0x270   :  { %v3000_v52 = vpop.f32.mrf.mxu1  ;;  %6183 = vmatmul.mubr.f32.gmra.mxu1 %v10456_v31  ;;  %v8621_v49 = vadd.f32 %v2976_v47, %v2458_v42  ;;  %v10458_v31 = vand.u32 4294901760, %v8031_v26 }
 0x271   :  { %v2464_v44 = vpop.f32.mrf.mxu0  ;;  %5982 = vmatmul.mubr.f32.gmra.mxu0 %v7956_v54  ;;  %6185 = vmatprep.mubr.msk.f32.mxu1 %vm6613_vm9, %v6612_v11 }
 0x272   :  { %v2465_v53 = vadd.f32 %v2464_v44, %v8027_v3  ;;  %v6040_v21 = vpop.f32.mrf.mxu1  ;;  %5984 = vmatprep.mubr.msk.f32.mxu0 %vm6613_vm9, %v6612_v11 }
 0x273   :  { %v5839_v15 = vpop.f32.mrf.mxu0 }
 0x274   :  { %v3008_v60 = vpop.f32.mrf.mxu1  ;;  %6186 = vmatmul.mubr.f32.gmra.mxu1 %v10457_v61  ;;  %v8631_v10 = vadd.f32 %v2984_v46, %v2465_v53  ;;  %v10459_v15 = vld [vmem:[#allocation6_spill] sm:$0xff] }
 0x275   :  { %v2471_v47 = vpop.f32.mrf.mxu0  ;;  %5985 = vmatmul.mubr.f32.gmra.mxu0 %v7976_v7  ;;  %6188 = vmatprep.mubr.msk.f32.mxu1 %vm6613_vm9, %v6612_v11 }
 0x276   :  { %v2472_v54 = vadd.f32 %v2471_v47, %v8041_v25  ;;  %v6043_v3 = vpop.f32.mrf.mxu1  ;;  %5987 = vmatprep.mubr.msk.f32.mxu0 %vm6613_vm9, %v6612_v11 }
 0x277   :  { %v5842_v42 = vpop.f32.mrf.mxu0  ;;  %v10460_v3 = vld [vmem:[#allocation8_spill] sm:$0xff] }
 0x278   :  { %v3016_v40 = vpop.f32.mrf.mxu1  ;;  %6189 = vmatmul.mubr.f32.gmra.mxu1 %v10458_v31  ;;  %v8641_v44 = vadd.f32 %v2992_v38, %v2472_v54 }
 0x279   :  { %v2478_v46 = vpop.f32.mrf.mxu0  ;;  %5988 = vmatmul.mubr.f32.gmra.mxu0 %v7996_v36  ;;  %6392 = vmatprep.mubr.msk.f32.mxu1 %vm6613_vm9, %v6612_v11 }
 0x27a   :  { %v2479_v7 = vadd.f32 %v2478_v46, %v8053_v30  ;;  %v6046_v25 = vpop.f32.mrf.mxu1  ;;  %5990 = vmatprep.mubr.msk.f32.mxu0 %vm6613_vm9, %v6612_v11 }
 0x27b   :  { %v5845_v53 = vpop.f32.mrf.mxu0 }
 0x27c   :  { %v3024_v21 = vpop.f32.mrf.mxu1  ;;  %6393 = vmatmul.mubr.msk.f32.vlgmr.msra.gmra.mxu1 %vm970_vm3, %v10459_v15  ;;  %v8651_v61 = vadd.f32 %v3000_v52, %v2479_v7  ;;  %v10461_v7 = vld [vmem:[#allocation5_spill] sm:$0xff] }
 0x27d   :  { %v2485_v38 = vpop.f32.mrf.mxu0  ;;  %5991 = vmatmul.mubr.f32.gmra.mxu0 %v8015_v33  ;;  %6395 = vmatprep.mubr.msk.f32.mxu1 %vm6613_vm9, %v6612_v11 }
 0x27e   :  { %v2486_v36 = vadd.f32 %v2485_v38, %v8064_v12  ;;  %v6049_v30 = vpop.f32.mrf.mxu1  ;;  %5993 = vmatprep.mubr.msk.f32.mxu0 %vm6613_vm9, %v6612_v11 }
 0x27f   :  { %v5848_v47 = vpop.f32.mrf.mxu0 }
 0x280   :  { %v3032_v54 = vpop.f32.mrf.mxu1  ;;  %6396 = vmatmul.mubr.msk.f32.gmra.mxu1 %vm970_vm3, %v10460_v3  ;;  %v8661_v42 = vadd.f32 %v3008_v60, %v2486_v36  ;;  %v10462_v36 = vld [vmem:[#allocation7_spill] sm:$0xff] }
 0x281   :  { %v2492_v52 = vpop.f32.mrf.mxu0  ;;  %5994 = vmatmul.mubr.f32.gmra.mxu0 %v8031_v26  ;;  %6398 = vmatprep.mubr.msk.f32.mxu1 %vm6613_vm9, %v6612_v11 }
 0x282   :  { %v2493_v33 = vadd.f32 %v2492_v52, %v8074_v43  ;;  %v6052_v12 = vpop.f32.mrf.mxu1  ;;  %6197 = vmatprep.mubr.msk.f32.mxu0 %vm6613_vm9, %v6612_v11 }
 0x283   :  { %v5851_v31 = vpop.f32.mrf.mxu0 }
 0x284   :  { %v3040_v46 = vpop.f32.mrf.mxu1  ;;  %6399 = vmatmul.mubr.msk.f32.gmra.mxu1 %vm970_vm3, %v10461_v7  ;;  %v8671_v25 = vadd.f32 %v3016_v40, %v2493_v33  ;;  %v10463_v33 = vld [vmem:[#allocation9_spill] sm:$0xff] }
 0x285   :  { %v2499_v60 = vpop.f32.mrf.mxu0  ;;  %6198 = vmatmul.mubr.msk.f32.vlgmr.msra.gmra.mxu0 %vm970_vm3, %v10459_v15  ;;  %6401 = vmatprep.mubr.msk.f32.mxu1 %vm6613_vm9, %v6612_v11 }
 0x286   :  { %v2500_v26 = vadd.f32 %v2499_v60, %v8085_v0  ;;  %v6055_v43 = vpop.f32.mrf.mxu1  ;;  %6200 = vmatprep.mubr.msk.f32.mxu0 %vm6613_vm9, %v6612_v11 }
 0x287   :  { %v5854_v53 = vpop.f32.mrf.mxu0 }
 0x288   :  { %v3048_v38 = vpop.f32.mrf.mxu1  ;;  %6402 = vmatmul.mubr.msk.f32.gmra.mxu1 %vm970_vm3, %v10462_v36  ;;  %v8682_v40 = vadd.f32 %v3024_v21, %v2500_v26  ;;  %v10464_v26 = vld [vmem:[#allocation10_spill] sm:$0xff] }
 0x289   :  { %v2506_v30 = vpop.f32.mrf.mxu0  ;;  %6201 = vmatmul.mubr.msk.f32.gmra.mxu0 %vm970_vm3, %v10460_v3  ;;  %6404 = vmatprep.mubr.msk.f32.mxu1 %vm6613_vm9, %v6612_v11 }
 0x28a   :  { %v2507_v0 = vadd.f32 %v2506_v30, %v8100_v51  ;;  %v6058_v15 = vpop.f32.mrf.mxu1  ;;  %6203 = vmatprep.mubr.msk.f32.mxu0 %vm6613_vm9, %v6612_v11 }
 0x28b   :  { %v5857_v47 = vpop.f32.mrf.mxu0 }
 0x28c   :  { %v3056_v52 = vpop.f32.mrf.mxu1  ;;  %6405 = vmatmul.mubr.msk.f32.gmra.mxu1 %vm970_vm3, %v10463_v33  ;;  %v8693_v21 = vadd.f32 %v3032_v54, %v2507_v0  ;;  %v10465_v0 = vld [vmem:[#allocation11_spill] sm:$0xff] }
 0x28d   :  { %v2513_v12 = vpop.f32.mrf.mxu0  ;;  %6204 = vmatmul.mubr.msk.f32.gmra.mxu0 %vm970_vm3, %v10461_v7  ;;  %6407 = vmatprep.mubr.msk.f32.mxu1 %vm6613_vm9, %v6612_v11 }
 0x28e   :  { %v2514_v51 = vadd.f32 %v2513_v12, %v8112_v19  ;;  %v6061_v3 = vpop.f32.mrf.mxu1  ;;  %6206 = vmatprep.mubr.msk.f32.mxu0 %vm6613_vm9, %v6612_v11 }
 0x28f   :  { %v5860_v31 = vpop.f32.mrf.mxu0 }
 0x290   :  { %v3064_v60 = vpop.f32.mrf.mxu1  ;;  %6408 = vmatmul.mubr.msk.f32.gmra.mxu1 %vm970_vm3, %v10464_v26  ;;  %v8704_v54 = vadd.f32 %v3040_v46, %v2514_v51  ;;  %v10466_v51 = vld [vmem:[#allocation12_spill] sm:$0xff] }
 0x291   :  { %v2520_v43 = vpop.f32.mrf.mxu0  ;;  %6207 = vmatmul.mubr.msk.f32.gmra.mxu0 %vm970_vm3, %v10462_v36  ;;  %6410 = vmatprep.mubr.msk.f32.mxu1 %vm6613_vm9, %v6612_v11 }
 0x292   :  { %v2521_v19 = vadd.f32 %v2520_v43, %v8121_v41  ;;  %v6064_v7 = vpop.f32.mrf.mxu1  ;;  %6209 = vmatprep.mubr.msk.f32.mxu0 %vm6613_vm9, %v6612_v11 }
 0x293   :  { %v5863_v53 = vpop.f32.mrf.mxu0 }
 0x294   :  { %v3072_v30 = vpop.f32.mrf.mxu1  ;;  %6411 = vmatmul.mubr.msk.f32.gmra.mxu1 %vm970_vm3, %v10465_v0  ;;  %v8715_v46 = vadd.f32 %v3048_v38, %v2521_v19  ;;  %v10467_v19 = vld [vmem:[#allocation13_spill] sm:$0xff] }
 0x295   :  { %v2527_v15 = vpop.f32.mrf.mxu0  ;;  %6210 = vmatmul.mubr.msk.f32.gmra.mxu0 %vm970_vm3, %v10463_v33  ;;  %6413 = vmatprep.mubr.msk.f32.mxu1 %vm6613_vm9, %v6612_v11 }
 0x296   :  { %v2528_v41 = vadd.f32 %v2527_v15, %v8130_v57  ;;  %v6067_v36 = vpop.f32.mrf.mxu1  ;;  %6212 = vmatprep.mubr.msk.f32.mxu0 %vm6613_vm9, %v6612_v11 }
 0x297   :  { %v5866_v47 = vpop.f32.mrf.mxu0 }
 0x298   :  { %v3080_v12 = vpop.f32.mrf.mxu1  ;;  %6414 = vmatmul.mubr.msk.f32.gmra.mxu1 %vm970_vm3, %v10466_v51  ;;  %v8726_v38 = vadd.f32 %v3056_v52, %v2528_v41  ;;  %v10468_v41 = vld [vmem:[#allocation14_spill] sm:$0xff] }
 0x299   :  { %v2534_v3 = vpop.f32.mrf.mxu0  ;;  %6213 = vmatmul.mubr.msk.f32.gmra.mxu0 %vm970_vm3, %v10464_v26  ;;  %6416 = vmatprep.mubr.msk.f32.mxu1 %vm6613_vm9, %v6612_v11 }
 0x29a   :  { %v2535_v57 = vadd.f32 %v2534_v3, %v8139_v5  ;;  %v6070_v33 = vpop.f32.mrf.mxu1  ;;  %6215 = vmatprep.mubr.msk.f32.mxu0 %vm6613_vm9, %v6612_v11 }
 0x29b   :  { %v5869_v31 = vpop.f32.mrf.mxu0 }
 0x29c   :  { %v3088_v43 = vpop.f32.mrf.mxu1  ;;  %6417 = vmatmul.mubr.msk.f32.gmra.mxu1 %vm970_vm3, %v10467_v19  ;;  %v8737_v52 = vadd.f32 %v3064_v60, %v2535_v57  ;;  %v10469_v57 = vld [vmem:[#allocation15_spill] sm:$0xff] }
 0x29d   :  { %v2541_v7 = vpop.f32.mrf.mxu0  ;;  %6216 = vmatmul.mubr.msk.f32.gmra.mxu0 %vm970_vm3, %v10465_v0  ;;  %6419 = vmatprep.mubr.msk.f32.mxu1 %vm6613_vm9, %v6612_v11 }
 0x29e   :  { %v2542_v5 = vadd.f32 %v2541_v7, %v8148_v13  ;;  %v6073_v26 = vpop.f32.mrf.mxu1  ;;  %6218 = vmatprep.mubr.msk.f32.mxu0 %vm6613_vm9, %v6612_v11 }
 0x29f   :  { %v5872_v53 = vpop.f32.mrf.mxu0 }
 0x2a0   :  { %v3096_v15 = vpop.f32.mrf.mxu1  ;;  %6420 = vmatmul.mubr.msk.f32.gmra.mxu1 %vm970_vm3, %v10468_v41  ;;  %v8748_v60 = vadd.f32 %v3072_v30, %v2542_v5  ;;  %v10470_v5 = vld [vmem:[#allocation16_spill] sm:$0xff] }
 0x2a1   :  { %v2548_v36 = vpop.f32.mrf.mxu0  ;;  %6219 = vmatmul.mubr.msk.f32.gmra.mxu0 %vm970_vm3, %v10466_v51  ;;  %6422 = vmatprep.mubr.msk.f32.mxu1 %vm6613_vm9, %v6612_v11 }
 0x2a2   :  { %v2549_v13 = vadd.f32 %v2548_v36, %v8157_v20  ;;  %v6076_v0 = vpop.f32.mrf.mxu1  ;;  %6221 = vmatprep.mubr.msk.f32.mxu0 %vm6613_vm9, %v6612_v11 }
 0x2a3   :  { %v5875_v47 = vpop.f32.mrf.mxu0 }
 0x2a4   :  { %v3104_v3 = vpop.f32.mrf.mxu1  ;;  %6423 = vmatmul.mubr.msk.f32.gmra.mxu1 %vm970_vm3, %v10469_v57  ;;  %v8759_v30 = vadd.f32 %v3080_v12, %v2549_v13  ;;  %v10471_v13 = vld [vmem:[#allocation17_spill] sm:$0xff] }
 0x2a5   :  { %v2555_v33 = vpop.f32.mrf.mxu0  ;;  %6222 = vmatmul.mubr.msk.f32.gmra.mxu0 %vm970_vm3, %v10467_v19  ;;  %6425 = vmatprep.mubr.msk.f32.mxu1 %vm6613_vm9, %v6612_v11 }
 0x2a6   :  { %v2556_v20 = vadd.f32 %v2555_v33, %v8166_v27  ;;  %v6079_v51 = vpop.f32.mrf.mxu1  ;;  %6224 = vmatprep.mubr.msk.f32.mxu0 %vm6613_vm9, %v6612_v11 }
 0x2a7   :  { %v5878_v31 = vpop.f32.mrf.mxu0 }
 0x2a8   :  { %v3112_v7 = vpop.f32.mrf.mxu1  ;;  %6426 = vmatmul.mubr.msk.f32.gmra.mxu1 %vm970_vm3, %v10470_v5  ;;  %v8770_v12 = vadd.f32 %v3088_v43, %v2556_v20  ;;  %v10472_v20 = vld [vmem:[#allocation18_spill] sm:$0xff] }
 0x2a9   :  { %v2562_v26 = vpop.f32.mrf.mxu0  ;;  %6225 = vmatmul.mubr.msk.f32.gmra.mxu0 %vm970_vm3, %v10468_v41  ;;  %6428 = vmatprep.mubr.msk.f32.mxu1 %vm6613_vm9, %v6612_v11 }
 0x2aa   :  { %v2563_v27 = vadd.f32 %v2562_v26, %v8175_v37  ;;  %v6082_v19 = vpop.f32.mrf.mxu1  ;;  %6227 = vmatprep.mubr.msk.f32.mxu0 %vm6613_vm9, %v6612_v11 }
 0x2ab   :  { %v5881_v53 = vpop.f32.mrf.mxu0 }
 0x2ac   :  { %v3120_v36 = vpop.f32.mrf.mxu1  ;;  %6429 = vmatmul.mubr.msk.f32.gmra.mxu1 %vm970_vm3, %v10471_v13  ;;  %v8781_v43 = vadd.f32 %v3096_v15, %v2563_v27  ;;  %v10473_v27 = vld [vmem:[#allocation19_spill] sm:$0xff] }
 0x2ad   :  { %v2569_v0 = vpop.f32.mrf.mxu0  ;;  %6228 = vmatmul.mubr.msk.f32.gmra.mxu0 %vm970_vm3, %v10469_v57  ;;  %6431 = vmatprep.mubr.msk.f32.mxu1 %vm6613_vm9, %v6612_v11 }
 0x2ae   :  { %v2570_v37 = vadd.f32 %v2569_v0, %v8184_v55  ;;  %v6085_v41 = vpop.f32.mrf.mxu1  ;;  %6230 = vmatprep.mubr.msk.f32.mxu0 %vm6613_vm9, %v6612_v11 }
 0x2af   :  { %v5884_v47 = vpop.f32.mrf.mxu0 }
 0x2b0   :  { %v3128_v33 = vpop.f32.mrf.mxu1  ;;  %6432 = vmatmul.mubr.msk.f32.gmra.mxu1 %vm970_vm3, %v10472_v20  ;;  %v8792_v15 = vadd.f32 %v3104_v3, %v2570_v37  ;;  %v10474_v37 = vld [vmem:[#allocation20_spill] sm:$0xff] }
 0x2b1   :  { %v2576_v51 = vpop.f32.mrf.mxu0  ;;  %6231 = vmatmul.mubr.msk.f32.gmra.mxu0 %vm970_vm3, %v10470_v5  ;;  %6434 = vmatprep.mubr.msk.f32.mxu1 %vm6613_vm9, %v6612_v11 }
 0x2b2   :  { %v2577_v55 = vadd.f32 %v2576_v51, %v8193_v8  ;;  %v6088_v57 = vpop.f32.mrf.mxu1  ;;  %6233 = vmatprep.mubr.msk.f32.mxu0 %vm6613_vm9, %v6612_v11 }
 0x2b3   :  { %v5887_v31 = vpop.f32.mrf.mxu0 }
 0x2b4   :  { %v3136_v26 = vpop.f32.mrf.mxu1  ;;  %6435 = vmatmul.mubr.msk.f32.gmra.mxu1 %vm970_vm3, %v10473_v27  ;;  %v8803_v3 = vadd.f32 %v3112_v7, %v2577_v55  ;;  %v10475_v55 = vld [vmem:[#allocation21_spill] sm:$0xff] }
 0x2b5   :  { %v2583_v19 = vpop.f32.mrf.mxu0  ;;  %6234 = vmatmul.mubr.msk.f32.gmra.mxu0 %vm970_vm3, %v10471_v13  ;;  %6437 = vmatprep.mubr.msk.f32.mxu1 %vm6613_vm9, %v6612_v11 }
 0x2b6   :  { %v2584_v8 = vadd.f32 %v2583_v19, %v8202_v22  ;;  %v6091_v5 = vpop.f32.mrf.mxu1  ;;  %6236 = vmatprep.mubr.msk.f32.mxu0 %vm6613_vm9, %v6612_v11 }
 0x2b7   :  { %v5890_v53 = vpop.f32.mrf.mxu0 }
 0x2b8   :  { %v3144_v0 = vpop.f32.mrf.mxu1  ;;  %6438 = vmatmul.mubr.msk.f32.gmra.mxu1 %vm970_vm3, %v10474_v37  ;;  %v8814_v7 = vadd.f32 %v3120_v36, %v2584_v8  ;;  %v10476_v8 = vld [vmem:[#allocation22_spill] sm:$0xff] }
 0x2b9   :  { %v2590_v41 = vpop.f32.mrf.mxu0  ;;  %6237 = vmatmul.mubr.msk.f32.gmra.mxu0 %vm970_vm3, %v10472_v20  ;;  %6440 = vmatprep.mubr.msk.f32.mxu1 %vm6613_vm9, %v6612_v11 }
 0x2ba   :  { %v2591_v22 = vadd.f32 %v2590_v41, %v8211_v39  ;;  %v6094_v13 = vpop.f32.mrf.mxu1  ;;  %6239 = vmatprep.mubr.msk.f32.mxu0 %vm6613_vm9, %v6612_v11 }
 0x2bb   :  { %v5893_v47 = vpop.f32.mrf.mxu0 }
 0x2bc   :  { %v3152_v51 = vpop.f32.mrf.mxu1  ;;  %6441 = vmatmul.mubr.msk.f32.gmra.mxu1 %vm970_vm3, %v10475_v55  ;;  %v8825_v36 = vadd.f32 %v3128_v33, %v2591_v22  ;;  %v10477_v22 = vld [vmem:[#allocation23_spill] sm:$0xff] }
 0x2bd   :  { %v2597_v57 = vpop.f32.mrf.mxu0  ;;  %6240 = vmatmul.mubr.msk.f32.gmra.mxu0 %vm970_vm3, %v10473_v27  ;;  %6443 = vmatprep.mubr.msk.f32.mxu1 %vm6613_vm9, %v6612_v11 }
 0x2be   :  { %v2598_v39 = vadd.f32 %v2597_v57, %v8220_v6  ;;  %v6097_v20 = vpop.f32.mrf.mxu1  ;;  %6242 = vmatprep.mubr.msk.f32.mxu0 %vm6613_vm9, %v6612_v11 }
 0x2bf   :  { %v5896_v31 = vpop.f32.mrf.mxu0 }
 0x2c0   :  { %v3160_v19 = vpop.f32.mrf.mxu1  ;;  %6444 = vmatmul.mubr.msk.f32.gmra.mxu1 %vm970_vm3, %v10476_v8  ;;  %v8836_v33 = vadd.f32 %v3136_v26, %v2598_v39  ;;  %v10478_v39 = vld [vmem:[#allocation24_spill] sm:$0xff] }
 0x2c1   :  { %v2604_v5 = vpop.f32.mrf.mxu0  ;;  %6243 = vmatmul.mubr.msk.f32.gmra.mxu0 %vm970_vm3, %v10474_v37  ;;  %6446 = vmatprep.mubr.msk.f32.mxu1 %vm6613_vm9, %v6612_v11 }
 0x2c2   :  { %v2605_v6 = vadd.f32 %v2604_v5, %v8229_v28  ;;  %v6100_v27 = vpop.f32.mrf.mxu1  ;;  %6245 = vmatprep.mubr.msk.f32.mxu0 %vm6613_vm9, %v6612_v11 }
 0x2c3   :  { %v5899_v53 = vpop.f32.mrf.mxu0 }
 0x2c4   :  { %v3168_v41 = vpop.f32.mrf.mxu1  ;;  %6447 = vmatmul.mubr.msk.f32.gmra.mxu1 %vm970_vm3, %v10477_v22  ;;  %v8847_v26 = vadd.f32 %v3144_v0, %v2605_v6  ;;  %v10479_v6 = vld [vmem:[#allocation25_spill] sm:$0xff] }
 0x2c5   :  { %v2611_v13 = vpop.f32.mrf.mxu0  ;;  %6246 = vmatmul.mubr.msk.f32.gmra.mxu0 %vm970_vm3, %v10475_v55  ;;  %6449 = vmatprep.mubr.msk.f32.mxu1 %vm6613_vm9, %v6612_v11 }
 0x2c6   :  { %v2612_v28 = vadd.f32 %v2611_v13, %v8238_v14  ;;  %v6103_v37 = vpop.f32.mrf.mxu1  ;;  %6248 = vmatprep.mubr.msk.f32.mxu0 %vm6613_vm9, %v6612_v11 }
 0x2c7   :  { %v5902_v47 = vpop.f32.mrf.mxu0 }
 0x2c8   :  { %v3176_v57 = vpop.f32.mrf.mxu1  ;;  %6450 = vmatmul.mubr.msk.f32.gmra.mxu1 %vm970_vm3, %v10478_v39  ;;  %v8858_v0 = vadd.f32 %v3152_v51, %v2612_v28  ;;  %v10480_v28 = vld [vmem:[#allocation26_spill] sm:$0xff] }
 0x2c9   :  { %v2618_v20 = vpop.f32.mrf.mxu0  ;;  %6249 = vmatmul.mubr.msk.f32.gmra.mxu0 %vm970_vm3, %v10476_v8  ;;  %6452 = vmatprep.mubr.msk.f32.mxu1 %vm6613_vm9, %v6612_v11 }
 0x2ca   :  { %v2619_v14 = vadd.f32 %v2618_v20, %v8247_v45  ;;  %v6106_v55 = vpop.f32.mrf.mxu1  ;;  %6251 = vmatprep.mubr.msk.f32.mxu0 %vm6613_vm9, %v6612_v11 }
 0x2cb   :  { %v5905_v31 = vpop.f32.mrf.mxu0 }
 0x2cc   :  { %v3184_v5 = vpop.f32.mrf.mxu1  ;;  %6453 = vmatmul.mubr.msk.f32.gmra.mxu1 %vm970_vm3, %v10479_v6  ;;  %v8869_v51 = vadd.f32 %v3160_v19, %v2619_v14  ;;  %v10481_v14 = vld [vmem:[#allocation27_spill] sm:$0xff] }
 0x2cd   :  { %v2625_v27 = vpop.f32.mrf.mxu0  ;;  %6252 = vmatmul.mubr.msk.f32.gmra.mxu0 %vm970_vm3, %v10477_v22  ;;  %6455 = vmatprep.mubr.msk.f32.mxu1 %vm6613_vm9, %v6612_v11 }
 0x2ce   :  { %v2626_v45 = vadd.f32 %v2625_v27, %v8256_v18  ;;  %v6109_v8 = vpop.f32.mrf.mxu1  ;;  %6254 = vmatprep.mubr.msk.f32.mxu0 %vm6613_vm9, %v6612_v11 }
 0x2cf   :  { %v5908_v53 = vpop.f32.mrf.mxu0 }
 0x2d0   :  { %v3192_v13 = vpop.f32.mrf.mxu1  ;;  %6456 = vmatmul.mubr.msk.f32.gmra.mxu1 %vm970_vm3, %v10480_v28  ;;  %v8880_v19 = vadd.f32 %v3168_v41, %v2626_v45  ;;  %v10482_v45 = vld [vmem:[#allocation28_spill] sm:$0xff] }
 0x2d1   :  { %v2632_v37 = vpop.f32.mrf.mxu0  ;;  %6255 = vmatmul.mubr.msk.f32.gmra.mxu0 %vm970_vm3, %v10478_v39  ;;  %6458 = vmatprep.mubr.msk.f32.mxu1 %vm6613_vm9, %v6612_v11 }
 0x2d2   :  { %v2633_v18 = vadd.f32 %v2632_v37, %v8265_v29  ;;  %v6112_v22 = vpop.f32.mrf.mxu1  ;;  %6257 = vmatprep.mubr.msk.f32.mxu0 %vm6613_vm9, %v6612_v11 }
 0x2d3   :  { %v5911_v47 = vpop.f32.mrf.mxu0 }
 0x2d4   :  { %v3200_v20 = vpop.f32.mrf.mxu1  ;;  %6459 = vmatmul.mubr.msk.f32.gmra.mxu1 %vm970_vm3, %v10481_v14  ;;  %v8891_v41 = vadd.f32 %v3176_v57, %v2633_v18  ;;  %v10483_v18 = vld [vmem:[#allocation29_spill] sm:$0xff] }
 0x2d5   :  { %v2639_v55 = vpop.f32.mrf.mxu0  ;;  %6258 = vmatmul.mubr.msk.f32.gmra.mxu0 %vm970_vm3, %v10479_v6  ;;  %6461 = vmatprep.mubr.msk.f32.mxu1 %vm6613_vm9, %v6612_v11 }
 0x2d6   :  { %v2640_v29 = vadd.f32 %v2639_v55, %v8274_v4  ;;  %v6115_v39 = vpop.f32.mrf.mxu1  ;;  %6260 = vmatprep.mubr.msk.f32.mxu0 %vm6613_vm9, %v6612_v11 }
 0x2d7   :  { %v5914_v31 = vpop.f32.mrf.mxu0 }
 0x2d8   :  { %v3208_v27 = vpop.f32.mrf.mxu1  ;;  %6462 = vmatmul.mubr.msk.f32.gmra.mxu1 %vm970_vm3, %v10482_v45  ;;  %v8902_v57 = vadd.f32 %v3184_v5, %v2640_v29  ;;  %v10484_v29 = vld [vmem:[#allocation30_spill] sm:$0xff] }
 0x2d9   :  { %v2646_v8 = vpop.f32.mrf.mxu0  ;;  %6261 = vmatmul.mubr.msk.f32.gmra.mxu0 %vm970_vm3, %v10480_v28  ;;  %6464 = vmatprep.mubr.msk.f32.mxu1 %vm6613_vm9, %v6612_v11 }
 0x2da   :  { %v2647_v4 = vadd.f32 %v2646_v8, %v8283_v32  ;;  %v6118_v6 = vpop.f32.mrf.mxu1  ;;  %6263 = vmatprep.mubr.msk.f32.mxu0 %vm6613_vm9, %v6612_v11 }
 0x2db   :  { %v5917_v53 = vpop.f32.mrf.mxu0 }
 0x2dc   :  { %v3216_v37 = vpop.f32.mrf.mxu1  ;;  %6465 = vmatmul.mubr.msk.f32.gmra.mxu1 %vm970_vm3, %v10483_v18  ;;  %v8913_v5 = vadd.f32 %v3192_v13, %v2647_v4  ;;  %v10485_v4 = vld [vmem:[#allocation31_spill] sm:$0xff] }
 0x2dd   :  { %v2653_v22 = vpop.f32.mrf.mxu0  ;;  %6264 = vmatmul.mubr.msk.f32.gmra.mxu0 %vm970_vm3, %v10481_v14  ;;  %6467 = vmatprep.mubr.msk.f32.mxu1 %vm6613_vm9, %v6612_v11 }
 0x2de   :  { %v2654_v32 = vadd.f32 %v2653_v22, %v8292_v17  ;;  %v6121_v28 = vpop.f32.mrf.mxu1  ;;  %6266 = vmatprep.mubr.msk.f32.mxu0 %vm6613_vm9, %v6612_v11 }
 0x2df   :  { %v5920_v47 = vpop.f32.mrf.mxu0 }
 0x2e0   :  { %v3224_v55 = vpop.f32.mrf.mxu1  ;;  %6468 = vmatmul.mubr.msk.f32.gmra.mxu1 %vm970_vm3, %v10484_v29  ;;  %v8924_v13 = vadd.f32 %v3200_v20, %v2654_v32  ;;  %v10486_v32 = vld [vmem:[#allocation32_spill] sm:$0xff] }
 0x2e1   :  { %v2660_v39 = vpop.f32.mrf.mxu0  ;;  %6267 = vmatmul.mubr.msk.f32.gmra.mxu0 %vm970_vm3, %v10482_v45  ;;  %6470 = vmatprep.mubr.msk.f32.mxu1 %vm6613_vm9, %v6612_v11 }
 0x2e2   :  { %v2661_v17 = vadd.f32 %v2660_v39, %v8301_v59  ;;  %v6124_v14 = vpop.f32.mrf.mxu1  ;;  %6269 = vmatprep.mubr.msk.f32.mxu0 %vm6613_vm9, %v6612_v11 }
 0x2e3   :  { %v5923_v31 = vpop.f32.mrf.mxu0 }
 0x2e4   :  { %v3232_v8 = vpop.f32.mrf.mxu1  ;;  %6471 = vmatmul.mubr.msk.f32.gmra.mxu1 %vm970_vm3, %v10485_v4  ;;  %v8935_v20 = vadd.f32 %v3208_v27, %v2661_v17  ;;  %v10487_v17 = vld [vmem:[#allocation33_spill] sm:$0xff] }
 0x2e5   :  { %v2667_v6 = vpop.f32.mrf.mxu0  ;;  %6270 = vmatmul.mubr.msk.f32.gmra.mxu0 %vm970_vm3, %v10483_v18  ;;  %6473 = vmatprep.mubr.msk.f32.mxu1 %vm6613_vm9, %v6612_v11 }
 0x2e6   :  { %v2668_v59 = vadd.f32 %v2667_v6, %v8310_v58  ;;  %v6127_v45 = vpop.f32.mrf.mxu1  ;;  %6272 = vmatprep.mubr.msk.f32.mxu0 %vm6613_vm9, %v6612_v11 }
 0x2e7   :  { %v5926_v53 = vpop.f32.mrf.mxu0 }
 0x2e8   :  { %v3240_v22 = vpop.f32.mrf.mxu1  ;;  %6474 = vmatmul.mubr.msk.f32.gmra.mxu1 %vm970_vm3, %v10486_v32  ;;  %v8946_v27 = vadd.f32 %v3216_v37, %v2668_v59  ;;  %v10488_v59 = vld [vmem:[#allocation34_spill] sm:$0xff] }
 0x2e9   :  { %v2674_v28 = vpop.f32.mrf.mxu0  ;;  %6273 = vmatmul.mubr.msk.f32.gmra.mxu0 %vm970_vm3, %v10484_v29  ;;  %6476 = vmatprep.mubr.msk.f32.mxu1 %vm6613_vm9, %v6612_v11 }
 0x2ea   :  { %v2675_v58 = vadd.f32 %v2674_v28, %v8319_v63  ;;  %v6130_v18 = vpop.f32.mrf.mxu1  ;;  %6275 = vmatprep.mubr.msk.f32.mxu0 %vm6613_vm9, %v6612_v11 }
 0x2eb   :  { %v5929_v47 = vpop.f32.mrf.mxu0 }
 0x2ec   :  { %v3248_v39 = vpop.f32.mrf.mxu1  ;;  %6477 = vmatmul.mubr.msk.f32.gmra.mxu1 %vm970_vm3, %v10487_v17  ;;  %v8957_v37 = vadd.f32 %v3224_v55, %v2675_v58  ;;  %v10489_v58 = vld [vmem:[#allocation35_spill] sm:$0xff] }
 0x2ed   :  { %v2681_v14 = vpop.f32.mrf.mxu0  ;;  %6276 = vmatmul.mubr.msk.f32.gmra.mxu0 %vm970_vm3, %v10485_v4  ;;  %6479 = vmatprep.mubr.msk.f32.mxu1 %vm6613_vm9, %v6612_v11 }
 0x2ee   :  { %v2682_v63 = vadd.f32 %v2681_v14, %v8328_v23  ;;  %v6133_v29 = vpop.f32.mrf.mxu1  ;;  %6278 = vmatprep.mubr.msk.f32.mxu0 %vm6613_vm9, %v6612_v11 }
 0x2ef   :  { %v5932_v31 = vpop.f32.mrf.mxu0 }
 0x2f0   :  { %v3256_v6 = vpop.f32.mrf.mxu1  ;;  %6480 = vmatmul.mubr.msk.f32.gmra.mxu1 %vm970_vm3, %v10488_v59  ;;  %v8968_v55 = vadd.f32 %v3232_v8, %v2682_v63  ;;  %v10490_v63 = vld [vmem:[#allocation36_spill] sm:$0xff] }
 0x2f1   :  { %v2688_v45 = vpop.f32.mrf.mxu0  ;;  %6279 = vmatmul.mubr.msk.f32.gmra.mxu0 %vm970_vm3, %v10486_v32  ;;  %6482 = vmatprep.mubr.msk.f32.mxu1 %vm6613_vm9, %v6612_v11 }
 0x2f2   :  { %v2689_v23 = vadd.f32 %v2688_v45, %v8337_v50  ;;  %v6136_v4 = vpop.f32.mrf.mxu1  ;;  %6281 = vmatprep.mubr.msk.f32.mxu0 %vm6613_vm9, %v6612_v11 }
 0x2f3   :  { %v5935_v53 = vpop.f32.mrf.mxu0 }
 0x2f4   :  { %v3264_v28 = vpop.f32.mrf.mxu1  ;;  %6483 = vmatmul.mubr.msk.f32.gmra.mxu1 %vm970_vm3, %v10489_v58  ;;  %v8979_v8 = vadd.f32 %v3240_v22, %v2689_v23  ;;  %v10491_v23 = vld [vmem:[#allocation37_spill] sm:$0xff] }
 0x2f5   :  { %v2695_v18 = vpop.f32.mrf.mxu0  ;;  %6282 = vmatmul.mubr.msk.f32.gmra.mxu0 %vm970_vm3, %v10487_v17  ;;  %6485 = vmatprep.mubr.msk.f32.mxu1 %vm6613_vm9, %v6612_v11 }
 0x2f6   :  { %v2696_v50 = vadd.f32 %v2695_v18, %v8346_v62  ;;  %v6139_v32 = vpop.f32.mrf.mxu1  ;;  %6284 = vmatprep.mubr.msk.f32.mxu0 %vm6613_vm9, %v6612_v11 }
 0x2f7   :  { %v5938_v47 = vpop.f32.mrf.mxu0 }
 0x2f8   :  { %v3272_v14 = vpop.f32.mrf.mxu1  ;;  %6486 = vmatmul.mubr.msk.f32.gmra.mxu1 %vm970_vm3, %v10490_v63  ;;  %v8990_v22 = vadd.f32 %v3248_v39, %v2696_v50  ;;  %v10492_v50 = vld [vmem:[#allocation38_spill] sm:$0xff] }
 0x2f9   :  { %v2702_v29 = vpop.f32.mrf.mxu0  ;;  %6285 = vmatmul.mubr.msk.f32.gmra.mxu0 %vm970_vm3, %v10488_v59  ;;  %6488 = vmatprep.mubr.msk.f32.mxu1 %vm6613_vm9, %v6612_v11 }
 0x2fa   :  { %v2703_v62 = vadd.f32 %v2702_v29, %v8355_v16  ;;  %v6142_v17 = vpop.f32.mrf.mxu1  ;;  %6287 = vmatprep.mubr.msk.f32.mxu0 %vm6613_vm9, %v6612_v11 }
 0x2fb   :  { %v5941_v31 = vpop.f32.mrf.mxu0 }
 0x2fc   :  { %v3280_v45 = vpop.f32.mrf.mxu1  ;;  %6489 = vmatmul.mubr.msk.f32.gmra.mxu1 %vm970_vm3, %v10491_v23  ;;  %v9001_v39 = vadd.f32 %v3256_v6, %v2703_v62  ;;  %v10493_v62 = vld [vmem:[#allocation39_spill] sm:$0xff] }
 0x2fd   :  { %v2709_v4 = vpop.f32.mrf.mxu0  ;;  %6288 = vmatmul.mubr.msk.f32.gmra.mxu0 %vm970_vm3, %v10489_v58  ;;  %6491 = vmatprep.mubr.msk.f32.mxu1 %vm6613_vm9, %v6612_v11 }
 0x2fe   :  { %v2710_v16 = vadd.f32 %v2709_v4, %v8364_v48  ;;  %v6145_v59 = vpop.f32.mrf.mxu1  ;;  %6290 = vmatprep.mubr.msk.f32.mxu0 %vm6613_vm9, %v6612_v11 }
 0x2ff   :  { %v5944_v53 = vpop.f32.mrf.mxu0 }
 0x300   :  { %v3288_v18 = vpop.f32.mrf.mxu1  ;;  %6492 = vmatmul.mubr.msk.f32.gmra.mxu1 %vm970_vm3, %v10492_v50  ;;  %v9012_v6 = vadd.f32 %v3264_v28, %v2710_v16  ;;  %v10494_v16 = vld [vmem:[#allocation40_spill] sm:$0xff] }
 0x301   :  { %v2716_v32 = vpop.f32.mrf.mxu0  ;;  %6291 = vmatmul.mubr.msk.f32.gmra.mxu0 %vm970_vm3, %v10490_v63  ;;  %6494 = vmatprep.mubr.msk.f32.mxu1 %vm6613_vm9, %v6612_v11 }
 0x302   :  { %v2717_v48 = vadd.f32 %v2716_v32, %v8373_v24  ;;  %v6148_v58 = vpop.f32.mrf.mxu1  ;;  %6293 = vmatprep.mubr.msk.f32.mxu0 %vm6613_vm9, %v6612_v11 }
 0x303   :  { %v5947_v47 = vpop.f32.mrf.mxu0 }
 0x304   :  { %v3296_v29 = vpop.f32.mrf.mxu1  ;;  %6495 = vmatmul.mubr.msk.f32.gmra.mxu1 %vm970_vm3, %v10493_v62  ;;  %v9023_v28 = vadd.f32 %v3272_v14, %v2717_v48  ;;  %v10496_v48 = vld [vmem:[#allocation41_spill] sm:$0xff] }
 0x305   :  { %v2723_v17 = vpop.f32.mrf.mxu0  ;;  %6294 = vmatmul.mubr.msk.f32.gmra.mxu0 %vm970_vm3, %v10491_v23  ;;  %6497 = vmatprep.mubr.msk.f32.mxu1 %vm6613_vm9, %v6612_v11 }
 0x306   :  { %v2724_v24 = vadd.f32 %v2723_v17, %v8382_v1  ;;  %v6151_v63 = vpop.f32.mrf.mxu1  ;;  %6296 = vmatprep.mubr.msk.f32.mxu0 %vm6613_vm9, %v6612_v11 }
 0x307   :  { %v5950_v31 = vpop.f32.mrf.mxu0  ;;  %v10499_v63 = vld [vmem:[#allocation43_spill] sm:$0xff] }
 0x308   :  { %v3304_v4 = vpop.f32.mrf.mxu1  ;;  %6498 = vmatmul.mubr.msk.f32.gmra.mxu1 %vm970_vm3, %v10494_v16  ;;  %v9034_v14 = vadd.f32 %v3280_v45, %v2724_v24 }
 0x309   :  { %v2730_v59 = vpop.f32.mrf.mxu0  ;;  %6297 = vmatmul.mubr.msk.f32.gmra.mxu0 %vm970_vm3, %v10492_v50  ;;  %6500 = vmatprep.mubr.msk.f32.mxu1 %vm6613_vm9, %v6612_v11  ;;  %v10498_v50 = vld [vmem:[#allocation42_spill] sm:$0xff] }
 0x30a   :  { %10495 = vst [vmem:[#allocation77_spill] sm:$0xff] %v9034_v14  ;;  %v2731_v1 = vadd.f32 %v2730_v59, %v8391_v9  ;;  %v6154_v23 = vpop.f32.mrf.mxu1  ;;  %6299 = vmatprep.mubr.msk.f32.mxu0 %vm6613_vm9, %v6612_v11  ;;  %v10541_v14 = vld [vmem:[#allocation71_spill] sm:$0xff] }
 0x30b   :  { %v5953_v53 = vpop.f32.mrf.mxu0 }
 0x30c   :  { %v3312_v32 = vpop.f32.mrf.mxu1  ;;  %6501 = vmatmul.mubr.msk.f32.gmra.mxu1 %vm970_vm3, %v10496_v48  ;;  %v9045_v45 = vadd.f32 %v3288_v18, %v2731_v1 }
 0x30d   :  { %v2737_v58 = vpop.f32.mrf.mxu0  ;;  %6300 = vmatmul.mubr.msk.f32.gmra.mxu0 %vm970_vm3, %v10493_v62  ;;  %6503 = vmatprep.mubr.msk.f32.mxu1 %vm6613_vm9, %v6612_v11  ;;  %v10501_v62 = vld [vmem:[#allocation44_spill] sm:$0xff] }
 0x30e   :  { %10497 = vst [vmem:[#allocation82_spill] sm:$0xff] %v9045_v45  ;;  %v2738_v9 = vadd.f32 %v2737_v58, %v10498_v50  ;;  %v6157_v47 = vpop.f32.mrf.mxu1  ;;  %6302 = vmatprep.mubr.msk.f32.mxu0 %vm6613_vm9, %v6612_v11  ;;  %v10502_v58 = vld [vmem:[#allocation45_spill] sm:$0xff] }
 0x30f   :  { %v5956_v17 = vpop.f32.mrf.mxu0 }
 0x310   :  { %v3320_v24 = vpop.f32.mrf.mxu1  ;;  %6504 = vmatmul.mubr.msk.f32.gmra.mxu1 %vm970_vm3, %v10499_v63  ;;  %v9056_v18 = vadd.f32 %v3296_v29, %v2738_v9 }
 0x311   :  { %v2744_v31 = vpop.f32.mrf.mxu0  ;;  %6303 = vmatmul.mubr.msk.f32.gmra.mxu0 %vm970_vm3, %v10494_v16  ;;  %6506 = vmatprep.mubr.msk.f32.mxu1 %vm6613_vm9, %v6612_v11  ;;  %v10504_v16 = vld [vmem:[#allocation46_spill] sm:$0xff] }
 0x312   :  { %10500 = vst [vmem:[#allocation80_spill] sm:$0xff] %v9056_v18  ;;  %v2745_v59 = vadd.f32 %v2744_v31, %v10501_v62  ;;  %v6160_v1 = vpop.f32.mrf.mxu1  ;;  %6305 = vmatprep.mubr.msk.f32.mxu0 %vm6613_vm9, %v6612_v11  ;;  %v10505_v62 = vld [vmem:[#allocation47_spill] sm:$0xff] }
 0x313   :  { %v5959_v23 = vpop.f32.mrf.mxu0 }
 0x314   :  { %v3328_v53 = vpop.f32.mrf.mxu1  ;;  %6507 = vmatmul.mubr.msk.f32.gmra.mxu1 %vm970_vm3, %v10502_v58  ;;  %v9067_v29 = vadd.f32 %v3304_v4, %v2745_v59 }
 0x315   :  { %v2751_v50 = vpop.f32.mrf.mxu0  ;;  %6306 = vmatmul.mubr.msk.f32.gmra.mxu0 %vm970_vm3, %v10496_v48  ;;  %6509 = vmatprep.mubr.msk.f32.mxu1 %vm6613_vm9, %v6612_v11  ;;  %v10507_v48 = vld [vmem:[#allocation48_spill] sm:$0xff] }
 0x316   :  { %10503 = vst [vmem:[#allocation85_spill] sm:$0xff] %v9067_v29  ;;  %v2752_v9 = vadd.f32 %v2751_v50, %v10504_v16  ;;  %v6163_v47 = vpop.f32.mrf.mxu1  ;;  %6308 = vmatprep.mubr.msk.f32.mxu0 %vm6613_vm9, %v6612_v11 }
 0x317   :  { %v5962_v17 = vpop.f32.mrf.mxu0  ;;  %v10508_v47 = vld [vmem:[#allocation49_spill] sm:$0xff] }
 0x318   :  { %v3336_v31 = vpop.f32.mrf.mxu1  ;;  %6510 = vmatmul.mubr.msk.f32.gmra.mxu1 %vm970_vm3, %v10505_v62  ;;  %v9078_v4 = vadd.f32 %v3312_v32, %v2752_v9 }
 0x319   :  { %v2758_v59 = vpop.f32.mrf.mxu0  ;;  %6309 = vmatmul.mubr.msk.f32.gmra.mxu0 %vm970_vm3, %v10499_v63  ;;  %6512 = vmatprep.mubr.msk.f32.mxu1 %vm6613_vm9, %v6612_v11  ;;  %v10510_v63 = vld [vmem:[#allocation50_spill] sm:$0xff] }
 0x31a   :  { %10506 = vst [vmem:[#allocation83_spill] sm:$0xff] %v9078_v4  ;;  %v2759_v1 = vadd.f32 %v2758_v59, %v10507_v48  ;;  %v6166_v23 = vpop.f32.mrf.mxu1  ;;  %6311 = vmatprep.mubr.msk.f32.mxu0 %vm6613_vm9, %v6612_v11 }
 0x31b   :  { %v5965_v50 = vpop.f32.mrf.mxu0 }
 0x31c   :  { %v3344_v16 = vpop.f32.mrf.mxu1  ;;  %6513 = vmatmul.mubr.msk.f32.gmra.mxu1 %vm970_vm3, %v10508_v47  ;;  %v9089_v32 = vadd.f32 %v3320_v24, %v2759_v1  ;;  %v10511_v50 = vld [vmem:[#allocation51_spill] sm:$0xff] }
 0x31d   :  { %v2765_v9 = vpop.f32.mrf.mxu0  ;;  %6312 = vmatmul.mubr.msk.f32.gmra.mxu0 %vm970_vm3, %v10502_v58  ;;  %6515 = vmatprep.mubr.msk.f32.mxu1 %vm6613_vm9, %v6612_v11  ;;  %v10513_v58 = vld [vmem:[#allocation52_spill] sm:$0xff] }
 0x31e   :  { %10509 = vst [vmem:[#allocation88_spill] sm:$0xff] %v9089_v32  ;;  %v2766_v17 = vadd.f32 %v2765_v9, %v10510_v63  ;;  %v6169_v59 = vpop.f32.mrf.mxu1  ;;  %6314 = vmatprep.mubr.msk.f32.mxu0 %vm6613_vm9, %v6612_v11  ;;  %v10514_v32 = vld [vmem:[#allocation53_spill] sm:$0xff] }
 0x31f   :  { %v5968_v48 = vpop.f32.mrf.mxu0 }
 0x320   :  { %v3352_v23 = vpop.f32.mrf.mxu1  ;;  %6516 = vmatmul.mubr.msk.f32.gmra.mxu1 %vm970_vm3, %v10511_v50  ;;  %v9100_v24 = vadd.f32 %v3328_v53, %v2766_v17 }
 0x321   :  { %v2772_v1 = vpop.f32.mrf.mxu0  ;;  %6315 = vmatmul.mubr.msk.f32.gmra.mxu0 %vm970_vm3, %v10505_v62  ;;  %6518 = vmatprep.mubr.msk.f32.mxu1 %vm6613_vm9, %v6612_v11  ;;  %v10516_v62 = vld [vmem:[#allocation54_spill] sm:$0xff] }
 0x322   :  { %10512 = vst [vmem:[#allocation86_spill] sm:$0xff] %v9100_v24  ;;  %v2773_v9 = vadd.f32 %v2772_v1, %v10513_v58  ;;  %v6172_v63 = vpop.f32.mrf.mxu1  ;;  %6317 = vmatprep.mubr.msk.f32.mxu0 %vm6613_vm9, %v6612_v11  ;;  %v10517_v24 = vld [vmem:[#allocation55_spill] sm:$0xff] }
 0x323   :  { %v5971_v59 = vpop.f32.mrf.mxu0 }
 0x324   :  { %v3360_v48 = vpop.f32.mrf.mxu1  ;;  %6519 = vmatmul.mubr.msk.f32.gmra.mxu1 %vm970_vm3, %v10514_v32  ;;  %v9111_v53 = vadd.f32 %v3336_v31, %v2773_v9 }
 0x325   :  { %v2779_v17 = vpop.f32.mrf.mxu0  ;;  %6318 = vmatmul.mubr.msk.f32.gmra.mxu0 %vm970_vm3, %v10508_v47  ;;  %6521 = vmatprep.mubr.msk.f32.mxu1 %vm6613_vm9, %v6612_v11  ;;  %v10519_v47 = vld [vmem:[#allocation56_spill] sm:$0xff] }
 0x326   :  { %10515 = vst [vmem:[#allocation91_spill] sm:$0xff] %v9111_v53  ;;  %v2780_v1 = vadd.f32 %v2779_v17, %v10516_v62  ;;  %v6175_v58 = vpop.f32.mrf.mxu1  ;;  %6320 = vmatprep.mubr.msk.f32.mxu0 %vm6613_vm9, %v6612_v11  ;;  %v10520_v53 = vld [vmem:[#allocation57_spill] sm:$0xff] }
 0x327   :  { %v5974_v63 = vpop.f32.mrf.mxu0 }
 0x328   :  { %v3368_v59 = vpop.f32.mrf.mxu1  ;;  %6522 = vmatmul.mubr.msk.f32.gmra.mxu1 %vm970_vm3, %v10517_v24  ;;  %v9122_v31 = vadd.f32 %v3344_v16, %v2780_v1 }
 0x329   :  { %v2786_v9 = vpop.f32.mrf.mxu0  ;;  %6321 = vmatmul.mubr.msk.f32.gmra.mxu0 %vm970_vm3, %v10511_v50  ;;  %6524 = vmatprep.mubr.msk.f32.mxu1 %vm6613_vm9, %v6612_v11  ;;  %v10522_v50 = vld [vmem:[#allocation58_spill] sm:$0xff] }
 0x32a   :  { %10518 = vst [vmem:[#allocation89_spill] sm:$0xff] %v9122_v31  ;;  %v2787_v17 = vadd.f32 %v2786_v9, %v10519_v47  ;;  %v6178_v62 = vpop.f32.mrf.mxu1  ;;  %6323 = vmatprep.mubr.msk.f32.mxu0 %vm6613_vm9, %v6612_v11  ;;  %v10523_v31 = vld [vmem:[#allocation59_spill] sm:$0xff] }
 0x32b   :  { %v5977_v58 = vpop.f32.mrf.mxu0 }
 0x32c   :  { %v3376_v63 = vpop.f32.mrf.mxu1  ;;  %6525 = vmatmul.mubr.msk.f32.gmra.mxu1 %vm970_vm3, %v10520_v53  ;;  %v9133_v16 = vadd.f32 %v3352_v23, %v2787_v17 }
 0x32d   :  { %v2793_v1 = vpop.f32.mrf.mxu0  ;;  %6324 = vmatmul.mubr.msk.f32.gmra.mxu0 %vm970_vm3, %v10514_v32  ;;  %6527 = vmatprep.mubr.msk.f32.mxu1 %vm6613_vm9, %v6612_v11  ;;  %v10525_v32 = vld [vmem:[#allocation60_spill] sm:$0xff] }
 0x32e   :  { %10521 = vst [vmem:[#allocation94_spill] sm:$0xff] %v9133_v16  ;;  %v2794_v9 = vadd.f32 %v2793_v1, %v10522_v50  ;;  %v6181_v47 = vpop.f32.mrf.mxu1  ;;  %6326 = vmatprep.mubr.msk.f32.mxu0 %vm6613_vm9, %v6612_v11  ;;  %v10526_v16 = vld [vmem:[#allocation61_spill] sm:$0xff] }
 0x32f   :  { %v5980_v62 = vpop.f32.mrf.mxu0 }
 0x330   :  { %v3384_v58 = vpop.f32.mrf.mxu1  ;;  %6528 = vmatmul.mubr.msk.f32.gmra.mxu1 %vm970_vm3, %v10523_v31  ;;  %v9144_v23 = vadd.f32 %v3360_v48, %v2794_v9 }
 0x331   :  { %v2800_v17 = vpop.f32.mrf.mxu0  ;;  %6327 = vmatmul.mubr.msk.f32.gmra.mxu0 %vm970_vm3, %v10517_v24  ;;  %6530 = vmatprep.mubr.msk.f32.mxu1 %vm6613_vm9, %v6612_v11  ;;  %v10528_v24 = vld [vmem:[#allocation62_spill] sm:$0xff] }
 0x332   :  { %10524 = vst [vmem:[#allocation92_spill] sm:$0xff] %v9144_v23  ;;  %v2801_v1 = vadd.f32 %v2800_v17, %v10525_v32  ;;  %v6184_v50 = vpop.f32.mrf.mxu1  ;;  %6329 = vmatprep.mubr.msk.f32.mxu0 %vm6613_vm9, %v6612_v11  ;;  %v10529_v23 = vld [vmem:[#allocation63_spill] sm:$0xff] }
 0x333   :  { %v5983_v47 = vpop.f32.mrf.mxu0 }
 0x334   :  { %v3392_v62 = vpop.f32.mrf.mxu1  ;;  %6531 = vmatmul.mubr.msk.f32.gmra.mxu1 %vm970_vm3, %v10526_v16  ;;  %v9155_v48 = vadd.f32 %v3368_v59, %v2801_v1 }
 0x335   :  { %v2807_v9 = vpop.f32.mrf.mxu0  ;;  %6330 = vmatmul.mubr.msk.f32.gmra.mxu0 %vm970_vm3, %v10520_v53  ;;  %6533 = vmatprep.mubr.msk.f32.mxu1 %vm6613_vm9, %v6612_v11  ;;  %v10531_v53 = vld [vmem:[#allocation64_spill] sm:$0xff] }
 0x336   :  { %10527 = vst [vmem:[#allocation96_spill] sm:$0xff] %v9155_v48  ;;  %v2808_v17 = vadd.f32 %v2807_v9, %v10528_v24  ;;  %v6187_v32 = vpop.f32.mrf.mxu1  ;;  %6332 = vmatprep.mubr.msk.f32.mxu0 %vm6613_vm9, %v6612_v11  ;;  %v10532_v48 = vld [vmem:[#allocation65_spill] sm:$0xff] }
 0x337   :  { %v5986_v50 = vpop.f32.mrf.mxu0 }
 0x338   :  { %v3400_v47 = vpop.f32.mrf.mxu1  ;;  %6534 = vmatmul.mubr.msk.f32.gmra.mxu1 %vm970_vm3, %v10529_v23  ;;  %v9166_v59 = vadd.f32 %v3376_v63, %v2808_v17 }
 0x339   :  { %v2814_v1 = vpop.f32.mrf.mxu0  ;;  %6333 = vmatmul.mubr.msk.f32.gmra.mxu0 %vm970_vm3, %v10523_v31  ;;  %6536 = vmatprep.mubr.msk.f32.mxu1 %vm6613_vm9, %v6612_v11  ;;  %v10534_v31 = vld [vmem:[#allocation66_spill] sm:$0xff] }
 0x33a   :  { %10530 = vst [vmem:[#allocation98_spill] sm:$0xff] %v9166_v59  ;;  %v2815_v9 = vadd.f32 %v2814_v1, %v10531_v53  ;;  %v6190_v24 = vpop.f32.mrf.mxu1  ;;  %6335 = vmatprep.mubr.msk.f32.mxu0 %vm6613_vm9, %v6612_v11 }
 0x33b   :  { %v5989_v32 = vpop.f32.mrf.mxu0 }
 0x33c   :  { %v3926_v50 = vpop.f32.mrf.mxu1  ;;  %6537 = vmatmul.mubr.msk.f32.gmra.mxu1 %vm970_vm3, %v10532_v48  ;;  %v9177_v63 = vadd.f32 %v3384_v58, %v2815_v9  ;;  %v20_v32 = vld [vmem:[%s10004_s1] sm:$0xff] }
 0x33d   :  { %v2821_v17 = vpop.f32.mrf.mxu0  ;;  %6336 = vmatmul.mubr.msk.f32.gmra.mxu0 %vm970_vm3, %v10526_v16  ;;  %6539 = vmatprep.mubr.msk.f32.mxu1 %vm6613_vm9, %v6612_v11  ;;  %v83_v58 = vld [vmem:[%s10005_s2] sm:$0xff]  ;;  %v10535_v16 = vld [vmem:[#allocation67_spill] sm:$0xff] }
 0x33e   :  { %10533 = vst [vmem:[#allocation6_spill] sm:$0xff] %v9177_v63  ;;  %v2822_v1 = vadd.f32 %v2821_v17, %v10534_v31  ;;  %v6394_v53 = vpop.f32.mrf.mxu1  ;;  %6338 = vmatprep.mubr.msk.f32.mxu0 %vm6613_vm9, %v6612_v11  ;;  %v10537_v31 = vld [vmem:[#allocation68_spill] sm:$0xff]  ;;  %v146_v59 = vsub.f32 %v20_v32, %v83_v58  ;;  %v10540_v32 = vld [vmem:[#allocation70_spill] sm:$0xff] }
 0x33f   :  { %v5992_v24 = vpop.f32.mrf.mxu0 }
 0x340   :  { %v3932_v9 = vpop.f32.mrf.mxu1  ;;  %6540 = vmatmul.mubr.msk.f32.gmra.mxu1 %vm970_vm3, %v10535_v16  ;;  %v9194_v63 = vadd.f32 %v3392_v62, %v2822_v1  ;;  %v21_v62 = vld [vmem:[%s10004_s1 + $0x8] sm:$0xff] }
 0x341   :  { %v2828_v17 = vpop.f32.mrf.mxu0  ;;  %6339 = vmatmul.mubr.msk.f32.gmra.mxu0 %vm970_vm3, %v10529_v23  ;;  %6542 = vmatprep.mubr.msk.f32.mxu1 %vm6613_vm9, %v6612_v11  ;;  %v84_v1 = vld [vmem:[%s10005_s2 + $0x8] sm:$0xff] }
 0x342   :  { %10536 = vst [vmem:[#allocation8_spill] sm:$0xff] %v9194_v63  ;;  %v2829_v53 = vadd.f32 %v2828_v17, %v10537_v31  ;;  %v6397_v24 = vpop.f32.mrf.mxu1  ;;  %6341 = vmatprep.mubr.msk.f32.mxu0 %vm6613_vm9, %v6612_v11  ;;  %v10538_v63 = vld [vmem:[#allocation69_spill] sm:$0xff]  ;;  %v147_v18 = vsub.f32 %v21_v62, %v84_v1 }
 0x343   :  { %v5995_v4 = vpop.f32.mrf.mxu0 }
 0x344   :  { %v3938_v23 = vpop.f32.mrf.mxu1  ;;  %6543 = vmatmul.mubr.msk.f32.gmra.mxu1 %vm970_vm3, %v10538_v63  ;;  %v9211_v29 = vadd.f32 %v3400_v47, %v2829_v53  ;;  %v209_v4 = vadd.f32 %v146_v59, %v83_v58  ;;  %v22_v47 = vld [vmem:[%s10004_s1 + $0x10] sm:$0xff] }
 0x345   :  { %v3480_v17 = vpop.f32.mrf.mxu0  ;;  %6342 = vmatmul.mubr.msk.f32.gmra.mxu0 %vm970_vm3, %v10532_v48  ;;  %6545 = vmatprep.mubr.msk.f32.mxu1 %vm6613_vm9, %v6612_v11  ;;  %v85_v48 = vld [vmem:[%s10005_s2 + $0x10] sm:$0xff] }
 0x346   :  { %10539 = vst [vmem:[#allocation5_spill] sm:$0xff] %v9211_v29  ;;  %v3481_v31 = vadd.f32 %v3480_v17, %v10540_v32  ;;  %v6400_v24 = vpop.f32.mrf.mxu1  ;;  %6344 = vmatprep.mubr.msk.f32.mxu0 %vm6613_vm9, %v6612_v11  ;;  %v10542_v58 = vld [vmem:[#allocation72_spill] sm:$0xff] }
 0x347   :  { %v6199_v45 = vpop.f32.mrf.mxu0 }
 0x348   :  { %v3927_v53 = vadd.f32 %v3926_v50, %v3481_v31  ;;  %v3944_v29 = vpop.f32.mrf.mxu1  ;;  %6546 = vmatmul.mubr.msk.f32.gmra.mxu1 %vm970_vm3, %v10541_v14  ;;  %v210_v45 = vadd.f32 %v147_v18, %v84_v1  ;;  %v148_v50 = vsub.f32 %v22_v47, %v85_v48  ;;  %v10543_v47 = vld [vmem:[#allocation73_spill] sm:$0xff] }
 0x349   :  { %v3486_v59 = vpop.f32.mrf.mxu0  ;;  %6345 = vmatmul.mubr.msk.f32.gmra.mxu0 %vm970_vm3, %v10535_v16  ;;  %6548 = vmatprep.mubr.msk.f32.mxu1 %vm6613_vm9, %v6612_v11  ;;  %v23_v16 = vld [vmem:[%s10004_s1 + $0x18] sm:$0xff] }
 0x34a   :  { %vm4302_vm12 = vcmp.gt.f32.partialorder %v209_v4, %v3927_v53  ;;  %v3487_v62 = vadd.f32 %v3486_v59, %v10542_v58  ;;  %v6403_v17 = vpop.f32.mrf.mxu1  ;;  %6347 = vmatprep.mubr.msk.f32.mxu0 %vm6613_vm9, %v6612_v11  ;;  %v86_v53 = vld [vmem:[%s10005_s2 + $0x18] sm:$0xff]  ;;  %v211_v59 = vadd.f32 %v148_v50, %v85_v48  ;;  %v10544_v58 = vld [vmem:[#allocation76_spill] sm:$0xff] }
 0x34b   :  { %v4952_v32 = vsel %vm4302_vm12, 1.0, %v6612_v11  ;;  %v4554_v31 = vsel %vm4302_vm12, 0.0, %v209_v4  ;;  %v6202_v24 = vpop.f32.mrf.mxu0 }
 0x34c   :  { %4491 = vst [vmem:[#allocation2] sm:$0xff] %v4952_v32  ;;  %4617 = vst [vmem:[%s10008_s5] sm:$0xff] %v4554_v31  ;;  %v3933_v18 = vadd.f32 %v3932_v9, %v3487_v62  ;;  %v3950_v1 = vpop.f32.mrf.mxu1  ;;  %6549 = vmatmul.mubr.msk.f32.gmra.mxu1 %vm970_vm3, %v10543_v47  ;;  %v149_v9 = vsub.f32 %v23_v16, %v86_v53  ;;  %v10545_v16 = vld [vmem:[#allocation75_spill] sm:$0xff] }
 0x34d   :  { %v3492_v4 = vpop.f32.mrf.mxu0  ;;  %6348 = vmatmul.mubr.msk.f32.gmra.mxu0 %vm970_vm3, %v10538_v63  ;;  %6551 = vmatprep.mubr.msk.f32.mxu1 %vm6613_vm9, %v6612_v11  ;;  %v24_v63 = vld [vmem:[%s10004_s1 + $0x20] sm:$0xff] }
 0x34e   :  { %vm4303_vm13 = vcmp.gt.f32.partialorder %v210_v45, %v3933_v18  ;;  %v3493_v17 = vadd.f32 %v3492_v4, %v10544_v58  ;;  %v6406_v32 = vpop.f32.mrf.mxu1  ;;  %6350 = vmatprep.mubr.msk.f32.mxu0 %vm6613_vm9, %v6612_v11  ;;  %v212_v4 = vadd.f32 %v149_v9, %v86_v53  ;;  %v10546_v58 = vld [vmem:[#allocation74_spill] sm:$0xff] }
 0x34f   :  { %v4953_v62 = vsel %vm4303_vm13, 1.0, %v6612_v11  ;;  %v4555_v31 = vsel %vm4303_vm13, 0.0, %v210_v45  ;;  %v6205_v24 = vpop.f32.mrf.mxu0 }
 0x350   :  { %4492 = vst [vmem:[#allocation2 + $0x8] sm:$0xff] %v4953_v62  ;;  %v3939_v48 = vadd.f32 %v3938_v23, %v3493_v17  ;;  %v3956_v50 = vpop.f32.mrf.mxu1  ;;  %6552 = vmatmul.mubr.msk.f32.gmra.mxu1 %vm970_vm3, %v10545_v16 }
 0x351   :  { %v3498_v45 = vpop.f32.mrf.mxu0  ;;  %6351 = vmatmul.mubr.msk.f32.gmra.mxu0 %vm970_vm3, %v10541_v14  ;;  %6554 = vmatprep.mubr.msk.f32.mxu1 %vm6613_vm9, %v6612_v11  ;;  %v25_v14 = vld [vmem:[%s10004_s1 + $0x28] sm:$0xff] }
 0x352   :  { %vm4304_vm14 = vcmp.gt.f32.partialorder %v211_v59, %v3939_v48  ;;  %v3499_v32 = vadd.f32 %v3498_v45, %v10546_v58  ;;  %v6409_v62 = vpop.f32.mrf.mxu1  ;;  %6353 = vmatprep.mubr.msk.f32.mxu0 %vm6613_vm9, %v6612_v11  ;;  %v10548_v58 = vld [vmem:[#allocation79_spill] sm:$0xff] }
 0x353   :  { %v87_v18 = vld [vmem:[%s10005_s2 + $0x20] sm:$0xff]  ;;  %v4954_v17 = vsel %vm4304_vm14, 1.0, %v6612_v11  ;;  %v6208_v24 = vpop.f32.mrf.mxu0 }
 0x354   :  { %4618 = vst [vmem:[%s10008_s5 + $0x8] sm:$0xff] %v4555_v31  ;;  %v150_v23 = vsub.f32 %v24_v63, %v87_v18  ;;  %v4556_v31 = vsel %vm4304_vm14, 0.0, %v211_v59  ;;  %4493 = vst [vmem:[#allocation2 + $0x10] sm:$0xff] %v4954_v17  ;;  %v3945_v53 = vadd.f32 %v3944_v29, %v3499_v32  ;;  %v3962_v9 = vpop.f32.mrf.mxu1  ;;  %v10547_v63 = vld [vmem:[#allocation78_spill] sm:$0xff] }
 0x355   :  { %6555 = vmatmul.mubr.msk.f32.gmra.mxu1 %vm970_vm3, %v10547_v63  ;;  %v3504_v59 = vpop.f32.mrf.mxu0  ;;  %6354 = vmatmul.mubr.msk.f32.gmra.mxu0 %vm970_vm3, %v10543_v47  ;;  %v26_v47 = vld [vmem:[%s10004_s1 + $0x30] sm:$0xff] }
 0x356   :  { %6557 = vmatprep.mubr.msk.f32.mxu1 %vm6613_vm9, %v6612_v11  ;;  %vm4305_vm15 = vcmp.gt.f32.partialorder %v212_v4, %v3945_v53  ;;  %v213_v45 = vadd.f32 %v150_v23, %v87_v18  ;;  %v3505_v62 = vadd.f32 %v3504_v59, %v10548_v58  ;;  %v6412_v17 = vpop.f32.mrf.mxu1  ;;  %6356 = vmatprep.mubr.msk.f32.mxu0 %vm6613_vm9, %v6612_v11 }
 0x357   :  { %v4955_v32 = vsel %vm4305_vm15, 1.0, %v6612_v11  ;;  %v6211_v24 = vpop.f32.mrf.mxu0 }
 0x358   :  { %4494 = vst [vmem:[#allocation2 + $0x18] sm:$0xff] %v4955_v32  ;;  %v3951_v18 = vadd.f32 %v3950_v1, %v3505_v62  ;;  %v3968_v23 = vpop.f32.mrf.mxu1 }
 0x359   :  { %6357 = vmatmul.mubr.msk.f32.gmra.mxu0 %vm970_vm3, %v10545_v16  ;;  %v27_v16 = vld [vmem:[%s10004_s1 + $0x38] sm:$0xff] }
 0x35a   :  { %vm4306_vm0 = vcmp.gt.f32.partialorder %v213_v45, %v3951_v18  ;;  %v6415_v17 = vpop.f32.mrf.mxu1  ;;  %6359 = vmatprep.mubr.msk.f32.mxu0 %vm6613_vm9, %v6612_v11 }
 0x35b   :  { %v88_v48 = vld [vmem:[%s10005_s2 + $0x28] sm:$0xff]  ;;  %v4956_v62 = vsel %vm4306_vm0, 1.0, %v6612_v11  ;;  %v4558_v32 = vsel %vm4306_vm0, 0.0, %v213_v45 }
 0x35c   :  { %4619 = vst [vmem:[%s10008_s5 + $0x10] sm:$0xff] %v4556_v31  ;;  %v151_v29 = vsub.f32 %v25_v14, %v88_v48  ;;  %v4557_v31 = vsel %vm4305_vm15, 0.0, %v212_v4  ;;  %v10549_v14 = vld [vmem:[#allocation81_spill] sm:$0xff]  ;;  %v3510_v4 = vpop.f32.mrf.mxu0  ;;  %4495 = vst [vmem:[#allocation2 + $0x20] sm:$0xff] %v4956_v62 }
 0x35d   :  { %6558 = vmatmul.mubr.msk.f32.gmra.mxu1 %vm970_vm3, %v10549_v14  ;;  %v3511_v58 = vadd.f32 %v3510_v4, %v8581_v56  ;;  %6360 = vmatmul.mubr.msk.f32.gmra.mxu0 %vm970_vm3, %v10547_v63  ;;  %v28_v63 = vld [vmem:[%s10004_s1 + $0x40] sm:$0xff] }
 0x35e   :  { %6560 = vmatprep.mubr.msk.f32.mxu1 %vm6613_vm9, %v6612_v11  ;;  %v214_v59 = vadd.f32 %v151_v29, %v88_v48  ;;  %v3974_v48 = vpop.f32.mrf.mxu1  ;;  %v10550_v29 = vld [vmem:[#allocation84_spill] sm:$0xff]  ;;  %6362 = vmatprep.mubr.msk.f32.mxu0 %vm6613_vm9, %v6612_v11 }
 0x35f   :  { %v3957_v56 = vadd.f32 %v3956_v50, %v3511_v58 }
 0x360   :  { %v6418_v4 = vpop.f32.mrf.mxu1 }
 0x361   :  { %6561 = vmatmul.mubr.msk.f32.gmra.mxu1 %vm970_vm3, %v10550_v29  ;;  %vm4307_vm1 = vcmp.gt.f32.partialorder %v214_v59, %v3957_v56  ;;  %6363 = vmatmul.mubr.msk.f32.gmra.mxu0 %vm970_vm3, %v10549_v14  ;;  %v29_v14 = vld [vmem:[%s10004_s1 + $0x48] sm:$0xff] }
 0x362   :  { %6563 = vmatprep.mubr.msk.f32.mxu1 %vm6613_vm9, %v6612_v11  ;;  %v4957_v58 = vsel %vm4307_vm1, 1.0, %v6612_v11  ;;  %v4559_v17 = vsel %vm4307_vm1, 0.0, %v214_v59  ;;  %6365 = vmatprep.mubr.msk.f32.mxu0 %vm6613_vm9, %v6612_v11 }
 0x363   :  { %v89_v53 = vld [vmem:[%s10005_s2 + $0x30] sm:$0xff]  ;;  %4496 = vst [vmem:[#allocation2 + $0x28] sm:$0xff] %v4957_v58 }
 0x364   :  { %4620 = vst [vmem:[%s10008_s5 + $0x18] sm:$0xff] %v4557_v31  ;;  %v152_v1 = vsub.f32 %v26_v47, %v89_v53  ;;  %v6214_v31 = vpop.f32.mrf.mxu0 }
 0x365   :  { %6366 = vmatmul.mubr.msk.f32.gmra.mxu0 %vm970_vm3, %v10550_v29  ;;  %v30_v29 = vld [vmem:[%s10004_s1 + $0x50] sm:$0xff] }
 0x366   :  { %v3516_v45 = vpop.f32.mrf.mxu0  ;;  %v215_v47 = vadd.f32 %v152_v1, %v89_v53  ;;  %v3980_v53 = vpop.f32.mrf.mxu1  ;;  %v10551_v1 = vld [vmem:[#allocation87_spill] sm:$0xff]  ;;  %6368 = vmatprep.mubr.msk.f32.mxu0 %vm6613_vm9, %v6612_v11 }
 0x367   :  { %v3517_v18 = vadd.f32 %v3516_v45, %v8591_v34  ;;  %6564 = vmatmul.mubr.msk.f32.gmra.mxu1 %vm970_vm3, %v10551_v1 }
 0x368   :  { %v6217_v62 = vpop.f32.mrf.mxu0  ;;  %6566 = vmatprep.mubr.msk.f32.mxu1 %vm6613_vm9, %v6612_v11  ;;  %v6421_v56 = vpop.f32.mrf.mxu1 }
 0x369   :  { %v3963_v34 = vadd.f32 %v3962_v9, %v3517_v18  ;;  %6369 = vmatmul.mubr.msk.f32.gmra.mxu0 %vm970_vm3, %v10551_v1  ;;  %v31_v1 = vld [vmem:[%s10004_s1 + $0x58] sm:$0xff] }
 0x36a   :  { %v3522_v59 = vpop.f32.mrf.mxu0  ;;  %6371 = vmatprep.mubr.msk.f32.mxu0 %vm6613_vm9, %v6612_v11 }
 0x36b   :  { %v90_v24 = vld [vmem:[%s10005_s2 + $0x38] sm:$0xff]  ;;  %vm4308_vm2 = vcmp.gt.f32.partialorder %v215_v47, %v3963_v34 }
 0x36c   :  { %4621 = vst [vmem:[%s10008_s5 + $0x20] sm:$0xff] %v4558_v32  ;;  %v153_v50 = vsub.f32 %v27_v16, %v90_v24  ;;  %v3523_v16 = vadd.f32 %v3522_v59, %v8601_v2  ;;  %v4958_v45 = vsel %vm4308_vm2, 1.0, %v6612_v11  ;;  %v4560_v18 = vsel %vm4308_vm2, 0.0, %v215_v47  ;;  %v6220_v4 = vpop.f32.mrf.mxu0 }
 0x36d   :  { %4497 = vst [vmem:[#allocation2 + $0x30] sm:$0xff] %v4958_v45 }
 0x36e   :  { %v216_v31 = vadd.f32 %v153_v50, %v90_v24  ;;  %v3969_v2 = vadd.f32 %v3968_v23, %v3523_v16  ;;  %v3986_v24 = vpop.f32.mrf.mxu1  ;;  %v10552_v50 = vld [vmem:[#allocation90_spill] sm:$0xff]  ;;  %v3528_v47 = vpop.f32.mrf.mxu0 }
 0x36f   :  { %6567 = vmatmul.mubr.msk.f32.gmra.mxu1 %vm970_vm3, %v10552_v50  ;;  %v3529_v62 = vadd.f32 %v3528_v47, %v8611_v35  ;;  %6372 = vmatmul.mubr.msk.f32.gmra.mxu0 %vm970_vm3, %v10552_v50  ;;  %v32_v50 = vld [vmem:[%s10004_s1 + $0x60] sm:$0xff] }
 0x370   :  { %6569 = vmatprep.mubr.msk.f32.mxu1 %vm6613_vm9, %v6612_v11  ;;  %vm4309_vm4 = vcmp.gt.f32.partialorder %v216_v31, %v3969_v2  ;;  %v6223_v16 = vpop.f32.mrf.mxu0  ;;  %6374 = vmatprep.mubr.msk.f32.mxu0 %vm6613_vm9, %v6612_v11 }
 0x371   :  { %v4959_v34 = vsel %vm4309_vm4, 1.0, %v6612_v11  ;;  %v4561_v59 = vsel %vm4309_vm4, 0.0, %v216_v31  ;;  %v3975_v35 = vadd.f32 %v3974_v48, %v3529_v62 }
 0x372   :  { %4498 = vst [vmem:[#allocation2 + $0x38] sm:$0xff] %v4959_v34  ;;  %v3534_v31 = vpop.f32.mrf.mxu0 }
 0x373   :  { %v91_v32 = vld [vmem:[%s10005_s2 + $0x40] sm:$0xff] }
 0x374   :  { %4622 = vst [vmem:[%s10008_s5 + $0x28] sm:$0xff] %v4559_v17  ;;  %v154_v9 = vsub.f32 %v28_v63, %v91_v32  ;;  %v6424_v63 = vpop.f32.mrf.mxu1  ;;  %v6226_v47 = vpop.f32.mrf.mxu0 }
 0x375   :  { %v10554_v63 = vld [vmem:[#allocation95_spill] sm:$0xff] }
 0x376   :  { %v217_v17 = vadd.f32 %v154_v9, %v91_v32  ;;  %v3992_v32 = vpop.f32.mrf.mxu1  ;;  %v10553_v9 = vld [vmem:[#allocation93_spill] sm:$0xff] }
 0x377   :  { %6570 = vmatmul.mubr.msk.f32.gmra.mxu1 %vm970_vm3, %v10553_v9  ;;  %6375 = vmatmul.mubr.msk.f32.gmra.mxu0 %vm970_vm3, %v10553_v9  ;;  %v33_v9 = vld [vmem:[%s10004_s1 + $0x68] sm:$0xff] }
 0x378   :  { %6572 = vmatprep.mubr.msk.f32.mxu1 %vm6613_vm9, %v6612_v11  ;;  %vm4310_vm5 = vcmp.gt.f32.partialorder %v217_v17, %v3975_v35  ;;  %v6427_v4 = vpop.f32.mrf.mxu1  ;;  %6377 = vmatprep.mubr.msk.f32.mxu0 %vm6613_vm9, %v6612_v11 }
 0x379   :  { %v4562_v2 = vsel %vm4310_vm5, 0.0, %v217_v17  ;;  %v3540_v17 = vpop.f32.mrf.mxu0 }
 0x37a   :  { %v3541_v34 = vadd.f32 %v3540_v17, %v8631_v10  ;;  %v10556_v17 = vld [vmem:[#allocation99_spill] sm:$0xff] }
 0x37b   :  { %v92_v58 = vld [vmem:[%s10005_s2 + $0x48] sm:$0xff]  ;;  %6573 = vmatmul.mubr.msk.f32.gmra.mxu1 %vm970_vm3, %v10554_v63  ;;  %v6229_v35 = vpop.f32.mrf.mxu0  ;;  %6378 = vmatmul.mubr.msk.f32.gmra.mxu0 %vm970_vm3, %v10554_v63 }
 0x37c   :  { %4623 = vst [vmem:[%s10008_s5 + $0x30] sm:$0xff] %v4560_v18  ;;  %v155_v23 = vsub.f32 %v29_v14, %v92_v58  ;;  %v3535_v18 = vadd.f32 %v3534_v31, %v8621_v49  ;;  %v4960_v14 = vsel %vm4310_vm5, 1.0, %v6612_v11  ;;  %6575 = vmatprep.mubr.msk.f32.mxu1 %vm6613_vm9, %v6612_v11  ;;  %v3987_v10 = vadd.f32 %v3986_v24, %v3541_v34 }
 0x37d   :  { %4499 = vst [vmem:[#allocation2 + $0x40] sm:$0xff] %v4960_v14  ;;  %6380 = vmatprep.mubr.msk.f32.mxu0 %vm6613_vm9, %v6612_v11 }
 0x37e   :  { %v218_v45 = vadd.f32 %v155_v23, %v92_v58  ;;  %v3981_v49 = vadd.f32 %v3980_v53, %v3535_v18  ;;  %v3998_v58 = vpop.f32.mrf.mxu1  ;;  %v10555_v18 = vld [vmem:[#allocation97_spill] sm:$0xff] }
 0x37f   :  { %6576 = vmatmul.mubr.msk.f32.gmra.mxu1 %vm970_vm3, %v10555_v18  ;;  %6381 = vmatmul.mubr.msk.f32.gmra.mxu0 %vm970_vm3, %v10555_v18 }
 0x380   :  { %vm4311_vm6 = vcmp.gt.f32.partialorder %v218_v45, %v3981_v49  ;;  %6578 = vmatprep.mubr.msk.f32.mxu1 %vm6613_vm9, %v6612_v11  ;;  %6383 = vmatprep.mubr.msk.f32.mxu0 %vm6613_vm9, %v6612_v11 }
 0x381   :  { %v4961_v16 = vsel %vm4311_vm6, 1.0, %v6612_v11 }
 0x382   :  { %4500 = vst [vmem:[#allocation2 + $0x48] sm:$0xff] %v4961_v16 }
 0x383   :  { %v93_v56 = vld [vmem:[%s10005_s2 + $0x50] sm:$0xff]  ;;  %6579 = vmatmul.mubr.msk.f32.gmra.mxu1 %vm970_vm3, %v10556_v17  ;;  %6384 = vmatmul.mubr.msk.f32.gmra.mxu0 %vm970_vm3, %v10556_v17 }
 0x384   :  { %4624 = vst [vmem:[%s10008_s5 + $0x38] sm:$0xff] %v4561_v59  ;;  %v156_v48 = vsub.f32 %v30_v29, %v93_v56  ;;  %v6430_v59 = vpop.f32.mrf.mxu1  ;;  %v4563_v29 = vsel %vm4311_vm6, 0.0, %v218_v45  ;;  %v3546_v45 = vpop.f32.mrf.mxu0 }
 0x386   :  { %v219_v23 = vadd.f32 %v156_v48, %v93_v56  ;;  %v4004_v56 = vpop.f32.mrf.mxu1  ;;  %v3547_v48 = vadd.f32 %v3546_v45, %v8641_v44 }
 0x388   :  { %vm4312_vm7 = vcmp.gt.f32.partialorder %v219_v23, %v3987_v10  ;;  %v6433_v14 = vpop.f32.mrf.mxu1  ;;  %v3993_v44 = vadd.f32 %v3992_v32, %v3547_v48 }
 0x389   :  { %v4564_v47 = vsel %vm4312_vm7, 0.0, %v219_v23 }
 0x38b   :  { %v94_v62 = vld [vmem:[%s10005_s2 + $0x58] sm:$0xff] }
 0x38c   :  { %4625 = vst [vmem:[%s10008_s5 + $0x40] sm:$0xff] %v4562_v2  ;;  %v157_v53 = vsub.f32 %v31_v1, %v94_v62  ;;  %v4962_v2 = vsel %vm4312_vm7, 1.0, %v6612_v11  ;;  %v6232_v1 = vpop.f32.mrf.mxu0 }
 0x38d   :  { %4501 = vst [vmem:[#allocation2 + $0x50] sm:$0xff] %v4962_v2 }
 0x38e   :  { %v220_v4 = vadd.f32 %v157_v53, %v94_v62  ;;  %v4010_v62 = vpop.f32.mrf.mxu1  ;;  %v3552_v23 = vpop.f32.mrf.mxu0 }
 0x38f   :  { %v3553_v59 = vadd.f32 %v3552_v23, %v8651_v61 }
 0x390   :  { %vm4313_vm8 = vcmp.gt.f32.partialorder %v220_v4, %v3993_v44  ;;  %v6436_v53 = vpop.f32.mrf.mxu1  ;;  %v6235_v35 = vpop.f32.mrf.mxu0 }
 0x391   :  { %v4565_v32 = vsel %vm4313_vm8, 0.0, %v220_v4  ;;  %v3999_v61 = vadd.f32 %v3998_v58, %v3553_v59  ;;  %v35_v58 = vld [vmem:[%s10004_s1 + $0x78] sm:$0xff] }
 0x392   :  { %v3558_v10 = vpop.f32.mrf.mxu0 }
 0x393   :  { %v95_v31 = vld [vmem:[%s10005_s2 + $0x60] sm:$0xff]  ;;  %v3559_v4 = vadd.f32 %v3558_v10, %v8661_v42 }
 0x394   :  { %4626 = vst [vmem:[%s10008_s5 + $0x48] sm:$0xff] %v4563_v29  ;;  %v158_v24 = vsub.f32 %v32_v50, %v95_v31  ;;  %v4963_v29 = vsel %vm4313_vm8, 1.0, %v6612_v11  ;;  %v34_v50 = vld [vmem:[%s10004_s1 + $0x70] sm:$0xff] }
 0x395   :  { %4502 = vst [vmem:[#allocation2 + $0x58] sm:$0xff] %v4963_v29  ;;  %v4005_v42 = vadd.f32 %v4004_v56, %v3559_v4  ;;  %v36_v29 = vld [vmem:[%s10004_s1 + $0x80] sm:$0xff] }
 0x396   :  { %v221_v34 = vadd.f32 %v158_v24, %v95_v31  ;;  %v4016_v31 = vpop.f32.mrf.mxu1 }
 0x398   :  { %vm4314_vm10 = vcmp.gt.f32.partialorder %v221_v34, %v3999_v61  ;;  %v6439_v48 = vpop.f32.mrf.mxu1 }
 0x399   :  { %v4964_v24 = vsel %vm4314_vm10, 1.0, %v6612_v11  ;;  %v4566_v2 = vsel %vm4314_vm10, 0.0, %v221_v34  ;;  %v37_v48 = vld [vmem:[%s10004_s1 + $0x88] sm:$0xff] }
 0x39a   :  { %4503 = vst [vmem:[#allocation2 + $0x60] sm:$0xff] %v4964_v24  ;;  %v4022_v1 = vpop.f32.mrf.mxu1 }
 0x39b   :  { %v96_v49 = vld [vmem:[%s10005_s2 + $0x68] sm:$0xff] }
 0x39c   :  { %4627 = vst [vmem:[%s10008_s5 + $0x50] sm:$0xff] %v4564_v47  ;;  %v159_v16 = vsub.f32 %v33_v9, %v96_v49  ;;  %v6238_v47 = vpop.f32.mrf.mxu0  ;;  %v6442_v23 = vpop.f32.mrf.mxu1 }
 0x39e   :  { %v222_v45 = vadd.f32 %v159_v16, %v96_v49  ;;  %v3564_v9 = vpop.f32.mrf.mxu0  ;;  %v4028_v17 = vpop.f32.mrf.mxu1 }
 0x39f   :  { %v3565_v44 = vadd.f32 %v3564_v9, %v8671_v25 }
 0x3a0   :  { %vm4315_vm9 = vcmp.gt.f32.partialorder %v222_v45, %v4005_v42  ;;  %v6241_v16 = vpop.f32.mrf.mxu0 }
 0x3a1   :  { %v4965_v59 = vsel %vm4315_vm9, 1.0, %v6612_v11  ;;  %v4567_v53 = vsel %vm4315_vm9, 0.0, %v222_v45  ;;  %v4011_v25 = vadd.f32 %v4010_v62, %v3565_v44  ;;  %v38_v44 = vld [vmem:[%s10004_s1 + $0x90] sm:$0xff] }
 0x3a2   :  { %4504 = vst [vmem:[#allocation2 + $0x68] sm:$0xff] %v4965_v59 }
 0x3a3   :  { %v97_v63 = vld [vmem:[%s10005_s2 + $0x70] sm:$0xff] }
 0x3a4   :  { %4628 = vst [vmem:[%s10008_s5 + $0x58] sm:$0xff] %v4565_v32  ;;  %v160_v14 = vsub.f32 %v34_v50, %v97_v63  ;;  %v3570_v32 = vpop.f32.mrf.mxu0 }
 0x3a5   :  { %v3571_v50 = vadd.f32 %v3570_v32, %v8682_v40 }
 0x3a6   :  { %v223_v49 = vadd.f32 %v160_v14, %v97_v63  ;;  %v6445_v63 = vpop.f32.mrf.mxu1  ;;  %v6244_v4 = vpop.f32.mrf.mxu0 }
 0x3a7   :  { %v4017_v40 = vadd.f32 %v4016_v31, %v3571_v50 }
 0x3a8   :  { %vm4316_vm3 = vcmp.gt.f32.partialorder %v223_v49, %v4011_v25  ;;  %v4034_v14 = vpop.f32.mrf.mxu1  ;;  %v3576_v24 = vpop.f32.mrf.mxu0 }
 0x3a9   :  { %v4966_v10 = vsel %vm4316_vm3, 1.0, %v6612_v11  ;;  %v4568_v45 = vsel %vm4316_vm3, 0.0, %v223_v49  ;;  %v3577_v47 = vadd.f32 %v3576_v24, %v8693_v21  ;;  %v40_v24 = vld [vmem:[%s10004_s1 + $0xa0] sm:$0xff] }
 0x3aa   :  { %4505 = vst [vmem:[#allocation2 + $0x70] sm:$0xff] %v4966_v10  ;;  %v6247_v49 = vpop.f32.mrf.mxu0 }
 0x3ab   :  { %v98_v18 = vld [vmem:[%s10005_s2 + $0x78] sm:$0xff]  ;;  %v4023_v21 = vadd.f32 %v4022_v1, %v3577_v47 }
 0x3ac   :  { %4629 = vst [vmem:[%s10008_s5 + $0x60] sm:$0xff] %v4566_v2  ;;  %v161_v34 = vsub.f32 %v35_v58, %v98_v18  ;;  %v6448_v58 = vpop.f32.mrf.mxu1 }
 0x3ae   :  { %v224_v35 = vadd.f32 %v161_v34, %v98_v18  ;;  %v4040_v23 = vpop.f32.mrf.mxu1  ;;  %v3582_v34 = vpop.f32.mrf.mxu0 }
 0x3b0   :  { %vm4317_vm11 = vcmp.gt.f32.partialorder %v224_v35, %v4017_v40  ;;  %v6451_v16 = vpop.f32.mrf.mxu1  ;;  %v6250_v32 = vpop.f32.mrf.mxu0 }
 0x3b1   :  { %v4967_v42 = vsel %vm4317_vm11, 1.0, %v6612_v11  ;;  %v4569_v9 = vsel %vm4317_vm11, 0.0, %v224_v35  ;;  %v39_v35 = vld [vmem:[%s10004_s1 + $0x98] sm:$0xff] }
 0x3b2   :  { %4506 = vst [vmem:[#allocation2 + $0x78] sm:$0xff] %v4967_v42  ;;  %v4046_v50 = vpop.f32.mrf.mxu1  ;;  %v3588_v63 = vpop.f32.mrf.mxu0 }
 0x3b3   :  { %v99_v56 = vld [vmem:[%s10005_s2 + $0x80] sm:$0xff]  ;;  %v3589_v10 = vadd.f32 %v3588_v63, %v8715_v46 }
 0x3b4   :  { %4630 = vst [vmem:[%s10008_s5 + $0x68] sm:$0xff] %v4567_v53  ;;  %v162_v61 = vsub.f32 %v36_v29, %v99_v56  ;;  %v3583_v53 = vadd.f32 %v3582_v34, %v8704_v54  ;;  %v6253_v40 = vpop.f32.mrf.mxu0 }
 0x3b5   :  { %v4035_v46 = vadd.f32 %v4034_v14, %v3589_v10 }
 0x3b6   :  { %v225_v2 = vadd.f32 %v162_v61, %v99_v56  ;;  %v4029_v54 = vadd.f32 %v4028_v17, %v3583_v53  ;;  %v3594_v47 = vpop.f32.mrf.mxu0 }
 0x3b8   :  { %vm4318_vm12 = vcmp.gt.f32.partialorder %v225_v2, %v4023_v21  ;;  %v41_v21 = vld [vmem:[%s10004_s1 + $0xa8] sm:$0xff] }
 0x3b9   :  { %v4968_v56 = vsel %vm4318_vm12, 1.0, %v6612_v11  ;;  %v4570_v25 = vsel %vm4318_vm12, 0.0, %v225_v2 }
 0x3ba   :  { %4507 = vst [vmem:[#allocation2 + $0x80] sm:$0xff] %v4968_v56 }
 0x3bb   :  { %v100_v62 = vld [vmem:[%s10005_s2 + $0x88] sm:$0xff] }
 0x3bc   :  { %4631 = vst [vmem:[%s10008_s5 + $0x70] sm:$0xff] %v4568_v45  ;;  %v163_v18 = vsub.f32 %v37_v48, %v100_v62  ;;  %v6454_v45 = vpop.f32.mrf.mxu1 }
 0x3be   :  { %v226_v59 = vadd.f32 %v163_v18, %v100_v62  ;;  %v4052_v2 = vpop.f32.mrf.mxu1  ;;  %v3595_v18 = vadd.f32 %v3594_v47, %v8726_v38 }
 0x3c0   :  { %vm4319_vm13 = vcmp.gt.f32.partialorder %v226_v59, %v4029_v54  ;;  %v6457_v42 = vpop.f32.mrf.mxu1  ;;  %v4041_v38 = vadd.f32 %v4040_v23, %v3595_v18 }
 0x3c1   :  { %v4969_v48 = vsel %vm4319_vm13, 1.0, %v6612_v11  ;;  %v4571_v62 = vsel %vm4319_vm13, 0.0, %v226_v59 }
 0x3c2   :  { %4508 = vst [vmem:[#allocation2 + $0x88] sm:$0xff] %v4969_v48  ;;  %v4058_v34 = vpop.f32.mrf.mxu1 }
 0x3c3   :  { %v101_v31 = vld [vmem:[%s10005_s2 + $0x90] sm:$0xff] }
 0x3c4   :  { %4632 = vst [vmem:[%s10008_s5 + $0x78] sm:$0xff] %v4569_v9  ;;  %v164_v29 = vsub.f32 %v38_v44, %v101_v31 }
 0x3c6   :  { %v227_v61 = vadd.f32 %v164_v29, %v101_v31  ;;  %v6256_v31 = vpop.f32.mrf.mxu0  ;;  %v6460_v29 = vpop.f32.mrf.mxu1 }
 0x3c7   :  { %v44_v31 = vld [vmem:[%s10004_s1 + $0xc0] sm:$0xff] }
 0x3c8   :  { %vm4320_vm14 = vcmp.gt.f32.partialorder %v227_v61, %v4035_v46  ;;  %v3600_v59 = vpop.f32.mrf.mxu0  ;;  %v4064_v54 = vpop.f32.mrf.mxu1 }
 0x3c9   :  { %v4970_v49 = vsel %vm4320_vm14, 1.0, %v6612_v11  ;;  %v4572_v44 = vsel %vm4320_vm14, 0.0, %v227_v61  ;;  %v3601_v16 = vadd.f32 %v3600_v59, %v8737_v52 }
 0x3ca   :  { %4509 = vst [vmem:[#allocation2 + $0x90] sm:$0xff] %v4970_v49  ;;  %v6463_v45 = vpop.f32.mrf.mxu1 }
 0x3cb   :  { %v102_v1 = vld [vmem:[%s10005_s2 + $0x98] sm:$0xff]  ;;  %v4047_v52 = vadd.f32 %v4046_v50, %v3601_v16 }
 0x3cc   :  { %4633 = vst [vmem:[%s10008_s5 + $0x80] sm:$0xff] %v4570_v25  ;;  %v165_v4 = vsub.f32 %v39_v35, %v102_v1  ;;  %v6259_v35 = vpop.f32.mrf.mxu0 }
 0x3ce   :  { %v228_v58 = vadd.f32 %v165_v4, %v102_v1  ;;  %v42_v1 = vld [vmem:[%s10004_s1 + $0xb0] sm:$0xff]  ;;  %v3606_v63 = vpop.f32.mrf.mxu0 }
 0x3cf   :  { %v3607_v10 = vadd.f32 %v3606_v63, %v8748_v60 }
 0x3d0   :  { %vm4321_vm15 = vcmp.gt.f32.partialorder %v228_v58, %v4041_v38  ;;  %v6262_v40 = vpop.f32.mrf.mxu0 }
 0x3d1   :  { %v4971_v25 = vsel %vm4321_vm15, 1.0, %v6612_v11  ;;  %v4573_v32 = vsel %vm4321_vm15, 0.0, %v228_v58  ;;  %v4053_v60 = vadd.f32 %v4052_v2, %v3607_v10 }
 0x3d2   :  { %4510 = vst [vmem:[#allocation2 + $0x98] sm:$0xff] %v4971_v25  ;;  %v3612_v46 = vpop.f32.mrf.mxu0 }
 0x3d3   :  { %v103_v17 = vld [vmem:[%s10005_s2 + $0xa0] sm:$0xff]  ;;  %v3613_v58 = vadd.f32 %v3612_v46, %v8759_v30 }
 0x3d4   :  { %4634 = vst [vmem:[%s10008_s5 + $0x88] sm:$0xff] %v4571_v62  ;;  %v166_v9 = vsub.f32 %v40_v24, %v103_v17  ;;  %v43_v24 = vld [vmem:[%s10004_s1 + $0xb8] sm:$0xff] }
 0x3d5   :  { %v4059_v30 = vadd.f32 %v4058_v34, %v3613_v58 }
 0x3d6   :  { %v229_v53 = vadd.f32 %v166_v9, %v103_v17  ;;  %v4070_v17 = vpop.f32.mrf.mxu1 }
 0x3d8   :  { %vm4322_vm0 = vcmp.gt.f32.partialorder %v229_v53, %v4047_v52  ;;  %v6466_v18 = vpop.f32.mrf.mxu1 }
 0x3d9   :  { %v4972_v48 = vsel %vm4322_vm0, 1.0, %v6612_v11  ;;  %v4574_v62 = vsel %vm4322_vm0, 0.0, %v229_v53 }
 0x3da   :  { %4511 = vst [vmem:[#allocation2 + $0xa0] sm:$0xff] %v4972_v48  ;;  %v46_v48 = vld [vmem:[%s10004_s1 + $0xd0] sm:$0xff] }
 0x3db   :  { %v104_v14 = vld [vmem:[%s10005_s2 + $0xa8] sm:$0xff] }
 0x3dc   :  { %4635 = vst [vmem:[%s10008_s5 + $0x90] sm:$0xff] %v4572_v44  ;;  %v167_v56 = vsub.f32 %v41_v21, %v104_v14  ;;  %v6265_v44 = vpop.f32.mrf.mxu0  ;;  %v4076_v21 = vpop.f32.mrf.mxu1 }
 0x3de   :  { %v230_v61 = vadd.f32 %v167_v56, %v104_v14  ;;  %v3618_v14 = vpop.f32.mrf.mxu0  ;;  %v6469_v53 = vpop.f32.mrf.mxu1 }
 0x3df   :  { %v3619_v59 = vadd.f32 %v3618_v14, %v8770_v12  ;;  %v48_v53 = vld [vmem:[%s10004_s1 + $0xe0] sm:$0xff] }
 0x3e0   :  { %vm4323_vm1 = vcmp.gt.f32.partialorder %v230_v61, %v4053_v60  ;;  %v6268_v25 = vpop.f32.mrf.mxu0  ;;  %v4082_v35 = vpop.f32.mrf.mxu1 }
 0x3e1   :  { %v4973_v9 = vsel %vm4323_vm1, 1.0, %v6612_v11  ;;  %v4575_v49 = vsel %vm4323_vm1, 0.0, %v230_v61  ;;  %v4065_v12 = vadd.f32 %v4064_v54, %v3619_v59 }
 0x3e2   :  { %4512 = vst [vmem:[#allocation2 + $0xa8] sm:$0xff] %v4973_v9  ;;  %v6472_v63 = vpop.f32.mrf.mxu1 }
 0x3e3   :  { %v105_v23 = vld [vmem:[%s10005_s2 + $0xb0] sm:$0xff] }
 0x3e4   :  { %4636 = vst [vmem:[%s10008_s5 + $0x98] sm:$0xff] %v4573_v32  ;;  %v168_v4 = vsub.f32 %v42_v1, %v105_v23  ;;  %v45_v32 = vld [vmem:[%s10004_s1 + $0xc8] sm:$0xff]  ;;  %v3624_v1 = vpop.f32.mrf.mxu0 }
 0x3e5   :  { %v3625_v52 = vadd.f32 %v3624_v1, %v8781_v43 }
 0x3e6   :  { %v231_v47 = vadd.f32 %v168_v4, %v105_v23  ;;  %v6271_v4 = vpop.f32.mrf.mxu0 }
 0x3e7   :  { %v4071_v43 = vadd.f32 %v4070_v17, %v3625_v52  ;;  %v49_v52 = vld [vmem:[%s10004_s1 + $0xe8] sm:$0xff] }
 0x3e8   :  { %vm4324_vm2 = vcmp.gt.f32.partialorder %v231_v47, %v4059_v30  ;;  %v3630_v40 = vpop.f32.mrf.mxu0 }
 0x3e9   :  { %v4974_v29 = vsel %vm4324_vm2, 1.0, %v6612_v11  ;;  %v4576_v56 = vsel %vm4324_vm2, 0.0, %v231_v47 }
 0x3ea   :  { %4513 = vst [vmem:[#allocation2 + $0xb0] sm:$0xff] %v4974_v29  ;;  %v6274_v18 = vpop.f32.mrf.mxu0 }
 0x3eb   :  { %v106_v50 = vld [vmem:[%s10005_s2 + $0xb8] sm:$0xff] }
 0x3ec   :  { %4637 = vst [vmem:[%s10008_s5 + $0xa0] sm:$0xff] %v4574_v62  ;;  %v169_v42 = vsub.f32 %v43_v24, %v106_v50  ;;  %v4088_v62 = vpop.f32.mrf.mxu1 }
 0x3ee   :  { %v232_v38 = vadd.f32 %v169_v42, %v106_v50  ;;  %v3631_v50 = vadd.f32 %v3630_v40, %v8792_v15  ;;  %v6475_v60 = vpop.f32.mrf.mxu1  ;;  %v47_v42 = vld [vmem:[%s10004_s1 + $0xd8] sm:$0xff] }
 0x3f0   :  { %vm4325_vm4 = vcmp.gt.f32.partialorder %v232_v38, %v4065_v12  ;;  %v4077_v15 = vadd.f32 %v4076_v21, %v3631_v50  ;;  %v4094_v9 = vpop.f32.mrf.mxu1 }
 0x3f1   :  { %v4975_v10 = vsel %vm4325_vm4, 1.0, %v6612_v11  ;;  %v4577_v45 = vsel %vm4325_vm4, 0.0, %v232_v38 }
 0x3f2   :  { %4514 = vst [vmem:[#allocation2 + $0xb8] sm:$0xff] %v4975_v10 }
 0x3f3   :  { %v107_v2 = vld [vmem:[%s10005_s2 + $0xc0] sm:$0xff] }
 0x3f4   :  { %4638 = vst [vmem:[%s10008_s5 + $0xa8] sm:$0xff] %v4575_v49  ;;  %v170_v16 = vsub.f32 %v44_v31, %v107_v2  ;;  %v3636_v49 = vpop.f32.mrf.mxu0 }
 0x3f5   :  { %v3637_v31 = vadd.f32 %v3636_v49, %v8803_v3  ;;  %v51_v49 = vld [vmem:[%s10004_s1 + $0xf8] sm:$0xff] }
 0x3f6   :  { %v233_v23 = vadd.f32 %v170_v16, %v107_v2  ;;  %v6478_v2 = vpop.f32.mrf.mxu1  ;;  %v6277_v59 = vpop.f32.mrf.mxu0 }
 0x3f7   :  { %v4083_v3 = vadd.f32 %v4082_v35, %v3637_v31 }
 0x3f8   :  { %vm4326_vm5 = vcmp.gt.f32.partialorder %v233_v23, %v4071_v43  ;;  %v4100_v16 = vpop.f32.mrf.mxu1  ;;  %v3642_v29 = vpop.f32.mrf.mxu0 }
 0x3f9   :  { %v4976_v47 = vsel %vm4326_vm5, 1.0, %v6612_v11  ;;  %v4578_v58 = vsel %vm4326_vm5, 0.0, %v233_v23  ;;  %v3643_v25 = vadd.f32 %v3642_v29, %v8814_v7 }
 0x3fa   :  { %4515 = vst [vmem:[#allocation2 + $0xc0] sm:$0xff] %v4976_v47  ;;  %v6280_v23 = vpop.f32.mrf.mxu0 }
 0x3fb   :  { %v108_v34 = vld [vmem:[%s10005_s2 + $0xc8] sm:$0xff]  ;;  %v4089_v7 = vadd.f32 %v4088_v62, %v3643_v25 }
 0x3fc   :  { %4639 = vst [vmem:[%s10008_s5 + $0xb0] sm:$0xff] %v4576_v56  ;;  %v171_v61 = vsub.f32 %v45_v32, %v108_v34  ;;  %v6481_v32 = vpop.f32.mrf.mxu1 }
 0x3fe   :  { %v234_v24 = vadd.f32 %v171_v61, %v108_v34  ;;  %v4106_v63 = vpop.f32.mrf.mxu1  ;;  %v3648_v61 = vpop.f32.mrf.mxu0 }
 0x400   :  { %vm4327_vm6 = vcmp.gt.f32.partialorder %v234_v24, %v4077_v15  ;;  %v6484_v4 = vpop.f32.mrf.mxu1  ;;  %v6283_v40 = vpop.f32.mrf.mxu0 }
 0x401   :  { %v4977_v14 = vsel %vm4327_vm6, 1.0, %v6612_v11  ;;  %v4579_v38 = vsel %vm4327_vm6, 0.0, %v234_v24  ;;  %v50_v24 = vld [vmem:[%s10004_s1 + $0xf0] sm:$0xff] }
 0x402   :  { %4516 = vst [vmem:[#allocation2 + $0xc8] sm:$0xff] %v4977_v14  ;;  %v4112_v50 = vpop.f32.mrf.mxu1  ;;  %v3654_v60 = vpop.f32.mrf.mxu0 }
 0x403   :  { %v109_v54 = vld [vmem:[%s10005_s2 + $0xd0] sm:$0xff]  ;;  %v3655_v47 = vadd.f32 %v3654_v60, %v8836_v33 }
 0x404   :  { %4640 = vst [vmem:[%s10008_s5 + $0xb8] sm:$0xff] %v4577_v45  ;;  %v172_v46 = vsub.f32 %v46_v48, %v109_v54  ;;  %v3649_v45 = vadd.f32 %v3648_v61, %v8825_v36  ;;  %v6286_v15 = vpop.f32.mrf.mxu0 }
 0x405   :  { %v4101_v33 = vadd.f32 %v4100_v16, %v3655_v47  ;;  %v55_v15 = vld [vmem:[%s10004_s1 + $0x118] sm:$0xff] }
 0x406   :  { %v235_v44 = vadd.f32 %v172_v46, %v109_v54  ;;  %v4095_v36 = vadd.f32 %v4094_v9, %v3649_v45  ;;  %v3660_v31 = vpop.f32.mrf.mxu0 }
 0x408   :  { %vm4328_vm7 = vcmp.gt.f32.partialorder %v235_v44, %v4083_v3  ;;  %v52_v3 = vld [vmem:[%s10004_s1 + $0x100] sm:$0xff] }
 0x409   :  { %v4978_v12 = vsel %vm4328_vm7, 1.0, %v6612_v11  ;;  %v4580_v1 = vsel %vm4328_vm7, 0.0, %v235_v44 }
 0x40a   :  { %4517 = vst [vmem:[#allocation2 + $0xd0] sm:$0xff] %v4978_v12 }
 0x40b   :  { %v110_v17 = vld [vmem:[%s10005_s2 + $0xd8] sm:$0xff] }
 0x40c   :  { %4641 = vst [vmem:[%s10008_s5 + $0xc0] sm:$0xff] %v4578_v58  ;;  %v173_v30 = vsub.f32 %v47_v42, %v110_v17  ;;  %v6487_v58 = vpop.f32.mrf.mxu1 }
 0x40e   :  { %v236_v56 = vadd.f32 %v173_v30, %v110_v17  ;;  %v4118_v44 = vpop.f32.mrf.mxu1  ;;  %v3661_v30 = vadd.f32 %v3660_v31, %v8847_v26 }
 0x410   :  { %vm4329_vm8 = vcmp.gt.f32.partialorder %v236_v56, %v4089_v7  ;;  %v6490_v14 = vpop.f32.mrf.mxu1  ;;  %v4107_v26 = vadd.f32 %v4106_v63, %v3661_v30 }
 0x411   :  { %v4979_v54 = vsel %vm4329_vm8, 1.0, %v6612_v11  ;;  %v4581_v43 = vsel %vm4329_vm8, 0.0, %v236_v56 }
 0x412   :  { %4518 = vst [vmem:[#allocation2 + $0xd8] sm:$0xff] %v4979_v54  ;;  %v4124_v29 = vpop.f32.mrf.mxu1 }
 0x413   :  { %v111_v21 = vld [vmem:[%s10005_s2 + $0xe0] sm:$0xff] }
 0x414   :  { %4642 = vst [vmem:[%s10008_s5 + $0xc8] sm:$0xff] %v4579_v38  ;;  %v174_v34 = vsub.f32 %v48_v53, %v111_v21 }
 0x416   :  { %v237_v10 = vadd.f32 %v174_v34, %v111_v21  ;;  %v6289_v21 = vpop.f32.mrf.mxu0  ;;  %v6493_v34 = vpop.f32.mrf.mxu1 }
 0x418   :  { %vm4330_vm10 = vcmp.gt.f32.partialorder %v237_v10, %v4095_v36  ;;  %v3666_v56 = vpop.f32.mrf.mxu0  ;;  %v4130_v63 = vpop.f32.mrf.mxu1 }
 0x419   :  { %v4980_v42 = vsel %vm4330_vm10, 1.0, %v6612_v11  ;;  %v4582_v17 = vsel %vm4330_vm10, 0.0, %v237_v10  ;;  %v3667_v32 = vadd.f32 %v3666_v56, %v8858_v0 }
 0x41a   :  { %4519 = vst [vmem:[#allocation2 + $0xe0] sm:$0xff] %v4980_v42  ;;  %v6496_v4 = vpop.f32.mrf.mxu1 }
 0x41b   :  { %v112_v35 = vld [vmem:[%s10005_s2 + $0xe8] sm:$0xff]  ;;  %v4113_v0 = vadd.f32 %v4112_v50, %v3667_v32 }
 0x41c   :  { %4643 = vst [vmem:[%s10008_s5 + $0xd0] sm:$0xff] %v4580_v1  ;;  %v175_v48 = vsub.f32 %v49_v52, %v112_v35  ;;  %v6292_v52 = vpop.f32.mrf.mxu0  ;;  %v4136_v36 = vpop.f32.mrf.mxu1 }
 0x41e   :  { %v238_v46 = vadd.f32 %v175_v48, %v112_v35  ;;  %v53_v35 = vld [vmem:[%s10004_s1 + $0x108] sm:$0xff]  ;;  %v3672_v61 = vpop.f32.mrf.mxu0  ;;  %v6499_v47 = vpop.f32.mrf.mxu1 }
 0x41f   :  { %v3673_v45 = vadd.f32 %v3672_v61, %v8869_v51  ;;  %v59_v47 = vld [vmem:[%s10004_s1 + $0x138] sm:$0xff] }
 0x420   :  { %vm4331_vm9 = vcmp.gt.f32.partialorder %v238_v46, %v4101_v33  ;;  %v6295_v40 = vpop.f32.mrf.mxu0 }
 0x421   :  { %v4981_v59 = vsel %vm4331_vm9, 1.0, %v6612_v11  ;;  %v4583_v53 = vsel %vm4331_vm9, 0.0, %v238_v46  ;;  %v4119_v51 = vadd.f32 %v4118_v44, %v3673_v45 }
 0x422   :  { %4520 = vst [vmem:[#allocation2 + $0xe8] sm:$0xff] %v4981_v59  ;;  %v3678_v50 = vpop.f32.mrf.mxu0 }
 0x423   :  { %v113_v62 = vld [vmem:[%s10005_s2 + $0xf0] sm:$0xff]  ;;  %v3679_v46 = vadd.f32 %v3678_v50, %v8880_v19 }
 0x424   :  { %4644 = vst [vmem:[%s10008_s5 + $0xd8] sm:$0xff] %v4581_v43  ;;  %v176_v18 = vsub.f32 %v50_v24, %v113_v62  ;;  %v54_v24 = vld [vmem:[%s10004_s1 + $0x110] sm:$0xff] }
 0x425   :  { %v4125_v19 = vadd.f32 %v4124_v29, %v3679_v46 }
 0x426   :  { %v239_v2 = vadd.f32 %v176_v18, %v113_v62 }
 0x428   :  { %vm4332_vm3 = vcmp.gt.f32.partialorder %v239_v2, %v4107_v26 }
 0x429   :  { %v4982_v1 = vsel %vm4332_vm3, 1.0, %v6612_v11  ;;  %v4584_v23 = vsel %vm4332_vm3, 0.0, %v239_v2 }
 0x42a   :  { %4521 = vst [vmem:[#allocation2 + $0xf0] sm:$0xff] %v4982_v1  ;;  %v57_v1 = vld [vmem:[%s10004_s1 + $0x128] sm:$0xff] }
 0x42b   :  { %v114_v9 = vld [vmem:[%s10005_s2 + $0xf8] sm:$0xff] }
 0x42c   :  { %4645 = vst [vmem:[%s10008_s5 + $0xe0] sm:$0xff] %v4582_v17  ;;  %v177_v38 = vsub.f32 %v51_v49, %v114_v9  ;;  %v6298_v17 = vpop.f32.mrf.mxu0 }
 0x42e   :  { %v240_v25 = vadd.f32 %v177_v38, %v114_v9  ;;  %v4142_v9 = vpop.f32.mrf.mxu1  ;;  %v3684_v33 = vpop.f32.mrf.mxu0 }
 0x42f   :  { %v3685_v31 = vadd.f32 %v3684_v33, %v8891_v41 }
 0x430   :  { %vm4333_vm11 = vcmp.gt.f32.partialorder %v240_v25, %v4113_v0  ;;  %v6502_v2 = vpop.f32.mrf.mxu1  ;;  %v6301_v59 = vpop.f32.mrf.mxu0 }
 0x431   :  { %v4983_v54 = vsel %vm4333_vm11, 1.0, %v6612_v11  ;;  %v4585_v43 = vsel %vm4333_vm11, 0.0, %v240_v25  ;;  %v4131_v41 = vadd.f32 %v4130_v63, %v3685_v31  ;;  %v60_v31 = vld [vmem:[%s10004_s1 + $0x140] sm:$0xff] }
 0x432   :  { %4522 = vst [vmem:[#allocation2 + $0xf8] sm:$0xff] %v4983_v54 }
 0x433   :  { %v115_v16 = vld [vmem:[%s10005_s2 + $0x100] sm:$0xff] }
 0x434   :  { %4646 = vst [vmem:[%s10008_s5 + $0xe8] sm:$0xff] %v4583_v53  ;;  %v178_v12 = vsub.f32 %v52_v3, %v115_v16  ;;  %v56_v53 = vld [vmem:[%s10004_s1 + $0x120] sm:$0xff]  ;;  %v4148_v3 = vpop.f32.mrf.mxu1 }
 0x436   :  { %v241_v10 = vadd.f32 %v178_v12, %v115_v16  ;;  %v3690_v16 = vpop.f32.mrf.mxu0  ;;  %v6505_v56 = vpop.f32.mrf.mxu1 }
 0x437   :  { %v3691_v29 = vadd.f32 %v3690_v16, %v8902_v57 }
 0x438   :  { %vm4334_vm12 = vcmp.gt.f32.partialorder %v241_v10, %v4119_v51  ;;  %v6304_v12 = vpop.f32.mrf.mxu0  ;;  %v4154_v52 = vpop.f32.mrf.mxu1 }
 0x439   :  { %v4984_v18 = vsel %vm4334_vm12, 1.0, %v6612_v11  ;;  %v4586_v42 = vsel %vm4334_vm12, 0.0, %v241_v10  ;;  %v4137_v57 = vadd.f32 %v4136_v36, %v3691_v29 }
 0x43a   :  { %4523 = vst [vmem:[#allocation2 + $0x100] sm:$0xff] %v4984_v18  ;;  %v6508_v63 = vpop.f32.mrf.mxu1 }
 0x43b   :  { %v116_v7 = vld [vmem:[%s10005_s2 + $0x108] sm:$0xff] }
 0x43c   :  { %4647 = vst [vmem:[%s10008_s5 + $0xf0] sm:$0xff] %v4584_v23  ;;  %v179_v48 = vsub.f32 %v53_v35, %v116_v7  ;;  %v3696_v35 = vpop.f32.mrf.mxu0 }
 0x43d   :  { %v3697_v0 = vadd.f32 %v3696_v35, %v8913_v5  ;;  %v62_v35 = vld [vmem:[%s10004_s1 + $0x150] sm:$0xff] }
 0x43e   :  { %v242_v60 = vadd.f32 %v179_v48, %v116_v7  ;;  %v6307_v4 = vpop.f32.mrf.mxu0  ;;  %v58_v48 = vld [vmem:[%s10004_s1 + $0x130] sm:$0xff] }
 0x43f   :  { %v4143_v5 = vadd.f32 %v4142_v9, %v3697_v0 }
 0x440   :  { %vm4335_vm13 = vcmp.gt.f32.partialorder %v242_v60, %v4125_v19  ;;  %v3702_v40 = vpop.f32.mrf.mxu0 }
 0x441   :  { %v4985_v14 = vsel %vm4335_vm13, 1.0, %v6612_v11  ;;  %v4587_v38 = vsel %vm4335_vm13, 0.0, %v242_v60 }
 0x442   :  { %4524 = vst [vmem:[#allocation2 + $0x108] sm:$0xff] %v4985_v14  ;;  %v6310_v46 = vpop.f32.mrf.mxu0 }
 0x443   :  { %v117_v62 = vld [vmem:[%s10005_s2 + $0x110] sm:$0xff] }
 0x444   :  { %4648 = vst [vmem:[%s10008_s5 + $0xf8] sm:$0xff] %v4585_v43  ;;  %v180_v58 = vsub.f32 %v54_v24, %v117_v62  ;;  %v4160_v43 = vpop.f32.mrf.mxu1 }
 0x446   :  { %v243_v44 = vadd.f32 %v180_v58, %v117_v62  ;;  %v3703_v62 = vadd.f32 %v3702_v40, %v8924_v13  ;;  %v6511_v51 = vpop.f32.mrf.mxu1 }
 0x448   :  { %vm4336_vm14 = vcmp.gt.f32.partialorder %v243_v44, %v4131_v41  ;;  %v4149_v13 = vadd.f32 %v4148_v3, %v3703_v62  ;;  %v4166_v18 = vpop.f32.mrf.mxu1 }
 0x449   :  { %v4986_v32 = vsel %vm4336_vm14, 1.0, %v6612_v11  ;;  %v4588_v34 = vsel %vm4336_vm14, 0.0, %v243_v44 }
 0x44a   :  { %4525 = vst [vmem:[#allocation2 + $0x110] sm:$0xff] %v4986_v32 }
 0x44b   :  { %v118_v49 = vld [vmem:[%s10005_s2 + $0x118] sm:$0xff] }
 0x44c   :  { %4649 = vst [vmem:[%s10008_s5 + $0x100] sm:$0xff] %v4586_v42  ;;  %v181_v30 = vsub.f32 %v55_v15, %v118_v49  ;;  %v3708_v42 = vpop.f32.mrf.mxu0 }
 0x44d   :  { %v3709_v15 = vadd.f32 %v3708_v42, %v8935_v20 }
 0x44e   :  { %v244_v26 = vadd.f32 %v181_v30, %v118_v49  ;;  %v6514_v49 = vpop.f32.mrf.mxu1  ;;  %v6313_v44 = vpop.f32.mrf.mxu0 }
 0x44f   :  { %v4155_v20 = vadd.f32 %v4154_v52, %v3709_v15 }
 0x450   :  { %vm4337_vm15 = vcmp.gt.f32.partialorder %v244_v26, %v4137_v57  ;;  %v4172_v30 = vpop.f32.mrf.mxu1  ;;  %v3714_v14 = vpop.f32.mrf.mxu0 }
 0x451   :  { %v4987_v10 = vsel %vm4337_vm15, 1.0, %v6612_v11  ;;  %v4589_v45 = vsel %vm4337_vm15, 0.0, %v244_v26  ;;  %v3715_v59 = vadd.f32 %v3714_v14, %v8946_v27  ;;  %v61_v26 = vld [vmem:[%s10004_s1 + $0x148] sm:$0xff] }
 0x452   :  { %4526 = vst [vmem:[#allocation2 + $0x118] sm:$0xff] %v4987_v10  ;;  %v6316_v16 = vpop.f32.mrf.mxu0 }
 0x453   :  { %v119_v21 = vld [vmem:[%s10005_s2 + $0x120] sm:$0xff]  ;;  %v4161_v27 = vadd.f32 %v4160_v43, %v3715_v59  ;;  %v63_v43 = vld [vmem:[%s10004_s1 + $0x158] sm:$0xff] }
 0x454   :  { %4650 = vst [vmem:[%s10008_s5 + $0x108] sm:$0xff] %v4587_v38  ;;  %v182_v25 = vsub.f32 %v56_v53, %v119_v21  ;;  %v6517_v53 = vpop.f32.mrf.mxu1 }
 0x456   :  { %v245_v7 = vadd.f32 %v182_v25, %v119_v21  ;;  %v4178_v56 = vpop.f32.mrf.mxu1  ;;  %v3720_v25 = vpop.f32.mrf.mxu0 }
 0x458   :  { %vm4338_vm0 = vcmp.gt.f32.partialorder %v245_v7, %v4143_v5  ;;  %v6520_v12 = vpop.f32.mrf.mxu1  ;;  %v6319_v52 = vpop.f32.mrf.mxu0 }
 0x459   :  { %v4988_v50 = vsel %vm4338_vm0, 1.0, %v6612_v11  ;;  %v4590_v60 = vsel %vm4338_vm0, 0.0, %v245_v7  ;;  %v67_v52 = vld [vmem:[%s10004_s1 + $0x178] sm:$0xff] }
 0x45a   :  { %4527 = vst [vmem:[#allocation2 + $0x120] sm:$0xff] %v4988_v50  ;;  %v4184_v0 = vpop.f32.mrf.mxu1  ;;  %v3726_v63 = vpop.f32.mrf.mxu0 }
 0x45b   :  { %v120_v23 = vld [vmem:[%s10005_s2 + $0x128] sm:$0xff]  ;;  %v3727_v10 = vadd.f32 %v3726_v63, %v8968_v55 }
 0x45c   :  { %4651 = vst [vmem:[%s10008_s5 + $0x110] sm:$0xff] %v4588_v34  ;;  %v183_v61 = vsub.f32 %v57_v1, %v120_v23  ;;  %v3721_v34 = vadd.f32 %v3720_v25, %v8957_v37  ;;  %v6322_v5 = vpop.f32.mrf.mxu0 }
 0x45d   :  { %v4173_v55 = vadd.f32 %v4172_v30, %v3727_v10 }
 0x45e   :  { %v246_v24 = vadd.f32 %v183_v61, %v120_v23  ;;  %v4167_v37 = vadd.f32 %v4166_v18, %v3721_v34  ;;  %v3732_v62 = vpop.f32.mrf.mxu0 }
 0x460   :  { %vm4339_vm1 = vcmp.gt.f32.partialorder %v246_v24, %v4149_v13  ;;  %v64_v13 = vld [vmem:[%s10004_s1 + $0x160] sm:$0xff] }
 0x461   :  { %v4989_v9 = vsel %vm4339_vm1, 1.0, %v6612_v11  ;;  %v4591_v33 = vsel %vm4339_vm1, 0.0, %v246_v24 }
 0x462   :  { %4528 = vst [vmem:[#allocation2 + $0x128] sm:$0xff] %v4989_v9 }
 0x463   :  { %v121_v54 = vld [vmem:[%s10005_s2 + $0x130] sm:$0xff] }
 0x464   :  { %4652 = vst [vmem:[%s10008_s5 + $0x118] sm:$0xff] %v4589_v45  ;;  %v184_v36 = vsub.f32 %v58_v48, %v121_v54  ;;  %v6523_v45 = vpop.f32.mrf.mxu1 }
 0x466   :  { %v247_v17 = vadd.f32 %v184_v36, %v121_v54  ;;  %v4190_v24 = vpop.f32.mrf.mxu1  ;;  %v3733_v36 = vadd.f32 %v3732_v62, %v8979_v8 }
 0x468   :  { %vm4340_vm2 = vcmp.gt.f32.partialorder %v247_v17, %v4155_v20  ;;  %v6526_v50 = vpop.f32.mrf.mxu1  ;;  %v4179_v8 = vadd.f32 %v4178_v56, %v3733_v36 }
 0x469   :  { %v4990_v41 = vsel %vm4340_vm2, 1.0, %v6612_v11  ;;  %v4592_v3 = vsel %vm4340_vm2, 0.0, %v247_v17 }
 0x46a   :  { %4529 = vst [vmem:[#allocation2 + $0x130] sm:$0xff] %v4990_v41  ;;  %v4196_v42 = vpop.f32.mrf.mxu1 }
 0x46b   :  { %v122_v58 = vld [vmem:[%s10005_s2 + $0x138] sm:$0xff] }
 0x46c   :  { %4653 = vst [vmem:[%s10008_s5 + $0x120] sm:$0xff] %v4590_v60  ;;  %v185_v19 = vsub.f32 %v59_v47, %v122_v58 }
 0x46e   :  { %v248_v38 = vadd.f32 %v185_v19, %v122_v58  ;;  %v6325_v58 = vpop.f32.mrf.mxu0  ;;  %v6529_v19 = vpop.f32.mrf.mxu1 }
 0x470   :  { %vm4341_vm4 = vcmp.gt.f32.partialorder %v248_v38, %v4161_v27  ;;  %v3738_v17 = vpop.f32.mrf.mxu0  ;;  %v4202_v30 = vpop.f32.mrf.mxu1 }
 0x471   :  { %v4991_v23 = vsel %vm4341_vm4, 1.0, %v6612_v11  ;;  %v4593_v57 = vsel %vm4341_vm4, 0.0, %v248_v38  ;;  %v3739_v49 = vadd.f32 %v3738_v17, %v8990_v22  ;;  %v10558_v17 = vld [vmem:[#allocation82_spill] sm:$0xff] }
 0x472   :  { %4530 = vst [vmem:[#allocation2 + $0x138] sm:$0xff] %v4991_v23  ;;  %v6532_v53 = vpop.f32.mrf.mxu1 }
 0x473   :  { %v123_v2 = vld [vmem:[%s10005_s2 + $0x140] sm:$0xff]  ;;  %v4185_v22 = vadd.f32 %v4184_v0, %v3739_v49 }
 0x474   :  { %4654 = vst [vmem:[%s10008_s5 + $0x128] sm:$0xff] %v4591_v33  ;;  %v186_v21 = vsub.f32 %v60_v31, %v123_v2  ;;  %v6328_v31 = vpop.f32.mrf.mxu0  ;;  %v4208_v27 = vpop.f32.mrf.mxu1 }
 0x475   :  { %v70_v31 = vld [vmem:[%s10004_s1 + $0x190] sm:$0xff] }
 0x476   :  { %v249_v32 = vadd.f32 %v186_v21, %v123_v2  ;;  %v65_v2 = vld [vmem:[%s10004_s1 + $0x168] sm:$0xff]  ;;  %v3744_v14 = vpop.f32.mrf.mxu0  ;;  %v6535_v34 = vpop.f32.mrf.mxu1 }
 0x477   :  { %v3745_v59 = vadd.f32 %v3744_v14, %v9001_v39 }
 0x478   :  { %vm4342_vm5 = vcmp.gt.f32.partialorder %v249_v32, %v4167_v37  ;;  %v6331_v16 = vpop.f32.mrf.mxu0 }
 0x479   :  { %v4992_v48 = vsel %vm4342_vm5, 1.0, %v6612_v11  ;;  %v4594_v54 = vsel %vm4342_vm5, 0.0, %v249_v32  ;;  %v4191_v39 = vadd.f32 %v4190_v24, %v3745_v59  ;;  %v10557_v24 = vld [vmem:[#allocation77_spill] sm:$0xff] }
 0x47a   :  { %4531 = vst [vmem:[#allocation2 + $0x140] sm:$0xff] %v4992_v48  ;;  %v3750_v56 = vpop.f32.mrf.mxu0 }
 0x47b   :  { %v124_v29 = vld [vmem:[%s10005_s2 + $0x148] sm:$0xff]  ;;  %v3751_v32 = vadd.f32 %v3750_v56, %v9012_v6 }
 0x47c   :  { %4655 = vst [vmem:[%s10008_s5 + $0x130] sm:$0xff] %v4592_v3  ;;  %v187_v1 = vsub.f32 %v61_v26, %v124_v29  ;;  %v66_v26 = vld [vmem:[%s10004_s1 + $0x170] sm:$0xff] }
 0x47d   :  { %v4197_v6 = vadd.f32 %v4196_v42, %v3751_v32  ;;  %v10560_v32 = vld [vmem:[#allocation85_spill] sm:$0xff] }
 0x47e   :  { %v250_v61 = vadd.f32 %v187_v1, %v124_v29 }
 0x480   :  { %vm4343_vm6 = vcmp.gt.f32.partialorder %v250_v61, %v4173_v55 }
 0x481   :  { %v4993_v46 = vsel %vm4343_vm6, 1.0, %v6612_v11  ;;  %v4595_v47 = vsel %vm4343_vm6, 0.0, %v250_v61 }
 0x482   :  { %4532 = vst [vmem:[#allocation2 + $0x148] sm:$0xff] %v4993_v46 }
 0x483   :  { %v125_v7 = vld [vmem:[%s10005_s2 + $0x150] sm:$0xff] }
 0x484   :  { %4656 = vst [vmem:[%s10008_s5 + $0x138] sm:$0xff] %v4593_v57  ;;  %v188_v4 = vsub.f32 %v62_v35, %v125_v7  ;;  %v6334_v57 = vpop.f32.mrf.mxu0 }
 0x486   :  { %v251_v51 = vadd.f32 %v188_v4, %v125_v7  ;;  %v4214_v7 = vpop.f32.mrf.mxu1  ;;  %v3756_v37 = vpop.f32.mrf.mxu0 }
 0x487   :  { %v3757_v63 = vadd.f32 %v3756_v37, %v9023_v28 }
 0x488   :  { %vm4344_vm7 = vcmp.gt.f32.partialorder %v251_v51, %v4179_v8  ;;  %v6538_v61 = vpop.f32.mrf.mxu1  ;;  %v6337_v48 = vpop.f32.mrf.mxu0 }
 0x489   :  { %v4994_v33 = vsel %vm4344_vm7, 1.0, %v6612_v11  ;;  %v4596_v44 = vsel %vm4344_vm7, 0.0, %v251_v51  ;;  %v4203_v28 = vadd.f32 %v4202_v30, %v3757_v63  ;;  %v10561_v61 = vld [vmem:[#allocation83_spill] sm:$0xff] }
 0x48a   :  { %4533 = vst [vmem:[#allocation2 + $0x150] sm:$0xff] %v4994_v33 }
 0x48b   :  { %v126_v40 = vld [vmem:[%s10005_s2 + $0x158] sm:$0xff] }
 0x48c   :  { %4657 = vst [vmem:[%s10008_s5 + $0x140] sm:$0xff] %v4594_v54  ;;  %v189_v60 = vsub.f32 %v63_v43, %v126_v40  ;;  %v68_v54 = vld [vmem:[%s10004_s1 + $0x180] sm:$0xff]  ;;  %v4220_v43 = vpop.f32.mrf.mxu1 }
 0x48e   :  { %v252_v15 = vadd.f32 %v189_v60, %v126_v40  ;;  %v3762_v40 = vpop.f32.mrf.mxu0  ;;  %v6541_v51 = vpop.f32.mrf.mxu1 }
 0x48f   :  { %v3763_v62 = vadd.f32 %v3762_v40, %v10557_v24  ;;  %v10562_v51 = vld [vmem:[#allocation88_spill] sm:$0xff] }
 0x490   :  { %vm4345_vm8 = vcmp.gt.f32.partialorder %v252_v15, %v4185_v22  ;;  %v6340_v46 = vpop.f32.mrf.mxu0 }
 0x491   :  { %v4995_v41 = vsel %vm4345_vm8, 1.0, %v6612_v11  ;;  %v4597_v3 = vsel %vm4345_vm8, 0.0, %v252_v15 }
 0x492   :  { %4534 = vst [vmem:[#allocation2 + $0x158] sm:$0xff] %v4995_v41  ;;  %v3768_v8 = vpop.f32.mrf.mxu0 }
 0x493   :  { %v127_v18 = vld [vmem:[%s10005_s2 + $0x160] sm:$0xff]  ;;  %v3769_v15 = vadd.f32 %v3768_v8, %v10558_v17 }
 0x494   :  { %4658 = vst [vmem:[%s10008_s5 + $0x148] sm:$0xff] %v4595_v47  ;;  %v190_v9 = vsub.f32 %v64_v13, %v127_v18  ;;  %v69_v47 = vld [vmem:[%s10004_s1 + $0x188] sm:$0xff]  ;;  %v4209_v13 = vadd.f32 %v4208_v27, %v3763_v62 }
 0x496   :  { %v253_v38 = vadd.f32 %v190_v9, %v127_v18  ;;  %v4226_v18 = vpop.f32.mrf.mxu1 }
 0x498   :  { %vm4346_vm10 = vcmp.gt.f32.partialorder %v253_v38, %v4191_v39  ;;  %v6544_v49 = vpop.f32.mrf.mxu1 }
 0x499   :  { %v4996_v1 = vsel %vm4346_vm10, 1.0, %v6612_v11  ;;  %v4598_v23 = vsel %vm4346_vm10, 0.0, %v253_v38  ;;  %v10559_v38 = vld [vmem:[#allocation80_spill] sm:$0xff]  ;;  %v10563_v49 = vld [vmem:[#allocation86_spill] sm:$0xff] }
 0x49a   :  { %4535 = vst [vmem:[#allocation2 + $0x160] sm:$0xff] %v4996_v1  ;;  %v4232_v22 = vpop.f32.mrf.mxu1 }
 0x49b   :  { %v128_v20 = vld [vmem:[%s10005_s2 + $0x168] sm:$0xff] }
 0x49c   :  { %4659 = vst [vmem:[%s10008_s5 + $0x150] sm:$0xff] %v4596_v44  ;;  %v191_v21 = vsub.f32 %v65_v2, %v128_v20  ;;  %v6343_v44 = vpop.f32.mrf.mxu0  ;;  %v6547_v53 = vpop.f32.mrf.mxu1 }
 0x49d   :  { %v10564_v53 = vld [vmem:[#allocation91_spill] sm:$0xff] }
 0x49e   :  { %v254_v25 = vadd.f32 %v191_v21, %v128_v20  ;;  %v4215_v20 = vadd.f32 %v4214_v7, %v3769_v15  ;;  %v3774_v30 = vpop.f32.mrf.mxu0  ;;  %v4238_v27 = vpop.f32.mrf.mxu1 }
 0x49f   :  { %v3775_v59 = vadd.f32 %v3774_v30, %v10559_v38 }
 0x4a0   :  { %vm4347_vm9 = vcmp.gt.f32.partialorder %v254_v25, %v4197_v6  ;;  %v6346_v16 = vpop.f32.mrf.mxu0 }
 0x4a1   :  { %v4997_v45 = vsel %vm4347_vm9, 1.0, %v6612_v11  ;;  %v4599_v4 = vsel %vm4347_vm9, 0.0, %v254_v25  ;;  %v4221_v39 = vadd.f32 %v4220_v43, %v3775_v59 }
 0x4a2   :  { %4536 = vst [vmem:[#allocation2 + $0x168] sm:$0xff] %v4997_v45  ;;  %v3780_v56 = vpop.f32.mrf.mxu0 }
 0x4a3   :  { %v129_v29 = vld [vmem:[%s10005_s2 + $0x170] sm:$0xff]  ;;  %v3781_v34 = vadd.f32 %v3780_v56, %v10560_v32 }
 0x4a4   :  { %4660 = vst [vmem:[%s10008_s5 + $0x158] sm:$0xff] %v4597_v3  ;;  %v192_v12 = vsub.f32 %v66_v26, %v129_v29  ;;  %v71_v26 = vld [vmem:[%s10004_s1 + $0x198] sm:$0xff] }
 0x4a5   :  { %v4227_v7 = vadd.f32 %v4226_v18, %v3781_v34 }
 0x4a6   :  { %v255_v0 = vadd.f32 %v192_v12, %v129_v29  ;;  %v6550_v12 = vpop.f32.mrf.mxu1 }
 0x4a7   :  { %v10565_v12 = vld [vmem:[#allocation89_spill] sm:$0xff] }
 0x4a8   :  { %vm4348_vm3 = vcmp.gt.f32.partialorder %v255_v0, %v4203_v28  ;;  %v4244_v37 = vpop.f32.mrf.mxu1  ;;  %v73_v28 = vld [vmem:[%s10004_s1 + $0x1a8] sm:$0xff] }
 0x4a9   :  { %v4998_v50 = vsel %vm4348_vm3, 1.0, %v6612_v11  ;;  %v4600_v60 = vsel %vm4348_vm3, 0.0, %v255_v0 }
 0x4aa   :  { %4537 = vst [vmem:[#allocation2 + $0x170] sm:$0xff] %v4998_v50  ;;  %v6553_v45 = vpop.f32.mrf.mxu1 }
 0x4ab   :  { %v130_v35 = vld [vmem:[%s10005_s2 + $0x178] sm:$0xff]  ;;  %v10566_v45 = vld [vmem:[#allocation94_spill] sm:$0xff] }
 0x4ac   :  { %4661 = vst [vmem:[%s10008_s5 + $0x160] sm:$0xff] %v4598_v23  ;;  %v193_v10 = vsub.f32 %v67_v52, %v130_v35  ;;  %v6349_v52 = vpop.f32.mrf.mxu0 }
 0x4ae   :  { %v256_v55 = vadd.f32 %v193_v10, %v130_v35  ;;  %v72_v35 = vld [vmem:[%s10004_s1 + $0x1a0] sm:$0xff]  ;;  %v3786_v0 = vpop.f32.mrf.mxu0 }
 0x4af   :  { %v3787_v10 = vadd.f32 %v3786_v0, %v10561_v61 }
 0x4b0   :  { %vm4349_vm11 = vcmp.gt.f32.partialorder %v256_v55, %v4209_v13  ;;  %v74_v13 = vld [vmem:[%s10004_s1 + $0x1b0] sm:$0xff] }
 0x4b1   :  { %v4999_v9 = vsel %vm4349_vm11, 1.0, %v6612_v11  ;;  %v4601_v33 = vsel %vm4349_vm11, 0.0, %v256_v55  ;;  %v4233_v40 = vadd.f32 %v4232_v22, %v3787_v10  ;;  %v4250_v55 = vpop.f32.mrf.mxu1 }
 0x4b2   :  { %4538 = vst [vmem:[#allocation2 + $0x178] sm:$0xff] %v4999_v9 }
 0x4b3   :  { %v131_v5 = vld [vmem:[%s10005_s2 + $0x180] sm:$0xff]  ;;  %v6556_v50 = vpop.f32.mrf.mxu1 }
 0x4b4   :  { %4662 = vst [vmem:[%s10008_s5 + $0x168] sm:$0xff] %v4599_v4  ;;  %v194_v36 = vsub.f32 %v68_v54, %v131_v5  ;;  %v10567_v50 = vld [vmem:[#allocation92_spill] sm:$0xff] }
 0x4b6   :  { %v257_v42 = vadd.f32 %v194_v36, %v131_v5  ;;  %v6352_v5 = vpop.f32.mrf.mxu0 }
 0x4b8   :  { %vm4350_vm12 = vcmp.gt.f32.partialorder %v257_v42, %v4215_v20  ;;  %v3792_v24 = vpop.f32.mrf.mxu0  ;;  %v75_v20 = vld [vmem:[%s10004_s1 + $0x1b8] sm:$0xff] }
 0x4b9   :  { %v5000_v41 = vsel %vm4350_vm12, 1.0, %v6612_v11  ;;  %v4602_v3 = vsel %vm4350_vm12, 0.0, %v257_v42  ;;  %v3793_v36 = vadd.f32 %v3792_v24, %v10562_v51  ;;  %v4256_v42 = vpop.f32.mrf.mxu1 }
 0x4ba   :  { %4539 = vst [vmem:[#allocation2 + $0x180] sm:$0xff] %v5000_v41 }
 0x4bb   :  { %v132_v58 = vld [vmem:[%s10005_s2 + $0x188] sm:$0xff]  ;;  %v4239_v8 = vadd.f32 %v4238_v27, %v3793_v36  ;;  %v6559_v9 = vpop.f32.mrf.mxu1 }
 0x4bc   :  { %4663 = vst [vmem:[%s10008_s5 + $0x170] sm:$0xff] %v4600_v60  ;;  %v195_v19 = vsub.f32 %v69_v47, %v132_v58  ;;  %v10568_v9 = vld [vmem:[#allocation96_spill] sm:$0xff] }
 0x4be   :  { %v258_v14 = vadd.f32 %v195_v19, %v132_v58  ;;  %v6355_v58 = vpop.f32.mrf.mxu0 }
 0x4c0   :  { %vm4351_vm13 = vcmp.gt.f32.partialorder %v258_v14, %v4221_v39  ;;  %v3798_v17 = vpop.f32.mrf.mxu0  ;;  %v76_v39 = vld [vmem:[%s10004_s1 + $0x1c0] sm:$0xff] }
 0x4c1   :  { %v5001_v23 = vsel %vm4351_vm13, 1.0, %v6612_v11  ;;  %v4603_v57 = vsel %vm4351_vm13, 0.0, %v258_v14  ;;  %v3799_v19 = vadd.f32 %v3798_v17, %v10563_v49  ;;  %v4262_v14 = vpop.f32.mrf.mxu1 }
 0x4c2   :  { %4540 = vst [vmem:[#allocation2 + $0x188] sm:$0xff] %v5001_v23 }
 0x4c3   :  { %v133_v2 = vld [vmem:[%s10005_s2 + $0x190] sm:$0xff]  ;;  %v4245_v30 = vadd.f32 %v4244_v37, %v3799_v19  ;;  %v6562_v41 = vpop.f32.mrf.mxu1 }
 0x4c4   :  { %4664 = vst [vmem:[%s10008_s5 + $0x178] sm:$0xff] %v4601_v33  ;;  %v196_v21 = vsub.f32 %v70_v31, %v133_v2  ;;  %v10569_v41 = vld [vmem:[#allocation98_spill] sm:$0xff] }
 0x4c6   :  { %v259_v25 = vadd.f32 %v196_v21, %v133_v2  ;;  %v6358_v2 = vpop.f32.mrf.mxu0 }
 0x4c8   :  { %vm4352_vm14 = vcmp.gt.f32.partialorder %v259_v25, %v4227_v7  ;;  %v3804_v38 = vpop.f32.mrf.mxu0  ;;  %v77_v7 = vld [vmem:[%s10004_s1 + $0x1c8] sm:$0xff] }
 0x4c9   :  { %v5002_v48 = vsel %vm4352_vm14, 1.0, %v6612_v11  ;;  %v4604_v54 = vsel %vm4352_vm14, 0.0, %v259_v25  ;;  %v3805_v21 = vadd.f32 %v3804_v38, %v10564_v53  ;;  %v4268_v25 = vpop.f32.mrf.mxu1 }
 0x4ca   :  { %4541 = vst [vmem:[#allocation2 + $0x190] sm:$0xff] %v5002_v48 }
 0x4cb   :  { %v134_v29 = vld [vmem:[%s10005_s2 + $0x198] sm:$0xff]  ;;  %v4251_v56 = vadd.f32 %v4250_v55, %v3805_v21  ;;  %v6565_v23 = vpop.f32.mrf.mxu1 }
 0x4cc   :  { %4665 = vst [vmem:[%s10008_s5 + $0x180] sm:$0xff] %v4602_v3  ;;  %v197_v1 = vsub.f32 %v71_v26, %v134_v29  ;;  %v10570_v23 = vld [vmem:[#allocation6_spill] sm:$0xff] }
 0x4ce   :  { %v260_v63 = vadd.f32 %v197_v1, %v134_v29  ;;  %v6361_v29 = vpop.f32.mrf.mxu0 }
 0x4d0   :  { %vm4353_vm15 = vcmp.gt.f32.partialorder %v260_v63, %v4233_v40  ;;  %v3810_v32 = vpop.f32.mrf.mxu0  ;;  %v78_v40 = vld [vmem:[%s10004_s1 + $0x1d0] sm:$0xff] }
 0x4d1   :  { %v5003_v46 = vsel %vm4353_vm15, 1.0, %v6612_v11  ;;  %v4605_v47 = vsel %vm4353_vm15, 0.0, %v260_v63  ;;  %v3811_v1 = vadd.f32 %v3810_v32, %v10565_v12  ;;  %v4274_v63 = vpop.f32.mrf.mxu1 }
 0x4d2   :  { %4542 = vst [vmem:[#allocation2 + $0x198] sm:$0xff] %v5003_v46 }
 0x4d3   :  { %v135_v6 = vld [vmem:[%s10005_s2 + $0x1a0] sm:$0xff]  ;;  %v4257_v0 = vadd.f32 %v4256_v42, %v3811_v1  ;;  %v6568_v48 = vpop.f32.mrf.mxu1 }
 0x4d4   :  { %4666 = vst [vmem:[%s10008_s5 + $0x188] sm:$0xff] %v4603_v57  ;;  %v198_v4 = vsub.f32 %v72_v35, %v135_v6 }
 0x4d6   :  { %v261_v62 = vadd.f32 %v198_v4, %v135_v6  ;;  %v6364_v6 = vpop.f32.mrf.mxu0 }
 0x4d8   :  { %vm4354_vm0 = vcmp.gt.f32.partialorder %v261_v62, %v4239_v8  ;;  %v3816_v61 = vpop.f32.mrf.mxu0  ;;  %v79_v8 = vld [vmem:[%s10004_s1 + $0x1d8] sm:$0xff] }
 0x4d9   :  { %v5004_v44 = vsel %vm4354_vm0, 1.0, %v6612_v11  ;;  %v4606_v31 = vsel %vm4354_vm0, 0.0, %v261_v62  ;;  %v3817_v4 = vadd.f32 %v3816_v61, %v10566_v45  ;;  %v4280_v62 = vpop.f32.mrf.mxu1 }
 0x4da   :  { %4543 = vst [vmem:[#allocation2 + $0x1a0] sm:$0xff] %v5004_v44 }
 0x4db   :  { %v136_v43 = vld [vmem:[%s10005_s2 + $0x1a8] sm:$0xff]  ;;  %v4263_v24 = vadd.f32 %v4262_v14, %v3817_v4  ;;  %v6571_v46 = vpop.f32.mrf.mxu1  ;;  %v10571_v4 = vld [vmem:[#allocation8_spill] sm:$0xff] }
 0x4dc   :  { %4667 = vst [vmem:[%s10008_s5 + $0x190] sm:$0xff] %v4604_v54  ;;  %v199_v60 = vsub.f32 %v73_v28, %v136_v43 }
 0x4de   :  { %v262_v15 = vadd.f32 %v199_v60, %v136_v43  ;;  %v6367_v43 = vpop.f32.mrf.mxu0 }
 0x4e0   :  { %vm4355_vm1 = vcmp.gt.f32.partialorder %v262_v15, %v4245_v30  ;;  %v3822_v51 = vpop.f32.mrf.mxu0  ;;  %v80_v30 = vld [vmem:[%s10004_s1 + $0x1e0] sm:$0xff] }
 0x4e1   :  { %v5005_v16 = vsel %vm4355_vm1, 1.0, %v6612_v11  ;;  %v4607_v26 = vsel %vm4355_vm1, 0.0, %v262_v15  ;;  %v3823_v60 = vadd.f32 %v3822_v51, %v10567_v50  ;;  %v4286_v15 = vpop.f32.mrf.mxu1 }
 0x4e2   :  { %4544 = vst [vmem:[#allocation2 + $0x1a8] sm:$0xff] %v5005_v16 }
 0x4e3   :  { %v137_v18 = vld [vmem:[%s10005_s2 + $0x1b0] sm:$0xff]  ;;  %v4269_v17 = vadd.f32 %v4268_v25, %v3823_v60  ;;  %v6574_v44 = vpop.f32.mrf.mxu1 }
 0x4e4   :  { %4668 = vst [vmem:[%s10008_s5 + $0x198] sm:$0xff] %v4605_v47  ;;  %v200_v33 = vsub.f32 %v74_v13, %v137_v18 }
 0x4e6   :  { %v263_v59 = vadd.f32 %v200_v33, %v137_v18  ;;  %v6370_v18 = vpop.f32.mrf.mxu0 }
 0x4e8   :  { %vm4356_vm2 = vcmp.gt.f32.partialorder %v263_v59, %v4251_v56  ;;  %v3828_v49 = vpop.f32.mrf.mxu0  ;;  %v81_v56 = vld [vmem:[%s10004_s1 + $0x1e8] sm:$0xff] }
 0x4e9   :  { %v5006_v52 = vsel %vm4356_vm2, 1.0, %v6612_v11  ;;  %v4608_v35 = vsel %vm4356_vm2, 0.0, %v263_v59  ;;  %v3829_v33 = vadd.f32 %v3828_v49, %v10568_v9  ;;  %v4292_v59 = vpop.f32.mrf.mxu1 }
 0x4ea   :  { %4545 = vst [vmem:[#allocation2 + $0x1b0] sm:$0xff] %v5006_v52 }
 0x4eb   :  { %v138_v22 = vld [vmem:[%s10005_s2 + $0x1b8] sm:$0xff]  ;;  %v4275_v38 = vadd.f32 %v4274_v63, %v3829_v33  ;;  %v6577_v16 = vpop.f32.mrf.mxu1 }
 0x4ec   :  { %4669 = vst [vmem:[%s10008_s5 + $0x1a0] sm:$0xff] %v4606_v31  ;;  %v201_v3 = vsub.f32 %v75_v20, %v138_v22 }
 0x4ee   :  { %v264_v34 = vadd.f32 %v201_v3, %v138_v22  ;;  %v6373_v22 = vpop.f32.mrf.mxu0 }
 0x4f0   :  { %vm4357_vm4 = vcmp.gt.f32.partialorder %v264_v34, %v4257_v0  ;;  %v3834_v53 = vpop.f32.mrf.mxu0  ;;  %v82_v0 = vld [vmem:[%s10004_s1 + $0x1f0] sm:$0xff] }
 0x4f1   :  { %v5007_v5 = vsel %vm4357_vm4, 1.0, %v6612_v11  ;;  %v4609_v28 = vsel %vm4357_vm4, 0.0, %v264_v34  ;;  %v3835_v3 = vadd.f32 %v3834_v53, %v10569_v41  ;;  %v4298_v34 = vpop.f32.mrf.mxu1 }
 0x4f2   :  { %4546 = vst [vmem:[#allocation2 + $0x1b8] sm:$0xff] %v5007_v5 }
 0x4f3   :  { %v139_v27 = vld [vmem:[%s10005_s2 + $0x1c0] sm:$0xff]  ;;  %v4281_v32 = vadd.f32 %v4280_v62, %v3835_v3  ;;  %v6580_v52 = vpop.f32.mrf.mxu1  ;;  %v10572_v62 = vld [vmem:[#allocation5_spill] sm:$0xff] }
 0x4f4   :  { %4670 = vst [vmem:[%s10008_s5 + $0x1a8] sm:$0xff] %v4607_v26  ;;  %v202_v57 = vsub.f32 %v76_v39, %v139_v27 }
 0x4f6   :  { %v265_v10 = vadd.f32 %v202_v57, %v139_v27  ;;  %v6376_v27 = vpop.f32.mrf.mxu0 }
 0x4f8   :  { %vm4358_vm5 = vcmp.gt.f32.partialorder %v265_v10, %v4263_v24  ;;  %v3840_v12 = vpop.f32.mrf.mxu0 }
 0x4f9   :  { %v5008_v58 = vsel %vm4358_vm5, 1.0, %v6612_v11  ;;  %v4610_v13 = vsel %vm4358_vm5, 0.0, %v265_v10  ;;  %v3841_v57 = vadd.f32 %v3840_v12, %v10570_v23 }
 0x4fa   :  { %4547 = vst [vmem:[#allocation2 + $0x1c0] sm:$0xff] %v5008_v58 }
 0x4fb   :  { %v140_v37 = vld [vmem:[%s10005_s2 + $0x1c8] sm:$0xff]  ;;  %v4287_v61 = vadd.f32 %v4286_v15, %v3841_v57 }
 0x4fc   :  { %4671 = vst [vmem:[%s10008_s5 + $0x1b0] sm:$0xff] %v4608_v35  ;;  %v203_v54 = vsub.f32 %v77_v7, %v140_v37 }
 0x4fe   :  { %v266_v36 = vadd.f32 %v203_v54, %v140_v37  ;;  %v6379_v37 = vpop.f32.mrf.mxu0 }
 0x500   :  { %vm4359_vm6 = vcmp.gt.f32.partialorder %v266_v36, %v4269_v17  ;;  %v3846_v10 = vpop.f32.mrf.mxu0 }
 0x501   :  { %v5009_v2 = vsel %vm4359_vm6, 1.0, %v6612_v11  ;;  %v4611_v20 = vsel %vm4359_vm6, 0.0, %v266_v36  ;;  %v3847_v48 = vadd.f32 %v3846_v10, %v10571_v4 }
 0x502   :  { %4548 = vst [vmem:[#allocation2 + $0x1c8] sm:$0xff] %v5009_v2  ;;  %v6382_v43 = vpop.f32.mrf.mxu0 }
 0x503   :  { %v141_v55 = vld [vmem:[%s10005_s2 + $0x1d0] sm:$0xff] }
 0x504   :  { %4672 = vst [vmem:[%s10008_s5 + $0x1b8] sm:$0xff] %v4609_v28  ;;  %v204_v47 = vsub.f32 %v78_v40, %v141_v55  ;;  %v4293_v40 = vadd.f32 %v4292_v59, %v3847_v48 }
 0x506   :  { %v267_v19 = vadd.f32 %v204_v47, %v141_v55  ;;  %v3852_v55 = vpop.f32.mrf.mxu0 }
 0x507   :  { %v3853_v51 = vadd.f32 %v3852_v55, %v10572_v62 }
 0x508   :  { %vm4360_vm7 = vcmp.gt.f32.partialorder %v267_v19, %v4275_v38  ;;  %v6385_v60 = vpop.f32.mrf.mxu0 }
 0x509   :  { %v5010_v29 = vsel %vm4360_vm7, 1.0, %v6612_v11  ;;  %v4612_v39 = vsel %vm4360_vm7, 0.0, %v267_v19  ;;  %v4299_v46 = vadd.f32 %v4298_v34, %v3853_v51 }
 0x50a   :  { %4549 = vst [vmem:[#allocation2 + $0x1d0] sm:$0xff] %v5010_v29 }
 0x50b   :  { %v142_v42 = vld [vmem:[%s10005_s2 + $0x1d8] sm:$0xff] }
 0x50c   :  { %4673 = vst [vmem:[%s10008_s5 + $0x1c0] sm:$0xff] %v4610_v13  ;;  %v205_v31 = vsub.f32 %v79_v8, %v142_v42 }
 0x50e   :  { %v268_v21 = vadd.f32 %v205_v31, %v142_v42 }
 0x510   :  { %vm4361_vm8 = vcmp.gt.f32.partialorder %v268_v21, %v4281_v32 }
 0x511   :  { %v5011_v6 = vsel %vm4361_vm8, 1.0, %v6612_v11  ;;  %v4613_v7 = vsel %vm4361_vm8, 0.0, %v268_v21 }
 0x512   :  { %4550 = vst [vmem:[#allocation2 + $0x1d8] sm:$0xff] %v5011_v6 }
 0x513   :  { %v143_v14 = vld [vmem:[%s10005_s2 + $0x1e0] sm:$0xff] }
 0x514   :  { %4674 = vst [vmem:[%s10008_s5 + $0x1c8] sm:$0xff] %v4611_v20  ;;  %v206_v26 = vsub.f32 %v80_v30, %v143_v14 }
 0x516   :  { %v269_v1 = vadd.f32 %v206_v26, %v143_v14 }
 0x518   :  { %vm4362_vm10 = vcmp.gt.f32.partialorder %v269_v1, %v4287_v61 }
 0x519   :  { %v5012_v5 = vsel %vm4362_vm10, 1.0, %v6612_v11  ;;  %v4614_v28 = vsel %vm4362_vm10, 0.0, %v269_v1 }
 0x51a   :  { %4551 = vst [vmem:[#allocation2 + $0x1e0] sm:$0xff] %v5012_v5 }
 0x51b   :  { %v144_v25 = vld [vmem:[%s10005_s2 + $0x1e8] sm:$0xff] }
 0x51c   :  { %4675 = vst [vmem:[%s10008_s5 + $0x1d0] sm:$0xff] %v4612_v39  ;;  %v207_v35 = vsub.f32 %v81_v56, %v144_v25 }
 0x51e   :  { %v270_v45 = vadd.f32 %v207_v35, %v144_v25 }
 0x520   :  { %vm4363_vm9 = vcmp.gt.f32.partialorder %v270_v45, %v4293_v40 }
 0x521   :  { %v5013_v36 = vsel %vm4363_vm9, 1.0, %v6612_v11  ;;  %v4615_v50 = vsel %vm4363_vm9, 0.0, %v270_v45 }
 0x522   :  { %4552 = vst [vmem:[#allocation2 + $0x1e8] sm:$0xff] %v5013_v36 }
 0x523   :  { %v145_v63 = vld [vmem:[%s10005_s2 + $0x1f0] sm:$0xff]  ;;  %s6614_s2 = smov [#allocation2]  }
 0x524   :  { %4676 = vst [vmem:[%s10008_s5 + $0x1d8] sm:$0xff] %v4613_v7  ;;  %v208_v54 = vsub.f32 %v82_v0, %v145_v63  ;;  %4677 = vst [vmem:[%s10008_s5 + $0x1e0] sm:$0xff] %v4614_v28  ;;  %s4685_s18 = sshll.u32 %s6614_s2, 4  ;;  %s4686_s18 = int_to_ptr.vmem [resolvable:$true] %s4685_s18 }
 0x525   :  { %4678 = vst [vmem:[%s10008_s5 + $0x1e8] sm:$0xff] %v4615_v50  ;;  %s6589_s0 = scalar_lea.vmem %s4686_s18, 8064  ;;  %p6594_p1 = scmp.lt.s32.totalorder %s4686_s18, %s4686_s18 }
 0x526   :  { %v271_v24 = vadd.f32 %v208_v54, %v145_v63  ;;  %p6590_p0 = scmp.ne.s32.totalorder %s4686_s18, %s6589_s0  ;;  %p6595_p2 = scmp.lt.s32.totalorder %s6589_s0, %s6589_s0 }
 0x528   :  { %vm4364_vm3 = vcmp.gt.f32.partialorder %v271_v24, %v4299_v46  ;;  %p6596_p3 = por %p6595_p2, %p6594_p1 }
 0x529   :  { %v5014_v47 = vsel %vm4364_vm3, 1.0, %v6612_v11  ;;  %v4616_v58 = vsel %vm4364_vm3, 0.0, %v271_v24 }
 0x52a   :  { %4553 = vst [vmem:[#allocation2 + $0x1f0] sm:$0xff] %v5014_v47  ;;  %4679 = vst [vmem:[%s10008_s5 + $0x1f0] sm:$0xff] %v4616_v58  ;;  %p6597_p4 = pnand %p6596_p3, %p6590_p0 }
 0x52c   :  { %6600 = shalt.err (!%p6597_p4)
}
 0x52d   :  { %s6615_s23 = smov 128   ;;  %s6616_s24 = smov 8  }
 0x52e   :  { %4691 = dma.vmem_to_hbm [thread:$0]  %s4686_s18, 8064, %s10007_s4, [#allocation3], %s6615_s23, %s6615_s23, %s6616_s24  }
 0x52f   :  { %6609 = dma.done.wait [#allocation3], 8064  }
 0x530   :  { %6610 = vsyncadd [#allocation3], 4294959232 }
 0x531   :  { %4699 = vsyncpa [#allocation3], 1 }

</bundles_post_ra>
